<compile_context>
chip_gen: v5e
topology: v5e:2x2
jax: 0.10.0
libtpu: 0.0.40
codegen_flags: <defaults>
</compile_context>

<pallas_src>
import functools

import jax
import jax.numpy as jnp
from jax.experimental import pallas as pl
from jax.experimental.pallas import tpu as pltpu

LATENT_DIM = 20
IN_DIM = 784
HID_DIM = 400


def _cdiv(a, b):
    return -(-a // b)


def _round_up(v, m):
    return _cdiv(v, m) * m


# ----------------------------------------------------------------------------
# Feature detection: single-buffered (resident) weight blocks via Buffered(1).
# ----------------------------------------------------------------------------
def _sb_copy_kernel(x_ref, o_ref):
    o_ref[...] = x_ref[...]


@functools.lru_cache(maxsize=None)
def _single_buffer_weights_supported():
    """True if pl.BlockSpec(..., pipeline_mode=pl.Buffered(1)) compiles here."""
    try:
        f = pl.pallas_call(
            _sb_copy_kernel,
            out_shape=jax.ShapeDtypeStruct((8, 128), jnp.float32),
            grid=(1,),
            in_specs=[pl.BlockSpec((8, 128), lambda i: (0, 0),
                                   pipeline_mode=pl.Buffered(1))],
            out_specs=pl.BlockSpec((8, 128), lambda i: (0, 0)),
        )
        jax.jit(f).lower(jax.ShapeDtypeStruct((8, 128), jnp.float32)).compile()
        return True
    except Exception:
        return False


# ----------------------------------------------------------------------------
# Fused VAE kernel: fc1 -> relu -> fc2 -> relu -> [fc31||fc32] head
#                   -> rsample -> fc4 -> relu -> fc5 -> relu -> fc6
# ----------------------------------------------------------------------------
def _vae_kernel(x_ref, eps_ref,
                w1_ref, b1_ref, w2_ref, b2_ref, w3_ref, b3_ref,
                w4_ref, b4_ref, w5_ref, b5_ref, w6_ref, b6_ref,
                head_ref, z_ref, logits_ref):
    f32 = jnp.float32
    bf16 = jnp.bfloat16
    L = LATENT_DIM

    # --- encoder ---
    x = x_ref[...].astype(bf16)
    h1 = jnp.maximum(
        jnp.dot(x, w1_ref[...], preferred_element_type=f32) + b1_ref[...], 0.0)
    h2 = jnp.maximum(
        jnp.dot(h1.astype(bf16), w2_ref[...], preferred_element_type=f32)
        + b2_ref[...], 0.0)
    # single (400, 2L) head matmul: [:, :L] -> mean, [:, L:] -> exp -> std
    head = (jnp.dot(h2.astype(bf16), w3_ref[...], preferred_element_type=f32)
            + b3_ref[...])
    exph = jnp.exp(head)
    # [mean || std] written via a VPU select on a lane mask (no lane-axis concat)
    lane = jax.lax.broadcasted_iota(jnp.int32, head.shape, 1)
    head_ref[...] = jnp.where(lane >= L, exph, head)
    mean = head[:, :L]
    std = exph[:, L:]

    # --- reparameterization (rsample with k samples) ---
    eps = eps_ref[...]                                   # (k, TB, L) f32
    z = mean[None, :, :] + std[None, :, :] * eps
    z_ref[...] = z

    # --- decoder, one k-sample at a time (k is a static Python int) ---
    k = eps.shape[0]
    for s in range(k):
        zs = z[s].astype(bf16)                           # (TB, L)
        h4 = jnp.maximum(
            jnp.dot(zs, w4_ref[...], preferred_element_type=f32)
            + b4_ref[...], 0.0)
        h5 = jnp.maximum(
            jnp.dot(h4.astype(bf16), w5_ref[...], preferred_element_type=f32)
            + b5_ref[...], 0.0)
        logits = (jnp.dot(h5.astype(bf16), w6_ref[...],
                          preferred_element_type=f32) + b6_ref[...])
        logits_ref[s] = logits.astype(logits_ref.dtype)  # bf16 writeback


# ----------------------------------------------------------------------------
# Wrapper: batch tiling + pallas_call
# ----------------------------------------------------------------------------
def _vae_pallas(x2d, eps, kp, *, tb=512):
    B = x2d.shape[0]
    k = eps.shape[0]
    L = LATENT_DIM

    # Batch tile: large enough to amortize per-grid-step overhead, but always
    # at least two grid tiles (rows padded to a multiple of 8) so the batch
    # axis can shard across v7x's two TensorCores.
    TB = min(tb, max(8, _round_up(_cdiv(B, 2), 8)))
    nblk = max(2, _cdiv(B, TB))
    Bp = nblk * TB
    if Bp != B:
        x2d = jnp.pad(x2d, ((0, Bp - B), (0, 0)))
        eps = jnp.pad(eps, ((0, 0), (0, Bp - B), (0, 0)))

    single_buf = _single_buffer_weights_supported()

    def wspec(shape):
        # weight / bias blocks: full array, constant block index -> stays
        # resident in VMEM across grid iterations (no re-DMA); single-buffered
        # when the runtime supports it (they are never re-fetched).
        idx_map = lambda i: (0,) * len(shape)
        if single_buf:
            return pl.BlockSpec(shape, idx_map, pipeline_mode=pl.Buffered(1))
        return pl.BlockSpec(shape, idx_map)

    in_specs = [
        pl.BlockSpec((TB, IN_DIM), lambda i: (i, 0)),        # x tile
        pl.BlockSpec((k, TB, L), lambda i: (0, i, 0)),       # eps tile
        wspec((IN_DIM, HID_DIM)), wspec((1, HID_DIM)),       # fc1
        wspec((HID_DIM, HID_DIM)), wspec((1, HID_DIM)),      # fc2
        wspec((HID_DIM, 2 * L)), wspec((1, 2 * L)),          # fc31||fc32
        wspec((L, HID_DIM)), wspec((1, HID_DIM)),            # fc4
        wspec((HID_DIM, HID_DIM)), wspec((1, HID_DIM)),      # fc5
        wspec((HID_DIM, IN_DIM)), wspec((1, IN_DIM)),        # fc6
    ]
    out_specs = (
        pl.BlockSpec((TB, 2 * L), lambda i: (i, 0)),         # [mean || std]
        pl.BlockSpec((k, TB, L), lambda i: (0, i, 0)),       # z
        pl.BlockSpec((k, TB, IN_DIM), lambda i: (0, i, 0)),  # logits (bf16)
    )
    out_shapes = (
        jax.ShapeDtypeStruct((Bp, 2 * L), jnp.float32),
        jax.ShapeDtypeStruct((k, Bp, L), jnp.float32),
        jax.ShapeDtypeStruct((k, Bp, IN_DIM), jnp.bfloat16),
    )

    # Advisory cost estimate for XLA's scheduler around the custom call.
    enc_flops = 2 * Bp * (IN_DIM * HID_DIM + HID_DIM * HID_DIM
                          + HID_DIM * 2 * L)
    dec_flops = 2 * k * Bp * (L * HID_DIM + HID_DIM * HID_DIM
                              + HID_DIM * IN_DIM)
    weight_bytes = 2 * (IN_DIM * HID_DIM + 2 * HID_DIM * HID_DIM
                        + HID_DIM * 2 * L + L * HID_DIM + HID_DIM * IN_DIM)
    bias_bytes = 4 * (4 * HID_DIM + 2 * L + IN_DIM)
    bytes_accessed = (Bp * IN_DIM * 4                      # x in (f32)
                      + k * Bp * L * 4                     # eps in
                      + weight_bytes + bias_bytes
                      + Bp * 2 * L * 4                     # head out
                      + k * Bp * L * 4                     # z out
                      + k * Bp * IN_DIM * 2)               # logits out (bf16)
    cost = pl.CostEstimate(flops=enc_flops + dec_flops,
                           transcendentals=Bp * 2 * L,
                           bytes_accessed=bytes_accessed)

    head, z, logits = pl.pallas_call(
        _vae_kernel,
        out_shape=out_shapes,
        grid=(nblk,),
        in_specs=in_specs,
        out_specs=out_specs,
        compiler_params=pltpu.CompilerParams(
            dimension_semantics=("parallel",),
            # Above v5e's 16 MiB default scoped limit, below v7x's 64 MiB
            # physical VMEM.
            vmem_limit_bytes=48 * 1024 * 1024),
        cost_estimate=cost,
    )(x2d, eps,
      kp["w1"], kp["b1"], kp["w2"], kp["b2"], kp["w3"], kp["b3"],
      kp["w4"], kp["b4"], kp["w5"], kp["b5"], kp["w6"], kp["b6"])

    mean = head[:B, :LATENT_DIM]
    std = head[:B, LATENT_DIM:]
    return mean, std, z[:, :B], logits[:, :B]


# ----------------------------------------------------------------------------
# Parameter init (deterministic, PyTorch nn.Linear-style uniform(+-1/sqrt(in)))
# ----------------------------------------------------------------------------
def init_params(key):
    dims = {
        "1": (IN_DIM, HID_DIM),
        "2": (HID_DIM, HID_DIM),
        "31": (HID_DIM, LATENT_DIM),
        "32": (HID_DIM, LATENT_DIM),
        "4": (LATENT_DIM, HID_DIM),
        "5": (HID_DIM, HID_DIM),
        "6": (HID_DIM, IN_DIM),
    }
    params = {}
    keys = jax.random.split(key, 2 * len(dims))
    for i, (name, (fan_in, fan_out)) in enumerate(dims.items()):
        bound = 1.0 / (fan_in ** 0.5)
        params["w" + name] = jax.random.uniform(
            keys[2 * i], (fan_in, fan_out), jnp.float32, -bound, bound)
        # bias kept 2D (1, out) for TPU-friendly layout; broadcasts over rows.
        params["b" + name] = jax.random.uniform(
            keys[2 * i + 1], (1, fan_out), jnp.float32, -bound, bound)
    return params


def prepare_kernel_params(params):
    """Kernel layout: bf16 weights, f32 biases, fc31||fc32 concatenated head."""
    kp = {}
    for n in ("1", "2", "4", "5", "6"):
        kp["w" + n] = params["w" + n].astype(jnp.bfloat16)
        kp["b" + n] = params["b" + n]
    kp["w3"] = jnp.concatenate(
        [params["w31"], params["w32"]], axis=1).astype(jnp.bfloat16)
    kp["b3"] = jnp.concatenate([params["b31"], params["b32"]], axis=1)
    return kp


# ----------------------------------------------------------------------------
# VAE forward
# ----------------------------------------------------------------------------
@functools.partial(jax.jit, static_argnames=("k", "tb"))
def vae_forward(x, kernel_params, eps_key, k=1, tb=512):
    B = x.shape[0]
    x2d = x.reshape(B, IN_DIM)                           # x.view(-1, 784)
    # TODO(synk): eps could be drawn in-kernel (pltpu.prng_seed + stateful
    # normal) to drop this separate RNG launch, but is kept as an explicit
    # jax.random input so rsample stays reproducible/verifiable bit-for-bit.
    eps = jax.random.normal(eps_key, (k, B, LATENT_DIM), jnp.float32)
    mean, std, z, logits = _vae_pallas(x2d, eps, kernel_params, tb=tb)
    # TODO(synk): torch.distributions Normal/Bernoulli objects have no Pallas
    # equivalent; their parameters (mean, std) and logits are returned instead.
    return (mean, std), z, logits


def _reference_forward(x, kp, eps):
    # plain-JAX reference with identical bf16-weight / f32-accumulate precision
    bf16, f32 = jnp.bfloat16, jnp.float32
    L = LATENT_DIM

    def lin(h, w, b):
        return jnp.dot(h.astype(bf16), w, preferred_element_type=f32) + b

    B = x.shape[0]
    x2d = x.reshape(B, IN_DIM)
    h = jnp.maximum(lin(x2d, kp["w1"], kp["b1"]), 0.0)
    h = jnp.maximum(lin(h, kp["w2"], kp["b2"]), 0.0)
    head = lin(h, kp["w3"], kp["b3"])
    mean = head[:, :L]
    std = jnp.exp(head[:, L:])
    z = mean[None] + std[None] * eps
    k = eps.shape[0]
    d = jnp.maximum(lin(z.reshape(k * B, L), kp["w4"], kp["b4"]), 0.0)
    d = jnp.maximum(lin(d, kp["w5"], kp["b5"]), 0.0)
    logits = lin(d, kp["w6"], kp["b6"]).reshape(k, B, IN_DIM)
    return mean, std, z, logits


if __name__ == "__main__":
    key = jax.random.PRNGKey(0)
    pkey, xkey, ekey = jax.random.split(key, 3)

    params = init_params(pkey)
    kparams = prepare_kernel_params(params)

    # Warm the single-buffer feature detection outside the jit trace.
    _single_buffer_weights_supported()

    # batch=2 MNIST-shaped input (NCHW), flattened to (2, 784) inside forward.
    B, k = 2, 1
    x = jax.random.normal(xkey, (B, 1, 28, 28), jnp.float32)

    (mean, std), z, logits = vae_forward(x, kparams, ekey, k=k)
    jax.block_until_ready((mean, std, z, logits))

    # verify against a pure-JAX reference using the same bf16-weight precision
    eps = jax.random.normal(ekey, (k, B, LATENT_DIM), jnp.float32)
    r_mean, r_std, r_z, r_logits = _reference_forward(x, kparams, eps)
    assert jnp.allclose(mean, r_mean, atol=1e-2, rtol=1e-2)
    assert jnp.allclose(std, r_std, atol=1e-2, rtol=1e-2)
    assert jnp.allclose(z, r_z, atol=1e-2, rtol=1e-2)
    assert jnp.allclose(logits.astype(jnp.float32), r_logits,
                        atol=2e-2, rtol=2e-2)

    print("KERNEL_OK")
</pallas_src>

<mosaic_0001>
module attributes {stable_mosaic.version = 11 : i64} {
  func.func @_vae_kernel(%arg0: i32, %arg1: memref<8x784xf32, #tpu.memory_space<vmem>>, %arg2: memref<1x8x20xf32, #tpu.memory_space<vmem>>, %arg3: memref<784x400xbf16, #tpu.memory_space<vmem>>, %arg4: memref<1x400xf32, #tpu.memory_space<vmem>>, %arg5: memref<400x400xbf16, #tpu.memory_space<vmem>>, %arg6: memref<1x400xf32, #tpu.memory_space<vmem>>, %arg7: memref<400x40xbf16, #tpu.memory_space<vmem>>, %arg8: memref<1x40xf32, #tpu.memory_space<vmem>>, %arg9: memref<20x400xbf16, #tpu.memory_space<vmem>>, %arg10: memref<1x400xf32, #tpu.memory_space<vmem>>, %arg11: memref<400x400xbf16, #tpu.memory_space<vmem>>, %arg12: memref<1x400xf32, #tpu.memory_space<vmem>>, %arg13: memref<400x784xbf16, #tpu.memory_space<vmem>>, %arg14: memref<1x784xf32, #tpu.memory_space<vmem>>, %arg15: memref<8x40xf32, #tpu.memory_space<vmem>>, %arg16: memref<1x8x20xf32, #tpu.memory_space<vmem>>, %arg17: memref<1x8x784xbf16, #tpu.memory_space<vmem>>) attributes {dimension_semantics = [#tpu.dimension_semantics<parallel>], iteration_bounds = array<i64: 2>, scalar_prefetch = 0 : i64, scratch_operands = 0 : i64, tpu.core_type = #tpu.core_type<tc>, window_params = [{transform_indices = @transform_0, window_bounds = array<i64: 8, 784>}, {transform_indices = @transform_1, window_bounds = array<i64: 1, 8, 20>}, {pipeline_mode = #tpu.pipeline_mode<synchronous>, transform_indices = @transform_2, window_bounds = array<i64: 784, 400>}, {pipeline_mode = #tpu.pipeline_mode<synchronous>, transform_indices = @transform_3, window_bounds = array<i64: 1, 400>}, {pipeline_mode = #tpu.pipeline_mode<synchronous>, transform_indices = @transform_4, window_bounds = array<i64: 400, 400>}, {pipeline_mode = #tpu.pipeline_mode<synchronous>, transform_indices = @transform_5, window_bounds = array<i64: 1, 400>}, {pipeline_mode = #tpu.pipeline_mode<synchronous>, transform_indices = @transform_6, window_bounds = array<i64: 400, 40>}, {pipeline_mode = #tpu.pipeline_mode<synchronous>, transform_indices = @transform_7, window_bounds = array<i64: 1, 40>}, {pipeline_mode = #tpu.pipeline_mode<synchronous>, transform_indices = @transform_8, window_bounds = array<i64: 20, 400>}, {pipeline_mode = #tpu.pipeline_mode<synchronous>, transform_indices = @transform_9, window_bounds = array<i64: 1, 400>}, {pipeline_mode = #tpu.pipeline_mode<synchronous>, transform_indices = @transform_10, window_bounds = array<i64: 400, 400>}, {pipeline_mode = #tpu.pipeline_mode<synchronous>, transform_indices = @transform_11, window_bounds = array<i64: 1, 400>}, {pipeline_mode = #tpu.pipeline_mode<synchronous>, transform_indices = @transform_12, window_bounds = array<i64: 400, 784>}, {pipeline_mode = #tpu.pipeline_mode<synchronous>, transform_indices = @transform_13, window_bounds = array<i64: 1, 784>}, {transform_indices = @transform_14, window_bounds = array<i64: 8, 40>}, {transform_indices = @transform_15, window_bounds = array<i64: 1, 8, 20>}, {transform_indices = @transform_16, window_bounds = array<i64: 1, 8, 784>}]} {
    %c0 = arith.constant 0 : index
    %c0_0 = arith.constant 0 : index
    %0 = vector.load %arg1[%c0, %c0_0] : memref<8x784xf32, #tpu.memory_space<vmem>>, vector<8x784xf32>
    %1 = arith.truncf %0 : vector<8x784xf32> to vector<8x784xbf16>
    %c0_1 = arith.constant 0 : index
    %c0_2 = arith.constant 0 : index
    %2 = vector.load %arg3[%c0_1, %c0_2] : memref<784x400xbf16, #tpu.memory_space<vmem>>, vector<784x400xbf16>
    %cst = arith.constant dense<0.000000e+00> : vector<8x400xf32>
    %3 = tpu.matmul %1, %2, %cst {dimension_numbers = #tpu.dot_dimension_numbers<[1], [0], [0], [1], [0, 0, 1, 1], [], []>} : vector<8x784xbf16>, vector<784x400xbf16>, vector<8x400xf32> -> vector<8x400xf32>
    %c0_3 = arith.constant 0 : index
    %c0_4 = arith.constant 0 : index
    %4 = vector.load %arg4[%c0_3, %c0_4] : memref<1x400xf32, #tpu.memory_space<vmem>>, vector<1x400xf32>
    %5 = vector.broadcast %4 : vector<1x400xf32> to vector<8x400xf32>
    %6 = arith.addf %3, %5 : vector<8x400xf32>
    %cst_5 = arith.constant 0.000000e+00 : f32
    %7 = vector.broadcast %cst_5 : f32 to vector<8x400xf32>
    %8 = arith.maximumf %6, %7 : vector<8x400xf32>
    %9 = arith.truncf %8 : vector<8x400xf32> to vector<8x400xbf16>
    %c0_6 = arith.constant 0 : index
    %c0_7 = arith.constant 0 : index
    %10 = vector.load %arg5[%c0_6, %c0_7] : memref<400x400xbf16, #tpu.memory_space<vmem>>, vector<400x400xbf16>
    %cst_8 = arith.constant dense<0.000000e+00> : vector<8x400xf32>
    %11 = tpu.matmul %9, %10, %cst_8 {dimension_numbers = #tpu.dot_dimension_numbers<[1], [0], [0], [1], [0, 0, 1, 1], [], []>} : vector<8x400xbf16>, vector<400x400xbf16>, vector<8x400xf32> -> vector<8x400xf32>
    %c0_9 = arith.constant 0 : index
    %c0_10 = arith.constant 0 : index
    %12 = vector.load %arg6[%c0_9, %c0_10] : memref<1x400xf32, #tpu.memory_space<vmem>>, vector<1x400xf32>
    %13 = vector.broadcast %12 : vector<1x400xf32> to vector<8x400xf32>
    %14 = arith.addf %11, %13 : vector<8x400xf32>
    %cst_11 = arith.constant 0.000000e+00 : f32
    %15 = vector.broadcast %cst_11 : f32 to vector<8x400xf32>
    %16 = arith.maximumf %14, %15 : vector<8x400xf32>
    %17 = arith.truncf %16 : vector<8x400xf32> to vector<8x400xbf16>
    %c0_12 = arith.constant 0 : index
    %c0_13 = arith.constant 0 : index
    %18 = vector.load %arg7[%c0_12, %c0_13] : memref<400x40xbf16, #tpu.memory_space<vmem>>, vector<400x40xbf16>
    %cst_14 = arith.constant dense<0.000000e+00> : vector<8x40xf32>
    %19 = tpu.matmul %17, %18, %cst_14 {dimension_numbers = #tpu.dot_dimension_numbers<[1], [0], [0], [1], [0, 0, 1, 1], [], []>} : vector<8x400xbf16>, vector<400x40xbf16>, vector<8x40xf32> -> vector<8x40xf32>
    %c0_15 = arith.constant 0 : index
    %c0_16 = arith.constant 0 : index
    %20 = vector.load %arg8[%c0_15, %c0_16] : memref<1x40xf32, #tpu.memory_space<vmem>>, vector<1x40xf32>
    %21 = vector.broadcast %20 : vector<1x40xf32> to vector<8x40xf32>
    %22 = arith.addf %19, %21 : vector<8x40xf32>
    %23 = math.exp %22 : vector<8x40xf32>
    %24 = tpu.iota {dimensions = array<i32: 1>} : vector<8x40xi32>
    %c20_i32 = arith.constant 20 : i32
    %25 = vector.broadcast %c20_i32 : i32 to vector<8x40xi32>
    %26 = arith.cmpi sge, %24, %25 : vector<8x40xi32>
    %27 = arith.select %26, %23, %22 : vector<8x40xi1>, vector<8x40xf32>
    %c0_17 = arith.constant 0 : index
    %c0_18 = arith.constant 0 : index
    %28 = vector.load %arg15[%c0_17, %c0_18] : memref<8x40xf32, #tpu.memory_space<vmem>>, vector<8x40xf32>
    tpu.vector_store %arg15[%c0_17, %c0_18], %27 {strides = array<i32>} : memref<8x40xf32, #tpu.memory_space<vmem>>, vector<8x40xf32>,
    %29 = vector.extract_strided_slice %22 {offsets = [0, 0], sizes = [8, 20], strides = [1, 1]} : vector<8x40xf32> to vector<8x20xf32>
    %30 = vector.extract_strided_slice %23 {offsets = [0, 20], sizes = [8, 20], strides = [1, 1]} : vector<8x40xf32> to vector<8x20xf32>
    %c0_19 = arith.constant 0 : index
    %c0_20 = arith.constant 0 : index
    %c0_21 = arith.constant 0 : index
    %31 = vector.load %arg2[%c0_19, %c0_20, %c0_21] : memref<1x8x20xf32, #tpu.memory_space<vmem>>, vector<1x8x20xf32>
    %32 = vector.shape_cast %29 : vector<8x20xf32> to vector<1x8x20xf32>
    %33 = vector.shape_cast %30 : vector<8x20xf32> to vector<1x8x20xf32>
    %34 = arith.mulf %33, %31 : vector<1x8x20xf32>
    %35 = arith.addf %32, %34 : vector<1x8x20xf32>
    %c0_22 = arith.constant 0 : index
    %c0_23 = arith.constant 0 : index
    %c0_24 = arith.constant 0 : index
    %36 = vector.load %arg16[%c0_22, %c0_23, %c0_24] : memref<1x8x20xf32, #tpu.memory_space<vmem>>, vector<1x8x20xf32>
    tpu.vector_store %arg16[%c0_22, %c0_23, %c0_24], %35 {strides = array<i32>} : memref<1x8x20xf32, #tpu.memory_space<vmem>>, vector<1x8x20xf32>,
    %37 = vector.shape_cast %35 : vector<1x8x20xf32> to vector<8x20xf32>
    %38 = arith.truncf %37 : vector<8x20xf32> to vector<8x20xbf16>
    %c0_25 = arith.constant 0 : index
    %c0_26 = arith.constant 0 : index
    %39 = vector.load %arg9[%c0_25, %c0_26] : memref<20x400xbf16, #tpu.memory_space<vmem>>, vector<20x400xbf16>
    %cst_27 = arith.constant dense<0.000000e+00> : vector<8x400xf32>
    %40 = tpu.matmul %38, %39, %cst_27 {dimension_numbers = #tpu.dot_dimension_numbers<[1], [0], [0], [1], [0, 0, 1, 1], [], []>} : vector<8x20xbf16>, vector<20x400xbf16>, vector<8x400xf32> -> vector<8x400xf32>
    %c0_28 = arith.constant 0 : index
    %c0_29 = arith.constant 0 : index
    %41 = vector.load %arg10[%c0_28, %c0_29] : memref<1x400xf32, #tpu.memory_space<vmem>>, vector<1x400xf32>
    %42 = vector.broadcast %41 : vector<1x400xf32> to vector<8x400xf32>
    %43 = arith.addf %40, %42 : vector<8x400xf32>
    %cst_30 = arith.constant 0.000000e+00 : f32
    %44 = vector.broadcast %cst_30 : f32 to vector<8x400xf32>
    %45 = arith.maximumf %43, %44 : vector<8x400xf32>
    %46 = arith.truncf %45 : vector<8x400xf32> to vector<8x400xbf16>
    %c0_31 = arith.constant 0 : index
    %c0_32 = arith.constant 0 : index
    %47 = vector.load %arg11[%c0_31, %c0_32] : memref<400x400xbf16, #tpu.memory_space<vmem>>, vector<400x400xbf16>
    %cst_33 = arith.constant dense<0.000000e+00> : vector<8x400xf32>
    %48 = tpu.matmul %46, %47, %cst_33 {dimension_numbers = #tpu.dot_dimension_numbers<[1], [0], [0], [1], [0, 0, 1, 1], [], []>} : vector<8x400xbf16>, vector<400x400xbf16>, vector<8x400xf32> -> vector<8x400xf32>
    %c0_34 = arith.constant 0 : index
    %c0_35 = arith.constant 0 : index
    %49 = vector.load %arg12[%c0_34, %c0_35] : memref<1x400xf32, #tpu.memory_space<vmem>>, vector<1x400xf32>
    %50 = vector.broadcast %49 : vector<1x400xf32> to vector<8x400xf32>
    %51 = arith.addf %48, %50 : vector<8x400xf32>
    %cst_36 = arith.constant 0.000000e+00 : f32
    %52 = vector.broadcast %cst_36 : f32 to vector<8x400xf32>
    %53 = arith.maximumf %51, %52 : vector<8x400xf32>
    %54 = arith.truncf %53 : vector<8x400xf32> to vector<8x400xbf16>
    %c0_37 = arith.constant 0 : index
    %c0_38 = arith.constant 0 : index
    %55 = vector.load %arg13[%c0_37, %c0_38] : memref<400x784xbf16, #tpu.memory_space<vmem>>, vector<400x784xbf16>
    %cst_39 = arith.constant dense<0.000000e+00> : vector<8x784xf32>
    %56 = tpu.matmul %54, %55, %cst_39 {dimension_numbers = #tpu.dot_dimension_numbers<[1], [0], [0], [1], [0, 0, 1, 1], [], []>} : vector<8x400xbf16>, vector<400x784xbf16>, vector<8x784xf32> -> vector<8x784xf32>
    %c0_40 = arith.constant 0 : index
    %c0_41 = arith.constant 0 : index
    %57 = vector.load %arg14[%c0_40, %c0_41] : memref<1x784xf32, #tpu.memory_space<vmem>>, vector<1x784xf32>
    %58 = vector.broadcast %57 : vector<1x784xf32> to vector<8x784xf32>
    %59 = arith.addf %56, %58 : vector<8x784xf32>
    %60 = arith.truncf %59 : vector<8x784xf32> to vector<8x784xbf16>
    %c0_42 = arith.constant 0 : index
    %c0_43 = arith.constant 0 : index
    %c0_44 = arith.constant 0 : index
    %61 = vector.load %arg17[%c0_42, %c0_43, %c0_44] : memref<1x8x784xbf16, #tpu.memory_space<vmem>>, vector<1x8x784xbf16>
    %62 = vector.shape_cast %61 : vector<1x8x784xbf16> to vector<8x784xbf16>
    %63 = vector.shape_cast %60 : vector<8x784xbf16> to vector<1x8x784xbf16>
    tpu.vector_store %arg17[%c0_42, %c0_43, %c0_44], %63 {strides = array<i32>} : memref<1x8x784xbf16, #tpu.memory_space<vmem>>, vector<1x8x784xbf16>,
    return
  }
  func.func @transform_0(%arg0: i32) -> (i32, i32) {
    %c0_i32 = arith.constant 0 : i32
    %c0_i32_0 = arith.constant 0 : i32
    return %arg0, %c0_i32 : i32, i32
  }
  func.func @transform_1(%arg0: i32) -> (i32, i32, i32) {
    %c0_i32 = arith.constant 0 : i32
    %c0_i32_0 = arith.constant 0 : i32
    %c0_i32_1 = arith.constant 0 : i32
    return %c0_i32, %arg0, %c0_i32_0 : i32, i32, i32
  }
  func.func @transform_2(%arg0: i32) -> (i32, i32) {
    %c0_i32 = arith.constant 0 : i32
    %c0_i32_0 = arith.constant 0 : i32
    %c0_i32_1 = arith.constant 0 : i32
    return %c0_i32, %c0_i32_0 : i32, i32
  }
  func.func @transform_3(%arg0: i32) -> (i32, i32) {
    %c0_i32 = arith.constant 0 : i32
    %c0_i32_0 = arith.constant 0 : i32
    %c0_i32_1 = arith.constant 0 : i32
    return %c0_i32, %c0_i32_0 : i32, i32
  }
  func.func @transform_4(%arg0: i32) -> (i32, i32) {
    %c0_i32 = arith.constant 0 : i32
    %c0_i32_0 = arith.constant 0 : i32
    %c0_i32_1 = arith.constant 0 : i32
    return %c0_i32, %c0_i32_0 : i32, i32
  }
  func.func @transform_5(%arg0: i32) -> (i32, i32) {
    %c0_i32 = arith.constant 0 : i32
    %c0_i32_0 = arith.constant 0 : i32
    %c0_i32_1 = arith.constant 0 : i32
    return %c0_i32, %c0_i32_0 : i32, i32
  }
  func.func @transform_6(%arg0: i32) -> (i32, i32) {
    %c0_i32 = arith.constant 0 : i32
    %c0_i32_0 = arith.constant 0 : i32
    %c0_i32_1 = arith.constant 0 : i32
    return %c0_i32, %c0_i32_0 : i32, i32
  }
  func.func @transform_7(%arg0: i32) -> (i32, i32) {
    %c0_i32 = arith.constant 0 : i32
    %c0_i32_0 = arith.constant 0 : i32
    %c0_i32_1 = arith.constant 0 : i32
    return %c0_i32, %c0_i32_0 : i32, i32
  }
  func.func @transform_8(%arg0: i32) -> (i32, i32) {
    %c0_i32 = arith.constant 0 : i32
    %c0_i32_0 = arith.constant 0 : i32
    %c0_i32_1 = arith.constant 0 : i32
    return %c0_i32, %c0_i32_0 : i32, i32
  }
  func.func @transform_9(%arg0: i32) -> (i32, i32) {
    %c0_i32 = arith.constant 0 : i32
    %c0_i32_0 = arith.constant 0 : i32
    %c0_i32_1 = arith.constant 0 : i32
    return %c0_i32, %c0_i32_0 : i32, i32
  }
  func.func @transform_10(%arg0: i32) -> (i32, i32) {
    %c0_i32 = arith.constant 0 : i32
    %c0_i32_0 = arith.constant 0 : i32
    %c0_i32_1 = arith.constant 0 : i32
    return %c0_i32, %c0_i32_0 : i32, i32
  }
  func.func @transform_11(%arg0: i32) -> (i32, i32) {
    %c0_i32 = arith.constant 0 : i32
    %c0_i32_0 = arith.constant 0 : i32
    %c0_i32_1 = arith.constant 0 : i32
    return %c0_i32, %c0_i32_0 : i32, i32
  }
  func.func @transform_12(%arg0: i32) -> (i32, i32) {
    %c0_i32 = arith.constant 0 : i32
    %c0_i32_0 = arith.constant 0 : i32
    %c0_i32_1 = arith.constant 0 : i32
    return %c0_i32, %c0_i32_0 : i32, i32
  }
  func.func @transform_13(%arg0: i32) -> (i32, i32) {
    %c0_i32 = arith.constant 0 : i32
    %c0_i32_0 = arith.constant 0 : i32
    %c0_i32_1 = arith.constant 0 : i32
    return %c0_i32, %c0_i32_0 : i32, i32
  }
  func.func @transform_14(%arg0: i32) -> (i32, i32) {
    %c0_i32 = arith.constant 0 : i32
    %c0_i32_0 = arith.constant 0 : i32
    return %arg0, %c0_i32 : i32, i32
  }
  func.func @transform_15(%arg0: i32) -> (i32, i32, i32) {
    %c0_i32 = arith.constant 0 : i32
    %c0_i32_0 = arith.constant 0 : i32
    %c0_i32_1 = arith.constant 0 : i32
    return %c0_i32, %arg0, %c0_i32_0 : i32, i32, i32
  }
  func.func @transform_16(%arg0: i32) -> (i32, i32, i32) {
    %c0_i32 = arith.constant 0 : i32
    %c0_i32_0 = arith.constant 0 : i32
    %c0_i32_1 = arith.constant 0 : i32
    return %c0_i32, %arg0, %c0_i32_0 : i32, i32, i32
  }
}

</mosaic_0001>

<bundles_post_ra>
// kernel: vae_forward.1
= control target key start
LH: loop header
LB: loop body
LE: loop exit
PB: predicated region body
PF: predicated region fallthrough
CT: control target
= control target key end

     0   :  { %s8965_s21 = smov 0   ;;  %s12794_s0 = inlined_call_operand.vmem [shape: f32[16,784], index: 0, kind: input, shape index: {}]   ;;  %s12795_s1 = inlined_call_operand.vmem [shape: f32[1,16,20], index: 1, kind: input, shape index: {}]   ;;  %s12796_s2 = inlined_call_operand.vmem [shape: bf16[784,400], index: 2, kind: input, shape index: {}]   ;;  %s12797_s3 = inlined_call_operand.vmem [shape: f32[1,400], index: 3, kind: input, shape index: {}]   ;;  %s12798_s4 = inlined_call_operand.vmem [shape: bf16[400,400], index: 4, kind: input, shape index: {}]   ;;  %s12799_s5 = inlined_call_operand.vmem [shape: f32[1,400], index: 5, kind: input, shape index: {}]   ;;  %s12800_s6 = inlined_call_operand.vmem [shape: bf16[400,40], index: 6, kind: input, shape index: {}]   ;;  %s12801_s7 = inlined_call_operand.vmem [shape: f32[1,40], index: 7, kind: input, shape index: {}]   ;;  %s12802_s8 = inlined_call_operand.vmem [shape: bf16[20,400], index: 8, kind: input, shape index: {}]   ;;  %s12803_s9 = inlined_call_operand.vmem [shape: f32[1,400], index: 9, kind: input, shape index: {}]   ;;  %s12804_s10 = inlined_call_operand.vmem [shape: bf16[400,400], index: 10, kind: input, shape index: {}]   ;;  %s12805_s11 = inlined_call_operand.vmem [shape: f32[1,400], index: 11, kind: input, shape index: {}]   ;;  %s12806_s12 = inlined_call_operand.vmem [shape: bf16[400,784], index: 12, kind: input, shape index: {}]   ;;  %s12807_s13 = inlined_call_operand.vmem [shape: f32[1,784], index: 13, kind: input, shape index: {}]   ;;  %s12808_s14 = inlined_call_operand.vmem [shape: f32[16,40], index: 14, kind: output, shape index: {0}]   ;;  %s12809_s15 = inlined_call_operand.vmem [shape: f32[1,16,20], index: 15, kind: output, shape index: {1}]   ;;  %s12810_s16 = inlined_call_operand.vmem [shape: bf16[1,16,784], index: 16, kind: output, shape index: {2}]  }
   0x1   :  { %12811 = sst [smem:[#allocation2_spill]] %s12794_s0 }
   0x2 LB: > { %s5819_s22 = sadd.s32 4294967295, %s8876_s21   ;;  %p5823_p0 = scmp.ge.s32.totalorder %s8876_s21, 1  ;;  %s8876_s21 = sphi %s8965_s21, %s27_s21  }
   0x3   : > { %p476_p1 = scmp.lt.s32.totalorder %s8876_s21, 3 }
   0x5   : > { %p477_p2 = pnand %p5823_p0, %p476_p1 }
   0x6   : > { %p538_p3 = scmp.lt.s32.totalorder (!%p477_p2), %s5819_s22, 1  ;;  %s12812_s0 = sld [smem:[#allocation2_spill]] (!%p477_p2) }
   0x7   : > { %480 = sbr.rel (%p477_p2) target bundleno = 1415 (0x587), region = 76  ;;  %s8879_s30 = smov (!%p477_p2), 108  }
   0xc   : > { %v5943_v0 = vld [vmem:[%s12796_s2 + $0xe0] sm:$0xf]  ;;  %v8285_v1 = vld [vmem:[%s12796_s2 + $0xec] sm:$0xf0]  ;;  %s12814_s22 = smov (!%p538_p3, %s5819_s22), 1  ;;  %vm1761_vm0 = vcmask 130048  }
   0xd   : > { %v6071_v2 = vld [vmem:[%s12796_s2 + $0x1e0] sm:$0xf]  ;;  %v5944_v3 = vor.u32 %v8285_v1, %v5943_v0  ;;  %v8317_v4 = vld [vmem:[%s12796_s2 + $0x1ec] sm:$0xf0]  ;;  %s8855_s18 = smul.u32 56, %s12814_s22  ;;  %vm3296_vm1 = vcmask 1041408  }
   0xe   : > { %v6199_v5 = vld [vmem:[%s12796_s2 + $0x2e0] sm:$0xf]  ;;  %v8349_v6 = vld [vmem:[%s12796_s2 + $0x2ec] sm:$0xf0]  ;;  %v6072_v7 = vor.u32 %v8317_v4, %v6071_v2  ;;  %vm3231_vm3 = vcmask 326656   ;;  %vm3244_vm4 = vcmask 162816  }
   0xf   : > { %v6200_v8 = vor.u32 %v8349_v6, %v6199_v5  ;;  %v6327_v9 = vld [vmem:[%s12796_s2 + $0x3e0] sm:$0xf]  ;;  %v8381_v10 = vld [vmem:[%s12796_s2 + $0x3ec] sm:$0xf0]  ;;  %1765 = vmatpush.bf16.msra.mxu0 %v5944_v3  ;;  %s9205_s17 = scalar_lea.vmem %s12812_s0, %s8855_s18  ;;  %s10959_s18 = sshll.u32 %s12814_s22, 3  ;;  %vm5688_vm5 = vcmask 125952  }
  0x10   : > { %v5927_v11 = vld [vmem:[%s12796_s2 + $0xc0] sm:$0xf]  ;;  %v6328_v12 = vor.u32 %v8381_v10, %v6327_v9  ;;  %v8281_v13 = vld [vmem:[%s12796_s2 + $0xcc] sm:$0xf0]  ;;  %1778 = vmatpush.bf16.msra.mxu1 %v6072_v7  ;;  %s546_s0 = scalar_lea.vmem %s12795_s1, %s10959_s18  ;;  %s550_s29 = scalar_lea.vmem %s12808_s14, %s10959_s18 }
  0x11   : > { %v6055_v14 = vld [vmem:[%s12796_s2 + $0x1c0] sm:$0xf]  ;;  %v8313_v15 = vld [vmem:[%s12796_s2 + $0x1cc] sm:$0xf0]  ;;  %1791 = vmatpush.bf16.msra.mxu2 %v6200_v8  ;;  %v5928_v16 = vor.u32 %v8281_v13, %v5927_v11  ;;  %s8856_s23 = smul.u32 28, %s12814_s22 }
  0x12   : > { %v6056_v17 = vor.u32 %v8313_v15, %v6055_v14  ;;  %v6183_v18 = vld [vmem:[%s12796_s2 + $0x2c0] sm:$0xf]  ;;  %v8345_v19 = vld [vmem:[%s12796_s2 + $0x2cc] sm:$0xf0]  ;;  %1804 = vmatpush.bf16.msra.mxu3 %v6328_v12 }
  0x13   : > { %v6311_v20 = vld [vmem:[%s12796_s2 + $0x3c0] sm:$0xf]  ;;  %v6184_v21 = vor.u32 %v8345_v19, %v6183_v18  ;;  %v8377_v22 = vld [vmem:[%s12796_s2 + $0x3cc] sm:$0xf0]  ;;  %1766 = vmatpush.bf16.msra.mxu0 %v5928_v16  ;;  %s12780_s26 = scalar_lea.vmem %s12810_s16, %s8856_s23 }
  0x14   : > { %v5911_v23 = vld [vmem:[%s12796_s2 + $0xa0] sm:$0xf]  ;;  %v8277_v24 = vld [vmem:[%s12796_s2 + $0xac] sm:$0xf0]  ;;  %v6312_v25 = vor.u32 %v8377_v22, %v6311_v20  ;;  %1779 = vmatpush.bf16.msra.mxu1 %v6056_v17 }
  0x15   : > { %v6039_v26 = vld [vmem:[%s12796_s2 + $0x1a0] sm:$0xf]  ;;  %v8309_v27 = vld [vmem:[%s12796_s2 + $0x1ac] sm:$0xf0]  ;;  %v5912_v29 = vor.u32 %v8277_v24, %v5911_v23  ;;  %1792 = vmatpush.bf16.msra.mxu2 %v6184_v21 }
  0x16   : > { %v6167_v28 = vld [vmem:[%s12796_s2 + $0x2a0] sm:$0xf]  ;;  %v8341_v30 = vld [vmem:[%s12796_s2 + $0x2ac] sm:$0xf0]  ;;  %v6040_v33 = vor.u32 %v8309_v27, %v6039_v26  ;;  %1805 = vmatpush.bf16.msra.mxu3 %v6312_v25 }
  0x17   : > { %v6295_v31 = vld [vmem:[%s12796_s2 + $0x3a0] sm:$0xf]  ;;  %v8373_v32 = vld [vmem:[%s12796_s2 + $0x3ac] sm:$0xf0]  ;;  %v6168_v34 = vor.u32 %v8341_v30, %v6167_v28  ;;  %1767 = vmatpush.bf16.msra.mxu0 %v5912_v29 }
  0x18   : > { %v5895_v35 = vld [vmem:[%s12796_s2 + $0x80] sm:$0xf]  ;;  %v8273_v36 = vld [vmem:[%s12796_s2 + $0x8c] sm:$0xf0]  ;;  %v6296_v38 = vor.u32 %v8373_v32, %v6295_v31  ;;  %1780 = vmatpush.bf16.msra.mxu1 %v6040_v33  ;;  %v8283_v32 = vld [vmem:[%s12796_s2 + $0xe4] sm:$0xf] }
  0x19   : > { %v6023_v37 = vld [vmem:[%s12796_s2 + $0x180] sm:$0xf]  ;;  %v8305_v39 = vld [vmem:[%s12796_s2 + $0x18c] sm:$0xf0]  ;;  %v5896_v44 = vor.u32 %v8273_v36, %v5895_v35  ;;  %1793 = vmatpush.bf16.msra.mxu2 %v6168_v34  ;;  %v5945_v34 = vld [vmem:[%s12796_s2 + $0xf0] sm:$0xf0] }
  0x1a   : > { %v6151_v40 = vld [vmem:[%s12796_s2 + $0x280] sm:$0xf]  ;;  %v8337_v41 = vld [vmem:[%s12796_s2 + $0x28c] sm:$0xf0]  ;;  %v6024_v45 = vor.u32 %v8305_v39, %v6023_v37  ;;  %1806 = vmatpush.bf16.msra.mxu3 %v6296_v38  ;;  %v8315_v39 = vld [vmem:[%s12796_s2 + $0x1e4] sm:$0xf] }
  0x1b   : > { %v6279_v42 = vld [vmem:[%s12796_s2 + $0x380] sm:$0xf]  ;;  %v8369_v43 = vld [vmem:[%s12796_s2 + $0x38c] sm:$0xf0]  ;;  %v6152_v46 = vor.u32 %v8337_v41, %v6151_v40  ;;  %1768 = vmatpush.bf16.msra.mxu0 %v5896_v44  ;;  %v6073_v40 = vld [vmem:[%s12796_s2 + $0x1f0] sm:$0xf0] }
  0x1c   : > { %v5879_v47 = vld [vmem:[%s12796_s2 + $0x60] sm:$0xf]  ;;  %v8269_v48 = vld [vmem:[%s12796_s2 + $0x6c] sm:$0xf0]  ;;  %v6280_v50 = vor.u32 %v8369_v43, %v6279_v42  ;;  %1781 = vmatpush.bf16.msra.mxu1 %v6024_v45 }
  0x1d   : > { %v6007_v49 = vld [vmem:[%s12796_s2 + $0x160] sm:$0xf]  ;;  %v8301_v51 = vld [vmem:[%s12796_s2 + $0x16c] sm:$0xf0]  ;;  %v5880_v56 = vor.u32 %v8269_v48, %v5879_v47  ;;  %1794 = vmatpush.bf16.msra.mxu2 %v6152_v46  ;;  %v5948_v47 = vor.u32 %v8283_v32, %v5945_v34 }
  0x1e   : > { %v6135_v52 = vld [vmem:[%s12796_s2 + $0x260] sm:$0xf]  ;;  %v8333_v53 = vld [vmem:[%s12796_s2 + $0x26c] sm:$0xf0]  ;;  %v6008_v57 = vor.u32 %v8301_v51, %v6007_v49  ;;  %1807 = vmatpush.bf16.msra.mxu3 %v6280_v50  ;;  %v564_v50 = vld [vmem:[%s9205_s17 + $0x18] sm:$0xff] }
  0x1f   : > { %v6263_v54 = vld [vmem:[%s12796_s2 + $0x360] sm:$0xf]  ;;  %v8365_v55 = vld [vmem:[%s12796_s2 + $0x36c] sm:$0xf0]  ;;  %v6136_v58 = vor.u32 %v8333_v53, %v6135_v52  ;;  %1769 = vmatpush.bf16.msra.mxu0 %v5880_v56  ;;  %v8279_v53 = vld [vmem:[%s12796_s2 + $0xc4] sm:$0xf] }
  0x20   : > { %v5863_v59 = vld [vmem:[%s12796_s2 + $0x40] sm:$0xf]  ;;  %v8265_v60 = vld [vmem:[%s12796_s2 + $0x4c] sm:$0xf0]  ;;  %v6264_v62 = vor.u32 %v8365_v55, %v6263_v54  ;;  %1782 = vmatpush.bf16.msra.mxu1 %v6008_v57  ;;  %v5929_v54 = vld [vmem:[%s12796_s2 + $0xd0] sm:$0xf0]  ;;  %v9232_v57 = vpack.c.bf16 %v564_v50, %v564_v50 }
  0x21   : > { %v5991_v61 = vld [vmem:[%s12796_s2 + $0x140] sm:$0xf]  ;;  %v8297_v63 = vld [vmem:[%s12796_s2 + $0x14c] sm:$0xf0]  ;;  %v5864_v4 = vor.u32 %v8265_v60, %v5863_v59  ;;  %1795 = vmatpush.bf16.msra.mxu2 %v6136_v58  ;;  %v562_v58 = vld [vmem:[%s9205_s17 + $0x8] sm:$0xff]  ;;  %v6076_v59 = vor.u32 %v8315_v39, %v6073_v40 }
  0x22   : > { %v6119_v0 = vld [vmem:[%s12796_s2 + $0x240] sm:$0xf]  ;;  %v8329_v1 = vld [vmem:[%s12796_s2 + $0x24c] sm:$0xf0]  ;;  %v5992_v6 = vor.u32 %v8297_v63, %v5991_v61  ;;  %1808 = vmatpush.bf16.msra.mxu3 %v6264_v62  ;;  %v8311_v61 = vld [vmem:[%s12796_s2 + $0x1c4] sm:$0xf] }
  0x23   : > { %v6247_v2 = vld [vmem:[%s12796_s2 + $0x340] sm:$0xf]  ;;  %v8361_v3 = vld [vmem:[%s12796_s2 + $0x34c] sm:$0xf0]  ;;  %v6120_v7 = vor.u32 %v8329_v1, %v6119_v0  ;;  %1770 = vmatpush.bf16.msra.mxu0 %v5864_v4  ;;  %v6057_v62 = vld [vmem:[%s12796_s2 + $0x1d0] sm:$0xf0]  ;;  %v5932_v0 = vor.u32 %v8279_v53, %v5929_v54 }
  0x24   : > { %v5847_v5 = vld [vmem:[%s12796_s2 + $0x20] sm:$0xf]  ;;  %v8261_v8 = vld [vmem:[%s12796_s2 + $0x2c] sm:$0xf0]  ;;  %v6248_v11 = vor.u32 %v8361_v3, %v6247_v2  ;;  %1783 = vmatpush.bf16.msra.mxu1 %v5992_v6  ;;  %v5913_v6 = vld [vmem:[%s12796_s2 + $0xb0] sm:$0xf0] }
  0x25   : > { %v5975_v9 = vld [vmem:[%s12796_s2 + $0x120] sm:$0xf]  ;;  %v8293_v10 = vld [vmem:[%s12796_s2 + $0x12c] sm:$0xf0]  ;;  %v5848_v18 = vor.u32 %v8261_v8, %v5847_v5  ;;  %1796 = vmatpush.bf16.msra.mxu2 %v6120_v7  ;;  %v8275_v5 = vld [vmem:[%s12796_s2 + $0xa4] sm:$0xf]  ;;  %v9261_v7 = vpack.c.bf16 %v562_v58, %v562_v58  ;;  %v6060_v8 = vor.u32 %v8311_v61, %v6057_v62 }
  0x26   : > { %v6103_v12 = vld [vmem:[%s12796_s2 + $0x220] sm:$0xf]  ;;  %v8325_v13 = vld [vmem:[%s12796_s2 + $0x22c] sm:$0xf0]  ;;  %v5976_v22 = vor.u32 %v8293_v10, %v5975_v9  ;;  %1809 = vmatpush.bf16.msra.mxu3 %v6248_v11  ;;  %v8307_v10 = vld [vmem:[%s12796_s2 + $0x1a4] sm:$0xf] }
  0x27   : > { %v6231_v14 = vld [vmem:[%s12796_s2 + $0x320] sm:$0xf]  ;;  %v8357_v15 = vld [vmem:[%s12796_s2 + $0x32c] sm:$0xf0]  ;;  %v6104_v23 = vor.u32 %v8325_v13, %v6103_v12  ;;  %1771 = vmatpush.bf16.msra.mxu0 %v5848_v18  ;;  %v6041_v11 = vld [vmem:[%s12796_s2 + $0x1b0] sm:$0xf0]  ;;  %v5916_v13 = vor.u32 %v8275_v5, %v5913_v6 }
  0x28   : > { %v5831_v16 = vld [vmem:[%s12796_s2] sm:$0xf]  ;;  %v8257_v17 = vld [vmem:[%s12796_s2 + $0xc] sm:$0xf0]  ;;  %v6232_v27 = vor.u32 %v8357_v15, %v6231_v14  ;;  %1784 = vmatpush.bf16.msra.mxu1 %v5976_v22  ;;  %v8271_v18 = vld [vmem:[%s12796_s2 + $0x84] sm:$0xf] }
  0x29   : > { %v5959_v19 = vld [vmem:[%s12796_s2 + $0x100] sm:$0xf]  ;;  %v8289_v20 = vld [vmem:[%s12796_s2 + $0x10c] sm:$0xf0]  ;;  %v5832_v33 = vor.u32 %v8257_v17, %v5831_v16  ;;  %1797 = vmatpush.bf16.msra.mxu2 %v6104_v23  ;;  %v8303_v22 = vld [vmem:[%s12796_s2 + $0x184] sm:$0xf] }
  0x2a   : > { %v6087_v21 = vld [vmem:[%s12796_s2 + $0x200] sm:$0xf]  ;;  %v8321_v24 = vld [vmem:[%s12796_s2 + $0x20c] sm:$0xf0]  ;;  %v5960_v36 = vor.u32 %v8289_v20, %v5959_v19  ;;  %1810 = vmatpush.bf16.msra.mxu3 %v6232_v27  ;;  %v5897_v19 = vld [vmem:[%s12796_s2 + $0x90] sm:$0xf0]  ;;  %v6044_v20 = vor.u32 %v8307_v10, %v6041_v11 }
  0x2b   : > { %v6215_v25 = vld [vmem:[%s12796_s2 + $0x300] sm:$0xf]  ;;  %v8353_v26 = vld [vmem:[%s12796_s2 + $0x30c] sm:$0xf0]  ;;  %v6088_v37 = vor.u32 %v8321_v24, %v6087_v21  ;;  %1772 = vmatpush.bf16.msra.mxu0 %v5832_v33  ;;  %v6025_v23 = vld [vmem:[%s12796_s2 + $0x190] sm:$0xf0] }
  0x2c   : > { %v6455_v28 = vld [vmem:[%s12796_s2 + $0x4e0] sm:$0xf]  ;;  %v8413_v29 = vld [vmem:[%s12796_s2 + $0x4ec] sm:$0xf0]  ;;  %v6216_v41 = vor.u32 %v8353_v26, %v6215_v25  ;;  %1785 = vmatpush.bf16.msra.mxu1 %v5960_v36  ;;  %v5900_v25 = vor.u32 %v8271_v18, %v5897_v19  ;;  %v6028_v33 = vor.u32 %v8303_v22, %v6025_v23  ;;  %v6009_v36 = vld [vmem:[%s12796_s2 + $0x170] sm:$0xf0] }
  0x2d   : > { %v6583_v30 = vld [vmem:[%s12796_s2 + $0x5e0] sm:$0xf]  ;;  %v8445_v31 = vld [vmem:[%s12796_s2 + $0x5ec] sm:$0xf0]  ;;  %v6456_v42 = vor.u32 %v8413_v29, %v6455_v28  ;;  %1798 = vmatpush.bf16.msra.mxu2 %v6088_v37  ;;  %v8347_v10 = vld [vmem:[%s12796_s2 + $0x2e4] sm:$0xf] }
  0x2e   : > { %v6599_v35 = vld [vmem:[%s12796_s2 + $0x600] sm:$0xf]  ;;  %v8449_v38 = vld [vmem:[%s12796_s2 + $0x60c] sm:$0xf0]  ;;  %v6584_v46 = vor.u32 %v8445_v31, %v6583_v30  ;;  %1811 = vmatpush.bf16.msra.mxu3 %v6216_v41  ;;  %v8267_v30 = vld [vmem:[%s12796_s2 + $0x64] sm:$0xf] }
  0x2f   : > { %v6439_v43 = vld [vmem:[%s12796_s2 + $0x4c0] sm:$0xf]  ;;  %v8409_v44 = vld [vmem:[%s12796_s2 + $0x4cc] sm:$0xf0]  ;;  %v6600_v56 = vor.u32 %v8449_v38, %v6599_v35  ;;  %1817 = vmatpush.bf16.msrb.mxu0 %v6456_v42  ;;  %1786 = vmatmul.bf16.vlgmr.msra.gmra.mxu1 %v9261_v7  ;;  %v5881_v31 = vld [vmem:[%s12796_s2 + $0x70] sm:$0xf0] }
  0x30   : > { %v6567_v45 = vld [vmem:[%s12796_s2 + $0x5c0] sm:$0xf]  ;;  %v563_v48 = vld [vmem:[%s9205_s17 + $0x10] sm:$0xff]  ;;  %v6440_v60 = vor.u32 %v8409_v44, %v6439_v43  ;;  %1830 = vmatpush.bf16.msrb.mxu1 %v6584_v46  ;;  %v8299_v35 = vld [vmem:[%s12796_s2 + $0x164] sm:$0xf]  ;;  %v5884_v38 = vor.u32 %v8267_v30, %v5881_v31 }
  0x31   : > { %v561_v49 = vld [vmem:[%s9205_s17] sm:$0xff]  ;;  %v9219_v51 = vpack.c.bf16 %v563_v48, %v563_v48  ;;  %v8441_v52 = vld [vmem:[%s12796_s2 + $0x5cc] sm:$0xf0]  ;;  %1850 = vmatpush.bf16.msrb.mxu2 %v6600_v56  ;;  %1812 = vmatmul.bf16.vlgmr.msra.gmra.mxu3 %v9232_v57  ;;  %v5865_v44 = vld [vmem:[%s12796_s2 + $0x50] sm:$0xf0]  ;;  %v6012_v46 = vor.u32 %v8299_v35, %v6009_v36 }
  0x32   : > { %v9230_v55 = vpack.c.bf16 %v561_v49, %v561_v49  ;;  %1856 = vmatpush.bf16.msrb.mxu3 %v5948_v47  ;;  %v6568_v63 = vor.u32 %v8441_v52, %v6567_v45  ;;  %v6423_v1 = vld [vmem:[%s12796_s2 + $0x4a0] sm:$0xf]  ;;  %v8405_v2 = vld [vmem:[%s12796_s2 + $0x4ac] sm:$0xf0]  ;;  %v8263_v43 = vld [vmem:[%s12796_s2 + $0x44] sm:$0xf] }
  0x33   : > { %v6551_v3 = vld [vmem:[%s12796_s2 + $0x5a0] sm:$0xf]  ;;  %1799 = vmatmul.bf16.vlgmr.msra.gmra.mxu2 %v9219_v51  ;;  %v8437_v4 = vld [vmem:[%s12796_s2 + $0x5ac] sm:$0xf0]  ;;  %1818 = vmatpush.bf16.msrb.mxu0 %v6440_v60  ;;  %v6424_v9 = vor.u32 %v8405_v2, %v6423_v1  ;;  %v8295_v48 = vld [vmem:[%s12796_s2 + $0x144] sm:$0xf]  ;;  %v5868_v52 = vor.u32 %v8263_v43, %v5865_v44 }
  0x34   : > { %1773 = vmatmul.bf16.vlgmr.msra.gmra.mxu0 %v9230_v55  ;;  %1831 = vmatpush.bf16.msrb.mxu1 %v6568_v63  ;;  %v6552_v12 = vor.u32 %v8437_v4, %v6551_v3  ;;  %v6407_v14 = vld [vmem:[%s12796_s2 + $0x480] sm:$0xf]  ;;  %v8401_v15 = vld [vmem:[%s12796_s2 + $0x48c] sm:$0xf0]  ;;  %v5993_v49 = vld [vmem:[%s12796_s2 + $0x150] sm:$0xf0] }
  0x35   : > { %1869 = vmatpush.bf16.msra.mxu2 %v6076_v59  ;;  %v6535_v16 = vld [vmem:[%s12796_s2 + $0x580] sm:$0xf]  ;;  %v8433_v17 = vld [vmem:[%s12796_s2 + $0x58c] sm:$0xf0]  ;;  %v6408_v21 = vor.u32 %v8401_v15, %v6407_v14  ;;  %v8259_v59 = vld [vmem:[%s12796_s2 + $0x24] sm:$0xf]  ;;  %v5996_v61 = vor.u32 %v8295_v48, %v5993_v49 }
  0x36   : > { %1857 = vmatpush.bf16.msrb.mxu3 %v5932_v0  ;;  %v6536_v24 = vor.u32 %v8433_v17, %v6535_v16  ;;  %v6391_v26 = vld [vmem:[%s12796_s2 + $0x460] sm:$0xf]  ;;  %v8397_v27 = vld [vmem:[%s12796_s2 + $0x46c] sm:$0xf0]  ;;  %v5849_v60 = vld [vmem:[%s12796_s2 + $0x30] sm:$0xf0] }
  0x37   : > { %1819 = vmatpush.bf16.msrb.mxu0 %v6424_v9  ;;  %v6519_v28 = vld [vmem:[%s12796_s2 + $0x560] sm:$0xf]  ;;  %v8429_v29 = vld [vmem:[%s12796_s2 + $0x56c] sm:$0xf0]  ;;  %v6392_v34 = vor.u32 %v8397_v27, %v6391_v26  ;;  %v8291_v63 = vld [vmem:[%s12796_s2 + $0x124] sm:$0xf]  ;;  %v5852_v3 = vor.u32 %v8259_v59, %v5849_v60 }
  0x38   : > { %1832 = vmatpush.bf16.msrb.mxu1 %v6552_v12  ;;  %v567_v32 = vld [vmem:[%s9205_s17 + $0x30] sm:$0xff]  ;;  %v6520_v37 = vor.u32 %v8429_v29, %v6519_v28  ;;  %v6375_v39 = vld [vmem:[%s12796_s2 + $0x440] sm:$0xf]  ;;  %v8379_v12 = vld [vmem:[%s12796_s2 + $0x3e4] sm:$0xf] }
  0x39   : > { %1870 = vmatpush.bf16.msra.mxu2 %v6060_v8  ;;  %v8393_v40 = vld [vmem:[%s12796_s2 + $0x44c] sm:$0xf0]  ;;  %v6503_v41 = vld [vmem:[%s12796_s2 + $0x540] sm:$0xf]  ;;  %v9338_v45 = vpack.c.bf16 %v567_v32, %v567_v32  ;;  %v5977_v0 = vld [vmem:[%s12796_s2 + $0x130] sm:$0xf0] }
  0x3a   : > { %1858 = vmatpush.bf16.msrb.mxu3 %v5916_v13  ;;  %v8425_v42 = vld [vmem:[%s12796_s2 + $0x54c] sm:$0xf0]  ;;  %v6376_v47 = vor.u32 %v8393_v40, %v6375_v39  ;;  %v6359_v53 = vld [vmem:[%s12796_s2 + $0x420] sm:$0xf]  ;;  %v8255_v8 = vld [vmem:[%s12796_s2 + $0x4] sm:$0xf]  ;;  %v5980_v14 = vor.u32 %v8291_v63, %v5977_v0 }
  0x3b   : > { %1820 = vmatpush.bf16.msrb.mxu0 %v6408_v21  ;;  %v6504_v50 = vor.u32 %v8425_v42, %v6503_v41  ;;  %v8389_v54 = vld [vmem:[%s12796_s2 + $0x42c] sm:$0xf0]  ;;  %v6487_v56 = vld [vmem:[%s12796_s2 + $0x520] sm:$0xf]  ;;  %v5833_v9 = vld [vmem:[%s12796_s2 + $0x10] sm:$0xf0] }
  0x3c   : > { %1833 = vmatpush.bf16.msrb.mxu1 %v6536_v24  ;;  %v8421_v58 = vld [vmem:[%s12796_s2 + $0x52c] sm:$0xf0]  ;;  %v6360_v62 = vor.u32 %v8389_v54, %v6359_v53  ;;  %v6343_v1 = vld [vmem:[%s12796_s2 + $0x400] sm:$0xf]  ;;  %v6201_v11 = vld [vmem:[%s12796_s2 + $0x2f0] sm:$0xf0] }
  0x3d   : > { %1871 = vmatpush.bf16.msra.mxu2 %v6044_v20  ;;  %v6488_v2 = vor.u32 %v8421_v58, %v6487_v56  ;;  %v8385_v4 = vld [vmem:[%s12796_s2 + $0x40c] sm:$0xf0]  ;;  %v6471_v5 = vld [vmem:[%s12796_s2 + $0x500] sm:$0xf]  ;;  %v6329_v13 = vld [vmem:[%s12796_s2 + $0x3f0] sm:$0xf0]  ;;  %v5836_v20 = vor.u32 %v8255_v8, %v5833_v9  ;;  %v6204_v24 = vor.u32 %v8347_v10, %v6201_v11 }
  0x3e   : > { %1859 = vmatpush.bf16.msrb.mxu3 %v5900_v25  ;;  %v8417_v6 = vld [vmem:[%s12796_s2 + $0x50c] sm:$0xf0]  ;;  %v6344_v15 = vor.u32 %v8385_v4, %v6343_v1  ;;  %v8411_v16 = vld [vmem:[%s12796_s2 + $0x4e4] sm:$0xf]  ;;  %v6457_v17 = vld [vmem:[%s12796_s2 + $0x4f0] sm:$0xf0]  ;;  %v6332_v25 = vor.u32 %v8379_v12, %v6329_v13 }
  0x3f   : > { %1821 = vmatpush.bf16.msrb.mxu0 %v6392_v34  ;;  %v565_v18 = vld [vmem:[%s9205_s17 + $0x20] sm:$0xff]  ;;  %v6472_v19 = vor.u32 %v8417_v6, %v6471_v5  ;;  %v5961_v22 = vld [vmem:[%s12796_s2 + $0x110] sm:$0xf0]  ;;  %v566_v23 = vld [vmem:[%s9205_s17 + $0x28] sm:$0xff]  ;;  %v6460_v29 = vor.u32 %v8411_v16, %v6457_v17  ;;  %s8878_s17 = smov 20  }
  0x40   : > { %1834 = vmatpush.bf16.msrb.mxu1 %v6520_v37  ;;  %v8287_v21 = vld [vmem:[%s12796_s2 + $0x104] sm:$0xf]  ;;  %v6585_v27 = vld [vmem:[%s12796_s2 + $0x5f0] sm:$0xf0]  ;;  %v9425_v30 = vpack.c.bf16 %v565_v18, %v565_v18  ;;  %v9436_v35 = vpack.c.bf16 %v566_v23, %v566_v23 }
  0x41   : > { %1872 = vmatpush.bf16.msra.mxu2 %v6028_v33  ;;  %v8443_v26 = vld [vmem:[%s12796_s2 + $0x5e4] sm:$0xf]  ;;  %v6185_v31 = vld [vmem:[%s12796_s2 + $0x2d0] sm:$0xf0]  ;;  %v5964_v34 = vor.u32 %v8287_v21, %v5961_v22 }
  0x42   : > { %1860 = vmatpush.bf16.msrb.mxu3 %v5884_v38  ;;  %v8343_v28 = vld [vmem:[%s12796_s2 + $0x2c4] sm:$0xf]  ;;  %v6313_v33 = vld [vmem:[%s12796_s2 + $0x3d0] sm:$0xf0]  ;;  %v6588_v38 = vor.u32 %v8443_v26, %v6585_v27 }
  0x43   : > { %6613 = vmatmul.msk.bf16.vlgmr.msrb.gmra.mxu2 %vm1761_vm0, %v9338_v45  ;;  %1822 = vmatpush.bf16.msrb.mxu0 %v6376_v47  ;;  %v8375_v32 = vld [vmem:[%s12796_s2 + $0x3c4] sm:$0xf]  ;;  %v6441_v37 = vld [vmem:[%s12796_s2 + $0x4d0] sm:$0xf0]  ;;  %v6188_v39 = vor.u32 %v8343_v28, %v6185_v31 }
  0x44   : > { %1835 = vmatpush.bf16.msrb.mxu1 %v6504_v50  ;;  %v8407_v36 = vld [vmem:[%s12796_s2 + $0x4c4] sm:$0xf]  ;;  %v6316_v40 = vor.u32 %v8375_v32, %v6313_v33  ;;  %v6569_v42 = vld [vmem:[%s12796_s2 + $0x5d0] sm:$0xf0] }
  0x45   : > { %1873 = vmatpush.bf16.msra.mxu2 %v6012_v46  ;;  %v8439_v41 = vld [vmem:[%s12796_s2 + $0x5c4] sm:$0xf]  ;;  %v6444_v44 = vor.u32 %v8407_v36, %v6441_v37  ;;  %v6169_v46 = vld [vmem:[%s12796_s2 + $0x2b0] sm:$0xf0] }
  0x46   : > { %1861 = vmatpush.bf16.msrb.mxu3 %v5868_v52  ;;  %v8339_v43 = vld [vmem:[%s12796_s2 + $0x2a4] sm:$0xf]  ;;  %v6297_v48 = vld [vmem:[%s12796_s2 + $0x3b0] sm:$0xf0]  ;;  %v6572_v52 = vor.u32 %v8439_v41, %v6569_v42 }
  0x47   : > { %1823 = vmatpush.bf16.msrb.mxu0 %v6360_v62  ;;  %v8371_v47 = vld [vmem:[%s12796_s2 + $0x3a4] sm:$0xf]  ;;  %v6425_v50 = vld [vmem:[%s12796_s2 + $0x4b0] sm:$0xf0]  ;;  %v6172_v53 = vor.u32 %v8339_v43, %v6169_v46 }
  0x48   : > { %1836 = vmatpush.bf16.msrb.mxu1 %v6488_v2  ;;  %v8403_v49 = vld [vmem:[%s12796_s2 + $0x4a4] sm:$0xf]  ;;  %v6300_v54 = vor.u32 %v8371_v47, %v6297_v48  ;;  %v6553_v58 = vld [vmem:[%s12796_s2 + $0x5b0] sm:$0xf0] }
  0x49   : > { %1874 = vmatpush.bf16.msra.mxu2 %v5996_v61  ;;  %v8435_v56 = vld [vmem:[%s12796_s2 + $0x5a4] sm:$0xf]  ;;  %v6428_v60 = vor.u32 %v8403_v49, %v6425_v50  ;;  %v6153_v61 = vld [vmem:[%s12796_s2 + $0x290] sm:$0xf0] }
  0x4a   : > { %1862 = vmatpush.bf16.msrb.mxu3 %v5852_v3  ;;  %v8335_v59 = vld [vmem:[%s12796_s2 + $0x284] sm:$0xf]  ;;  %v6281_v63 = vld [vmem:[%s12796_s2 + $0x390] sm:$0xf0]  ;;  %v6556_v2 = vor.u32 %v8435_v56, %v6553_v58  ;;  %v5951_v56 = vld [vmem:[%s12796_s2 + $0xe8] sm:$0xf] }
  0x4b   : > { %1824 = vmatpush.bf16.msrb.mxu0 %v6344_v15  ;;  %v8367_v62 = vld [vmem:[%s12796_s2 + $0x384] sm:$0xf]  ;;  %v6409_v1 = vld [vmem:[%s12796_s2 + $0x490] sm:$0xf0]  ;;  %v6156_v3 = vor.u32 %v8335_v59, %v6153_v61  ;;  %v8286_v58 = vld [vmem:[%s12796_s2 + $0xf4] sm:$0xf0] }
  0x4c   : > { %1837 = vmatpush.bf16.msrb.mxu1 %v6472_v19  ;;  %v8399_v0 = vld [vmem:[%s12796_s2 + $0x484] sm:$0xf]  ;;  %v6284_v4 = vor.u32 %v8367_v62, %v6281_v63  ;;  %v6537_v6 = vld [vmem:[%s12796_s2 + $0x590] sm:$0xf0]  ;;  %v6079_v59 = vld [vmem:[%s12796_s2 + $0x1e8] sm:$0xf] }
  0x4d   : > { %1875 = vmatpush.bf16.msra.mxu2 %v5980_v14  ;;  %v8431_v5 = vld [vmem:[%s12796_s2 + $0x584] sm:$0xf]  ;;  %v6412_v9 = vor.u32 %v8399_v0, %v6409_v1  ;;  %v6137_v10 = vld [vmem:[%s12796_s2 + $0x270] sm:$0xf0]  ;;  %v8318_v61 = vld [vmem:[%s12796_s2 + $0x1f4] sm:$0xf0] }
  0x4e   : > { %1863 = vmatpush.bf16.msrb.mxu3 %v5836_v20  ;;  %1825 = vmatmul.bf16.vlgmr.msrb.gmra.mxu0 %v9425_v30  ;;  %v8331_v8 = vld [vmem:[%s12796_s2 + $0x264] sm:$0xf]  ;;  %v6265_v12 = vld [vmem:[%s12796_s2 + $0x370] sm:$0xf0]  ;;  %v6540_v15 = vor.u32 %v8431_v5, %v6537_v6  ;;  %v5952_v6 = vor.u32 %v8286_v58, %v5951_v56  ;;  %v8270_v56 = vld [vmem:[%s12796_s2 + $0x74] sm:$0xf0] }
  0x4f   : > { %1882 = vmatpush.bf16.msra.mxu0 %v6204_v24  ;;  %1838 = vmatmul.bf16.vlgmr.msrb.gmra.mxu1 %v9436_v35  ;;  %v8363_v11 = vld [vmem:[%s12796_s2 + $0x364] sm:$0xf]  ;;  %v6393_v14 = vld [vmem:[%s12796_s2 + $0x470] sm:$0xf0]  ;;  %v6140_v16 = vor.u32 %v8331_v8, %v6137_v10  ;;  %v8350_v8 = vld [vmem:[%s12796_s2 + $0x2f4] sm:$0xf0] }
  0x50   : > { %1895 = vmatpush.bf16.msra.mxu1 %v6332_v25  ;;  %v8395_v13 = vld [vmem:[%s12796_s2 + $0x464] sm:$0xf]  ;;  %v6268_v17 = vor.u32 %v8363_v11, %v6265_v12  ;;  %v6521_v19 = vld [vmem:[%s12796_s2 + $0x570] sm:$0xf0]  ;;  %v8382_v10 = vld [vmem:[%s12796_s2 + $0x3f4] sm:$0xf0]  ;;  %v6080_v11 = vor.u32 %v8318_v61, %v6079_v59 }
  0x51   : > { %1876 = vmatpush.bf16.msra.mxu2 %v5964_v34  ;;  %1864 = vmatmul.bf16.vlgmr.msrb.gmra.mxu3 %v9230_v55  ;;  %v8427_v18 = vld [vmem:[%s12796_s2 + $0x564] sm:$0xf]  ;;  %v6396_v21 = vor.u32 %v8395_v13, %v6393_v14  ;;  %v6121_v22 = vld [vmem:[%s12796_s2 + $0x250] sm:$0xf0]  ;;  %v5935_v13 = vld [vmem:[%s12796_s2 + $0xc8] sm:$0xf] }
  0x52   : > { %1908 = vmatpush.bf16.msra.mxu3 %v6460_v29  ;;  %v8327_v20 = vld [vmem:[%s12796_s2 + $0x244] sm:$0xf]  ;;  %v6249_v24 = vld [vmem:[%s12796_s2 + $0x350] sm:$0xf0]  ;;  %v6524_v27 = vor.u32 %v8427_v18, %v6521_v19  ;;  %v8282_v14 = vld [vmem:[%s12796_s2 + $0xd4] sm:$0xf0] }
  0x53   : > { %1883 = vmatpush.bf16.msra.mxu0 %v6188_v39  ;;  %v8359_v23 = vld [vmem:[%s12796_s2 + $0x344] sm:$0xf]  ;;  %v6377_v26 = vld [vmem:[%s12796_s2 + $0x450] sm:$0xf0]  ;;  %v6124_v28 = vor.u32 %v8327_v20, %v6121_v22  ;;  %v6191_v20 = vld [vmem:[%s12796_s2 + $0x2c8] sm:$0xf] }
  0x54   : > { %1896 = vmatpush.bf16.msra.mxu1 %v6316_v40  ;;  %1877 = vmatmul.bf16.vlgmr.msra.gmra.mxu2 %v9261_v7  ;;  %v8391_v25 = vld [vmem:[%s12796_s2 + $0x444] sm:$0xf]  ;;  %v6252_v29 = vor.u32 %v8359_v23, %v6249_v24  ;;  %v6505_v32 = vld [vmem:[%s12796_s2 + $0x550] sm:$0xf0]  ;;  %v8346_v22 = vld [vmem:[%s12796_s2 + $0x2d4] sm:$0xf0] }
  0x55   : > { %1921 = vmatpush.bf16.msrb.mxu2 %v6588_v38  ;;  %v8423_v31 = vld [vmem:[%s12796_s2 + $0x544] sm:$0xf]  ;;  %v6380_v34 = vor.u32 %v8391_v25, %v6377_v26  ;;  %v6105_v36 = vld [vmem:[%s12796_s2 + $0x230] sm:$0xf0]  ;;  %v6319_v23 = vld [vmem:[%s12796_s2 + $0x3c8] sm:$0xf] }
  0x56   : > { %1909 = vmatpush.bf16.msra.mxu3 %v6444_v44  ;;  %v8323_v33 = vld [vmem:[%s12796_s2 + $0x224] sm:$0xf]  ;;  %v6233_v38 = vld [vmem:[%s12796_s2 + $0x330] sm:$0xf0]  ;;  %v6508_v41 = vor.u32 %v8423_v31, %v6505_v32  ;;  %v8378_v24 = vld [vmem:[%s12796_s2 + $0x3d4] sm:$0xf0]  ;;  %v6192_v31 = vor.u32 %v8346_v22, %v6191_v20 }
  0x57   : > { %1884 = vmatpush.bf16.msra.mxu0 %v6172_v53  ;;  %v8355_v37 = vld [vmem:[%s12796_s2 + $0x324] sm:$0xf]  ;;  %v6361_v40 = vld [vmem:[%s12796_s2 + $0x430] sm:$0xf0]  ;;  %v6108_v44 = vor.u32 %v8323_v33, %v6105_v36  ;;  %v5919_v26 = vld [vmem:[%s12796_s2 + $0xa8] sm:$0xf]  ;;  %v6320_v32 = vor.u32 %v8378_v24, %v6319_v23 }
  0x58   : > { %1897 = vmatpush.bf16.msra.mxu1 %v6300_v54  ;;  %v8387_v39 = vld [vmem:[%s12796_s2 + $0x424] sm:$0xf]  ;;  %v6489_v43 = vld [vmem:[%s12796_s2 + $0x530] sm:$0xf0]  ;;  %v6236_v46 = vor.u32 %v8355_v37, %v6233_v38  ;;  %v6175_v33 = vld [vmem:[%s12796_s2 + $0x2a8] sm:$0xf] }
  0x59   : > { %1922 = vmatpush.bf16.msrb.mxu2 %v6572_v52  ;;  %v8419_v42 = vld [vmem:[%s12796_s2 + $0x524] sm:$0xf]  ;;  %v6089_v48 = vld [vmem:[%s12796_s2 + $0x210] sm:$0xf0]  ;;  %v6364_v50 = vor.u32 %v8387_v39, %v6361_v40  ;;  %v6303_v37 = vld [vmem:[%s12796_s2 + $0x3a8] sm:$0xf] }
  0x5a   : > { %1910 = vmatpush.bf16.msra.mxu3 %v6428_v60  ;;  %v8319_v47 = vld [vmem:[%s12796_s2 + $0x204] sm:$0xf]  ;;  %v6217_v52 = vld [vmem:[%s12796_s2 + $0x310] sm:$0xf0]  ;;  %v6492_v60 = vor.u32 %v8419_v42, %v6489_v43  ;;  %v8374_v38 = vld [vmem:[%s12796_s2 + $0x3b4] sm:$0xf0] }
  0x5b   : > { %1885 = vmatpush.bf16.msra.mxu0 %v6156_v3  ;;  %v8351_v49 = vld [vmem:[%s12796_s2 + $0x304] sm:$0xf]  ;;  %v6345_v54 = vld [vmem:[%s12796_s2 + $0x410] sm:$0xf0]  ;;  %v6092_v0 = vor.u32 %v8319_v47, %v6089_v48  ;;  %v5903_v40 = vld [vmem:[%s12796_s2 + $0x88] sm:$0xf] }
  0x5c   : > { %1898 = vmatpush.bf16.msra.mxu1 %v6284_v4  ;;  %v8383_v53 = vld [vmem:[%s12796_s2 + $0x404] sm:$0xf]  ;;  %v6601_v63 = vld [vmem:[%s12796_s2 + $0x610] sm:$0xf0]  ;;  %v6220_v1 = vor.u32 %v8351_v49, %v6217_v52  ;;  %v6207_v4 = vld [vmem:[%s12796_s2 + $0x2e8] sm:$0xf] }
  0x5d   : > { %1923 = vmatpush.bf16.msrb.mxu2 %v6556_v2  ;;  %v8447_v62 = vld [vmem:[%s12796_s2 + $0x604] sm:$0xf]  ;;  %v6473_v3 = vld [vmem:[%s12796_s2 + $0x510] sm:$0xf0]  ;;  %v6348_v5 = vor.u32 %v8383_v53, %v6345_v54  ;;  %v6208_v18 = vor.u32 %v8350_v8, %v6207_v4  ;;  %v6031_v42 = vld [vmem:[%s12796_s2 + $0x188] sm:$0xf] }
  0x5e   : > { %1911 = vmatpush.bf16.msra.mxu3 %v6412_v9  ;;  %v8415_v2 = vld [vmem:[%s12796_s2 + $0x504] sm:$0xf]  ;;  %v6335_v9 = vld [vmem:[%s12796_s2 + $0x3e8] sm:$0xf]  ;;  %v6604_v12 = vor.u32 %v8447_v62, %v6601_v63  ;;  %v8306_v43 = vld [vmem:[%s12796_s2 + $0x194] sm:$0xf0] }
  0x5f   : > { %1886 = vmatpush.bf16.msra.mxu0 %v6140_v16  ;;  %v6063_v16 = vld [vmem:[%s12796_s2 + $0x1c8] sm:$0xf]  ;;  %v6336_v19 = vor.u32 %v8382_v10, %v6335_v9  ;;  %v8338_v49 = vld [vmem:[%s12796_s2 + $0x294] sm:$0xf0]  ;;  %v6032_v53 = vor.u32 %v8306_v43, %v6031_v42 }
  0x60   : > { %1899 = vmatpush.bf16.msra.mxu1 %v6268_v17  ;;  %v8314_v17 = vld [vmem:[%s12796_s2 + $0x1d4] sm:$0xf0]  ;;  %v6159_v47 = vld [vmem:[%s12796_s2 + $0x288] sm:$0xf] }
  0x61   : > { %1924 = vmatpush.bf16.msrb.mxu2 %v6540_v15  ;;  %v6476_v15 = vor.u32 %v8415_v2, %v6473_v3  ;;  %v6064_v25 = vor.u32 %v8314_v17, %v6063_v16  ;;  %v8370_v52 = vld [vmem:[%s12796_s2 + $0x394] sm:$0xf0]  ;;  %v5887_v54 = vld [vmem:[%s12796_s2 + $0x68] sm:$0xf] }
  0x62   : > { %1912 = vmatpush.bf16.msra.mxu3 %v6396_v21  ;;  %v5936_v21 = vor.u32 %v8282_v14, %v5935_v13  ;;  %v6015_v58 = vld [vmem:[%s12796_s2 + $0x168] sm:$0xf]  ;;  %v8302_v59 = vld [vmem:[%s12796_s2 + $0x174] sm:$0xf0]  ;;  %v5888_v63 = vor.u32 %v8270_v56, %v5887_v54 }
  0x63   : > { %1887 = vmatpush.bf16.msra.mxu0 %v6124_v28  ;;  %v6047_v28 = vld [vmem:[%s12796_s2 + $0x1a8] sm:$0xf]  ;;  %v8366_v2 = vld [vmem:[%s12796_s2 + $0x374] sm:$0xf0]  ;;  %v6016_v3 = vor.u32 %v8302_v59, %v6015_v58 }
  0x64   : > { %1900 = vmatpush.bf16.msra.mxu1 %v6252_v29  ;;  %v8310_v29 = vld [vmem:[%s12796_s2 + $0x1b4] sm:$0xf0]  ;;  %v6143_v62 = vld [vmem:[%s12796_s2 + $0x268] sm:$0xf] }
  0x65   : > { %1925 = vmatpush.bf16.msrb.mxu2 %v6524_v27  ;;  %v8278_v27 = vld [vmem:[%s12796_s2 + $0xb4] sm:$0xf0]  ;;  %v6048_v39 = vor.u32 %v8310_v29, %v6047_v28  ;;  %v5871_v4 = vld [vmem:[%s12796_s2 + $0x48] sm:$0xf] }
  0x66   : > { %1913 = vmatpush.bf16.msra.mxu3 %v6380_v34  ;;  %v8342_v34 = vld [vmem:[%s12796_s2 + $0x2b4] sm:$0xf0]  ;;  %v5920_v36 = vor.u32 %v8278_v27, %v5919_v26  ;;  %v6255_v14 = vld [vmem:[%s12796_s2 + $0x348] sm:$0xf] }
  0x67   : > { %1888 = vmatpush.bf16.msra.mxu0 %v6108_v44  ;;  %v6176_v44 = vor.u32 %v8342_v34, %v6175_v33  ;;  %v8298_v8 = vld [vmem:[%s12796_s2 + $0x154] sm:$0xf0]  ;;  %v5855_v17 = vld [vmem:[%s12796_s2 + $0x28] sm:$0xf] }
  0x68   : > { %1901 = vmatpush.bf16.msra.mxu1 %v6236_v46  ;;  %v6304_v46 = vor.u32 %v8374_v38, %v6303_v37  ;;  %v8330_v13 = vld [vmem:[%s12796_s2 + $0x254] sm:$0xf0]  ;;  %v6111_v23 = vld [vmem:[%s12796_s2 + $0x228] sm:$0xf] }
  0x69   : > { %1926 = vmatpush.bf16.msrb.mxu2 %v6508_v41  ;;  %v8274_v41 = vld [vmem:[%s12796_s2 + $0x94] sm:$0xf0]  ;;  %v6239_v26 = vld [vmem:[%s12796_s2 + $0x328] sm:$0xf] }
  0x6a   : > { %1914 = vmatpush.bf16.msra.mxu3 %v6364_v50  ;;  %v5904_v48 = vor.u32 %v8274_v41, %v5903_v40  ;;  %v6287_v50 = vld [vmem:[%s12796_s2 + $0x388] sm:$0xf]  ;;  %v8294_v20 = vld [vmem:[%s12796_s2 + $0x134] sm:$0xf0] }
  0x6b   : > { %1889 = vmatpush.bf16.msra.mxu0 %v6092_v0  ;;  %v6288_v61 = vor.u32 %v8370_v52, %v6287_v50  ;;  %v8334_v0 = vld [vmem:[%s12796_s2 + $0x274] sm:$0xf0]  ;;  %v5839_v28 = vld [vmem:[%s12796_s2 + $0x8] sm:$0xf]  ;;  %v5953_v50 = vld [vmem:[%s12796_s2 + $0xf8] sm:$0xf0] }
  0x6c   : > { %1902 = vmatpush.bf16.msra.mxu1 %v6220_v1  ;;  %v6271_v1 = vld [vmem:[%s12796_s2 + $0x368] sm:$0xf]  ;;  %v6144_v9 = vor.u32 %v8334_v0, %v6143_v62  ;;  %v8326_v24 = vld [vmem:[%s12796_s2 + $0x234] sm:$0xf0] }
  0x6d   : > { %1927 = vmatpush.bf16.msrb.mxu2 %v6492_v60  ;;  %v6160_v60 = vor.u32 %v8338_v49, %v6159_v47  ;;  %v6272_v10 = vor.u32 %v8366_v2, %v6271_v1  ;;  %v8358_v27 = vld [vmem:[%s12796_s2 + $0x334] sm:$0xf0]  ;;  %v6463_v34 = vld [vmem:[%s12796_s2 + $0x4e8] sm:$0xf]  ;;  %v6112_v38 = vor.u32 %v8326_v24, %v6111_v23  ;;  %v8284_v47 = vld [vmem:[%s12796_s2 + $0xec] sm:$0xf] }
  0x6e   : > { %1915 = vmatpush.bf16.msra.mxu3 %v6348_v5  ;;  %1890 = vmatmul.bf16.vlgmr.msra.gmra.mxu0 %v9219_v51  ;;  %v8266_v5 = vld [vmem:[%s12796_s2 + $0x54] sm:$0xf0]  ;;  %v6591_v37 = vld [vmem:[%s12796_s2 + $0x5e8] sm:$0xf]  ;;  %v8316_v1 = vld [vmem:[%s12796_s2 + $0x1ec] sm:$0xf] }
  0x6f   : > { %1941 = vmatpush.bf16.msrb.mxu0 %v6604_v12  ;;  %1903 = vmatmul.bf16.vlgmr.msra.gmra.mxu1 %v9232_v57  ;;  %v5872_v12 = vor.u32 %v8266_v5, %v5871_v4  ;;  %v8290_v33 = vld [vmem:[%s12796_s2 + $0x114] sm:$0xf0]  ;;  %v6095_v41 = vld [vmem:[%s12796_s2 + $0x208] sm:$0xf]  ;;  %v6081_v2 = vld [vmem:[%s12796_s2 + $0x1f8] sm:$0xf0] }
  0x70   : > { %1947 = vmatpush.bf16.msrb.mxu1 %v5952_v6  ;;  %v5999_v6 = vld [vmem:[%s12796_s2 + $0x148] sm:$0xf]  ;;  %v8446_v40 = vld [vmem:[%s12796_s2 + $0x5f4] sm:$0xf0]  ;;  %v8280_v4 = vld [vmem:[%s12796_s2 + $0xcc] sm:$0xf] }
  0x71   : > { %1928 = vmatpush.bf16.msrb.mxu2 %v6476_v15  ;;  %1916 = vmatmul.bf16.vlgmr.msra.gmra.mxu3 %v9425_v30  ;;  %v8362_v15 = vld [vmem:[%s12796_s2 + $0x354] sm:$0xf0]  ;;  %v6000_v16 = vor.u32 %v8298_v8, %v5999_v6  ;;  %v6607_v52 = vld [vmem:[%s12796_s2 + $0x608] sm:$0xf]  ;;  %v6592_v54 = vor.u32 %v8446_v40, %v6591_v37  ;;  %v5937_v5 = vld [vmem:[%s12796_s2 + $0xd8] sm:$0xf0] }
  0x72   : > { %1960 = vmatpush.bf16.msrb.mxu3 %v6080_v11  ;;  %v6127_v11 = vld [vmem:[%s12796_s2 + $0x248] sm:$0xf]  ;;  %v6256_v22 = vor.u32 %v8362_v15, %v6255_v14  ;;  %v8322_v42 = vld [vmem:[%s12796_s2 + $0x214] sm:$0xf0]  ;;  %v8312_v14 = vld [vmem:[%s12796_s2 + $0x1cc] sm:$0xf] }
  0x73   : > { %1973 = vmatpush.bf16.msra.mxu0 %v6208_v18  ;;  %v8262_v18 = vld [vmem:[%s12796_s2 + $0x34] sm:$0xf0]  ;;  %v6447_v56 = vld [vmem:[%s12796_s2 + $0x4c8] sm:$0xf]  ;;  %v6096_v59 = vor.u32 %v8322_v42, %v6095_v41  ;;  %v6065_v15 = vld [vmem:[%s12796_s2 + $0x1d8] sm:$0xf0] }
  0x74   : > { %1948 = vmatpush.bf16.msrb.mxu1 %v5936_v21  ;;  %1929 = vmatmul.bf16.vlgmr.msrb.gmra.mxu2 %v9436_v35  ;;  %v6128_v21 = vor.u32 %v8330_v13, %v6127_v11  ;;  %v8410_v58 = vld [vmem:[%s12796_s2 + $0x4d4] sm:$0xf0]  ;;  %v6431_v8 = vld [vmem:[%s12796_s2 + $0x4a8] sm:$0xf]  ;;  %v5940_v13 = vor.u32 %v8280_v4, %v5937_v5  ;;  %v8304_v40 = vld [vmem:[%s12796_s2 + $0x18c] sm:$0xf] }
  0x75   : > { %1986 = vmatpush.bf16.msra.mxu2 %v6336_v19  ;;  %v5983_v19 = vld [vmem:[%s12796_s2 + $0x128] sm:$0xf]  ;;  %v8442_v62 = vld [vmem:[%s12796_s2 + $0x5d4] sm:$0xf0]  ;;  %v6033_v41 = vld [vmem:[%s12796_s2 + $0x198] sm:$0xf0] }
  0x76   : > { %1961 = vmatpush.bf16.msrb.mxu3 %v6064_v25  ;;  %v5856_v25 = vor.u32 %v8262_v18, %v5855_v17  ;;  %v5984_v29 = vor.u32 %v8294_v20, %v5983_v19  ;;  %v6559_v11 = vld [vmem:[%s12796_s2 + $0x5a8] sm:$0xf]  ;;  %v8276_v17 = vld [vmem:[%s12796_s2 + $0xac] sm:$0xf]  ;;  %v5921_v18 = vld [vmem:[%s12796_s2 + $0xb8] sm:$0xf0] }
  0x77   : > { %1974 = vmatpush.bf16.msra.mxu0 %v6192_v31  ;;  %v8258_v31 = vld [vmem:[%s12796_s2 + $0x14] sm:$0xf0]  ;;  %v6415_v20 = vld [vmem:[%s12796_s2 + $0x488] sm:$0xf]  ;;  %v8296_v4 = vld [vmem:[%s12796_s2 + $0x14c] sm:$0xf] }
  0x78   : > { %1949 = vmatpush.bf16.msrb.mxu1 %v5920_v36  ;;  %v8414_v36 = vld [vmem:[%s12796_s2 + $0x4f4] sm:$0xf0]  ;;  %v5840_v43 = vor.u32 %v8258_v31, %v5839_v28  ;;  %v6543_v23 = vld [vmem:[%s12796_s2 + $0x588] sm:$0xf]  ;;  %v5905_v31 = vld [vmem:[%s12796_s2 + $0x98] sm:$0xf0] }
  0x79   : > { %1987 = vmatpush.bf16.msra.mxu2 %v6320_v32  ;;  %v5967_v32 = vld [vmem:[%s12796_s2 + $0x108] sm:$0xf]  ;;  %v6464_v49 = vor.u32 %v8414_v36, %v6463_v34  ;;  %v8434_v24 = vld [vmem:[%s12796_s2 + $0x594] sm:$0xf0]  ;;  %v6001_v5 = vld [vmem:[%s12796_s2 + $0x158] sm:$0xf0] }
  0x7a   : > { %1962 = vmatpush.bf16.msrb.mxu3 %v6048_v39  ;;  %v6240_v39 = vor.u32 %v8358_v27, %v6239_v26  ;;  %v8308_v26 = vld [vmem:[%s12796_s2 + $0x1ac] sm:$0xf]  ;;  %v6049_v27 = vld [vmem:[%s12796_s2 + $0x1b8] sm:$0xf0]  ;;  %v8398_v34 = vld [vmem:[%s12796_s2 + $0x474] sm:$0xf0] }
  0x7b   : > { %1975 = vmatpush.bf16.msra.mxu0 %v6176_v44  ;;  %v6223_v44 = vld [vmem:[%s12796_s2 + $0x308] sm:$0xf]  ;;  %v6052_v36 = vor.u32 %v8308_v26, %v6049_v27 }
  0x7c   : > { %1950 = vmatpush.bf16.msrb.mxu1 %v5904_v48  ;;  %v5968_v48 = vor.u32 %v8290_v33, %v5967_v32  ;;  %v6544_v32 = vor.u32 %v8434_v24, %v6543_v23  ;;  %v6399_v33 = vld [vmem:[%s12796_s2 + $0x468] sm:$0xf]  ;;  %v8256_v24 = vld [vmem:[%s12796_s2 + $0xc] sm:$0xf] }
  0x7d   : > { %1988 = vmatpush.bf16.msra.mxu2 %v6304_v46  ;;  %v8354_v46 = vld [vmem:[%s12796_s2 + $0x314] sm:$0xf0]  ;;  %v6527_v37 = vld [vmem:[%s12796_s2 + $0x568] sm:$0xf]  ;;  %v6400_v42 = vor.u32 %v8398_v34, %v6399_v33  ;;  %v8344_v33 = vld [vmem:[%s12796_s2 + $0x2cc] sm:$0xf] }
  0x7e   : > { %1963 = vmatpush.bf16.msrb.mxu3 %v6032_v53  ;;  %6614 = vmatmul.msk.bf16.vlgmr.msrb.gmra.mxu0 %vm1761_vm0, %v9338_v45  ;;  %v8450_v53 = vld [vmem:[%s12796_s2 + $0x614] sm:$0xf0]  ;;  %v6193_v34 = vld [vmem:[%s12796_s2 + $0x2d8] sm:$0xf0] }
  0x7f   : > { %1976 = vmatpush.bf16.msra.mxu0 %v6160_v60  ;;  %v6224_v60 = vor.u32 %v8354_v46, %v6223_v44  ;;  %v6608_v0 = vor.u32 %v8450_v53, %v6607_v52  ;;  %v5889_v44 = vld [vmem:[%s12796_s2 + $0x78] sm:$0xf0]  ;;  %v8426_v52 = vld [vmem:[%s12796_s2 + $0x554] sm:$0xf0] }
  0x80   : > { %1951 = vmatpush.bf16.msrb.mxu1 %v5888_v63  ;;  %v5956_v63 = vor.u32 %v8284_v47, %v5953_v50  ;;  %v6383_v47 = vld [vmem:[%s12796_s2 + $0x448] sm:$0xf] }
  0x81   : > { %1989 = vmatpush.bf16.msra.mxu2 %v6288_v61  ;;  %v6575_v61 = vld [vmem:[%s12796_s2 + $0x5c8] sm:$0xf] }
  0x82   : > { %1964 = vmatpush.bf16.msrb.mxu3 %v6016_v3  ;;  %v6448_v3 = vor.u32 %v8410_v58, %v6447_v56  ;;  %v6576_v6 = vor.u32 %v8442_v62, %v6575_v61  ;;  %v6511_v50 = vld [vmem:[%s12796_s2 + $0x548] sm:$0xf]  ;;  %v6017_v56 = vld [vmem:[%s12796_s2 + $0x178] sm:$0xf0] }
  0x83   : > { %1977 = vmatpush.bf16.msra.mxu0 %v6144_v9  ;;  %v8406_v9 = vld [vmem:[%s12796_s2 + $0x4b4] sm:$0xf0]  ;;  %v6512_v61 = vor.u32 %v8426_v52, %v6511_v50  ;;  %v6367_v62 = vld [vmem:[%s12796_s2 + $0x428] sm:$0xf]  ;;  %v8340_v50 = vld [vmem:[%s12796_s2 + $0x2ac] sm:$0xf] }
  0x84   : > { %1952 = vmatpush.bf16.msrb.mxu1 %v5872_v12  ;;  %v8438_v12 = vld [vmem:[%s12796_s2 + $0x5b4] sm:$0xf0]  ;;  %v6177_v52 = vld [vmem:[%s12796_s2 + $0x2b8] sm:$0xf0] }
  0x85   : > { %1990 = vmatpush.bf16.msra.mxu2 %v6272_v10  ;;  %v6084_v10 = vor.u32 %v8316_v1, %v6081_v2  ;;  %v6560_v19 = vor.u32 %v8438_v12, %v6559_v11  ;;  %v6495_v1 = vld [vmem:[%s12796_s2 + $0x528] sm:$0xf]  ;;  %v8422_v2 = vld [vmem:[%s12796_s2 + $0x534] sm:$0xf0] }
  0x86   : > { %1965 = vmatpush.bf16.msrb.mxu3 %v6000_v16  ;;  %v6432_v16 = vor.u32 %v8406_v9, %v6431_v8  ;;  %v8260_v8 = vld [vmem:[%s12796_s2 + $0x2c] sm:$0xf]  ;;  %v5857_v9 = vld [vmem:[%s12796_s2 + $0x38] sm:$0xf0]  ;;  %v6496_v11 = vor.u32 %v8422_v2, %v6495_v1  ;;  %v8386_v12 = vld [vmem:[%s12796_s2 + $0x414] sm:$0xf0] }
  0x87   : > { %1978 = vmatpush.bf16.msra.mxu0 %v6128_v21  ;;  %v8402_v21 = vld [vmem:[%s12796_s2 + $0x494] sm:$0xf0]  ;;  %v8336_v1 = vld [vmem:[%s12796_s2 + $0x28c] sm:$0xf]  ;;  %v6161_v2 = vld [vmem:[%s12796_s2 + $0x298] sm:$0xf0] }
  0x88   : > { %1953 = vmatpush.bf16.msrb.mxu1 %v5856_v25  ;;  %v5924_v25 = vor.u32 %v8276_v17, %v5921_v18  ;;  %v6416_v28 = vor.u32 %v8402_v21, %v6415_v20  ;;  %v6209_v17 = vld [vmem:[%s12796_s2 + $0x2f8] sm:$0xf0]  ;;  %v8380_v18 = vld [vmem:[%s12796_s2 + $0x3ec] sm:$0xf] }
  0x89   : > { %1991 = vmatpush.bf16.msra.mxu2 %v6256_v22  ;;  %v6068_v22 = vor.u32 %v8312_v14, %v6065_v15  ;;  %v8418_v14 = vld [vmem:[%s12796_s2 + $0x514] sm:$0xf0]  ;;  %v6004_v15 = vor.u32 %v8296_v4, %v6001_v5  ;;  %v6337_v20 = vld [vmem:[%s12796_s2 + $0x3f8] sm:$0xf0]  ;;  %v8292_v21 = vld [vmem:[%s12796_s2 + $0x12c] sm:$0xf] }
  0x8a   : > { %1966 = vmatpush.bf16.msrb.mxu3 %v5984_v29  ;;  %v8272_v29 = vld [vmem:[%s12796_s2 + $0x8c] sm:$0xf]  ;;  %v6289_v5 = vld [vmem:[%s12796_s2 + $0x398] sm:$0xf0] }
  0x8b   : > { %1979 = vmatpush.bf16.msra.mxu0 %v6112_v38  ;;  %v8430_v38 = vld [vmem:[%s12796_s2 + $0x574] sm:$0xf0]  ;;  %v8368_v4 = vld [vmem:[%s12796_s2 + $0x38c] sm:$0xf] }
  0x8c   : > { %1954 = vmatpush.bf16.msrb.mxu1 %v5840_v43  ;;  %v8268_v43 = vld [vmem:[%s12796_s2 + $0x6c] sm:$0xf]  ;;  %v6528_v46 = vor.u32 %v8430_v38, %v6527_v37  ;;  %v6321_v38 = vld [vmem:[%s12796_s2 + $0x3d8] sm:$0xf0] }
  0x8d   : > { %1992 = vmatpush.bf16.msra.mxu2 %v6240_v39  ;;  %v5908_v39 = vor.u32 %v8272_v29, %v5905_v31  ;;  %v5892_v53 = vor.u32 %v8268_v43, %v5889_v44  ;;  %v6465_v29 = vld [vmem:[%s12796_s2 + $0x4f8] sm:$0xf0]  ;;  %v6340_v31 = vor.u32 %v8380_v18, %v6337_v20  ;;  %v6196_v44 = vor.u32 %v8344_v33, %v6193_v34  ;;  %v8428_v33 = vld [vmem:[%s12796_s2 + $0x56c] sm:$0xf] }
  0x8e   : > { %1967 = vmatpush.bf16.msrb.mxu3 %v5968_v48  ;;  %v8394_v48 = vld [vmem:[%s12796_s2 + $0x454] sm:$0xf0]  ;;  %v6593_v43 = vld [vmem:[%s12796_s2 + $0x5f8] sm:$0xf0] }
  0x8f   : > { %1980 = vmatpush.bf16.msra.mxu0 %v6096_v59  ;;  %1955 = vmatmul.bf16.vlgmr.msrb.gmra.mxu1 %v9230_v55  ;;  %v6384_v58 = vor.u32 %v8394_v48, %v6383_v47  ;;  %v8264_v59 = vld [vmem:[%s12796_s2 + $0x4c] sm:$0xf]  ;;  %v6449_v47 = vld [vmem:[%s12796_s2 + $0x4d8] sm:$0xf0] }
  0x90   : > { %1999 = vmatpush.bf16.msra.mxu1 %v6464_v49  ;;  %v6036_v49 = vor.u32 %v8304_v40, %v6033_v41  ;;  %v5969_v40 = vld [vmem:[%s12796_s2 + $0x118] sm:$0xf0] }
  0x91   : > { %1993 = vmatpush.bf16.msra.mxu2 %v6224_v60  ;;  %1968 = vmatmul.bf16.vlgmr.msrb.gmra.mxu3 %v9261_v7  ;;  %v5873_v60 = vld [vmem:[%s12796_s2 + $0x58] sm:$0xf0] }
  0x92   : > { %2012 = vmatpush.bf16.msra.mxu3 %v6592_v54  ;;  %1981 = vmatmul.bf16.vlgmr.msra.gmra.mxu0 %v9219_v51  ;;  %v8300_v54 = vld [vmem:[%s12796_s2 + $0x16c] sm:$0xf]  ;;  %v6545_v20 = vld [vmem:[%s12796_s2 + $0x598] sm:$0xf0] }
  0x93   : > { %2032 = vmatpush.bf16.msrb.mxu0 %v6608_v0  ;;  %v6020_v0 = vor.u32 %v8300_v54, %v6017_v56  ;;  %v8372_v54 = vld [vmem:[%s12796_s2 + $0x3ac] sm:$0xf]  ;;  %v6305_v56 = vld [vmem:[%s12796_s2 + $0x3b8] sm:$0xf0] }
  0x94   : > { %2000 = vmatpush.bf16.msra.mxu1 %v6448_v3  ;;  %1994 = vmatmul.bf16.vlgmr.msra.gmra.mxu2 %v9232_v57  ;;  %v5876_v3 = vor.u32 %v8264_v59, %v5873_v60  ;;  %v8440_v59 = vld [vmem:[%s12796_s2 + $0x5cc] sm:$0xf]  ;;  %v6577_v60 = vld [vmem:[%s12796_s2 + $0x5d8] sm:$0xf0] }
  0x95   : > { %2038 = vmatpush.bf16.msrb.mxu2 %v5956_v63  ;;  %v8390_v63 = vld [vmem:[%s12796_s2 + $0x434] sm:$0xf0]  ;;  %v6529_v34 = vld [vmem:[%s12796_s2 + $0x578] sm:$0xf0] }
  0x96   : > { %2013 = vmatpush.bf16.msra.mxu3 %v6576_v6  ;;  %v6368_v6 = vor.u32 %v8390_v63, %v6367_v62  ;;  %v8404_v62 = vld [vmem:[%s12796_s2 + $0x4ac] sm:$0xf]  ;;  %v6433_v63 = vld [vmem:[%s12796_s2 + $0x4b8] sm:$0xf0] }
  0x97   : > { %2051 = vmatpush.bf16.msra.mxu0 %v6084_v10  ;;  %v6351_v10 = vld [vmem:[%s12796_s2 + $0x408] sm:$0xf] }
  0x98   : > { %2001 = vmatpush.bf16.msra.mxu1 %v6432_v16  ;;  %v8348_v16 = vld [vmem:[%s12796_s2 + $0x2ec] sm:$0xf]  ;;  %v6352_v23 = vor.u32 %v8386_v12, %v6351_v10  ;;  %v6164_v10 = vor.u32 %v8336_v1, %v6161_v2  ;;  %v6292_v12 = vor.u32 %v8368_v4, %v6289_v5  ;;  %v6731_v1 = vld [vmem:[%s12798_s4 + $0xe0] sm:$0xf]  ;;  %v6609_v4 = vld [vmem:[%s12796_s2 + $0x618] sm:$0xf0] }
  0x99   : > { %2039 = vmatpush.bf16.msrb.mxu2 %v5940_v13  ;;  %v6479_v13 = vld [vmem:[%s12796_s2 + $0x508] sm:$0xf]  ;;  %v6212_v27 = vor.u32 %v8348_v16, %v6209_v17  ;;  %v8364_v16 = vld [vmem:[%s12796_s2 + $0x36c] sm:$0xf] }
  0x9a   : > { %2014 = vmatpush.bf16.msra.mxu3 %v6560_v19  ;;  %v5860_v19 = vor.u32 %v8260_v8, %v5857_v9  ;;  %v6480_v26 = vor.u32 %v8418_v14, %v6479_v13  ;;  %v8436_v8 = vld [vmem:[%s12796_s2 + $0x5ac] sm:$0xf]  ;;  %v6561_v9 = vld [vmem:[%s12796_s2 + $0x5b8] sm:$0xf0] }
  0x9b   : > { %2052 = vmatpush.bf16.msra.mxu0 %v6068_v22  ;;  %v5985_v22 = vld [vmem:[%s12796_s2 + $0x138] sm:$0xf0]  ;;  %v8332_v13 = vld [vmem:[%s12796_s2 + $0x26c] sm:$0xf] }
  0x9c   : > { %2002 = vmatpush.bf16.msra.mxu1 %v6416_v28  ;;  %v8412_v28 = vld [vmem:[%s12796_s2 + $0x4ec] sm:$0xf]  ;;  %v6145_v14 = vld [vmem:[%s12796_s2 + $0x278] sm:$0xf0] }
  0x9d   : > { %2040 = vmatpush.bf16.msrb.mxu2 %v5924_v25  ;;  %v5841_v25 = vld [vmem:[%s12796_s2 + $0x18] sm:$0xf0]  ;;  %v6468_v41 = vor.u32 %v8412_v28, %v6465_v29  ;;  %v8360_v29 = vld [vmem:[%s12796_s2 + $0x34c] sm:$0xf] }
  0x9e   : > { %2015 = vmatpush.bf16.msra.mxu3 %v6544_v32  ;;  %v5988_v32 = vor.u32 %v8292_v21, %v5985_v22  ;;  %v5844_v37 = vor.u32 %v8256_v24, %v5841_v25  ;;  %v6148_v21 = vor.u32 %v8332_v13, %v6145_v14  ;;  %v8396_v22 = vld [vmem:[%s12796_s2 + $0x46c] sm:$0xf] }
  0x9f   : > { %2053 = vmatpush.bf16.msra.mxu0 %v6052_v36  ;;  %v8376_v36 = vld [vmem:[%s12796_s2 + $0x3cc] sm:$0xf] }
  0xa0   : > { %2003 = vmatpush.bf16.msra.mxu1 %v6400_v42  ;;  %v8444_v42 = vld [vmem:[%s12796_s2 + $0x5ec] sm:$0xf]  ;;  %v6324_v48 = vor.u32 %v8376_v36, %v6321_v38 }
  0xa1   : > { %2041 = vmatpush.bf16.msrb.mxu2 %v5908_v39  ;;  %v8288_v39 = vld [vmem:[%s12796_s2 + $0x10c] sm:$0xf] }
  0xa2   : > { %2016 = vmatpush.bf16.msra.mxu3 %v6528_v46  ;;  %6615 = vmatmul.msk.bf16.vlgmr.msrb.gmra.mxu0 %vm1761_vm0, %v9338_v45  ;;  %v8408_v46 = vld [vmem:[%s12796_s2 + $0x4cc] sm:$0xf] }
  0xa3   : > { %2054 = vmatpush.bf16.msra.mxu0 %v6036_v49  ;;  %v5972_v49 = vor.u32 %v8288_v39, %v5969_v40  ;;  %v8328_v25 = vld [vmem:[%s12796_s2 + $0x24c] sm:$0xf]  ;;  %v6385_v39 = vld [vmem:[%s12796_s2 + $0x458] sm:$0xf0] }
  0xa4   : > { %2004 = vmatpush.bf16.msra.mxu1 %v6384_v58  ;;  %v6452_v58 = vor.u32 %v8408_v46, %v6449_v47  ;;  %v8392_v38 = vld [vmem:[%s12796_s2 + $0x44c] sm:$0xf]  ;;  %v6241_v47 = vld [vmem:[%s12796_s2 + $0x338] sm:$0xf0] }
  0xa5   : > { %2042 = vmatpush.bf16.msrb.mxu2 %v5892_v53  ;;  %v6596_v53 = vor.u32 %v8444_v42, %v6593_v43  ;;  %v8324_v42 = vld [vmem:[%s12796_s2 + $0x22c] sm:$0xf]  ;;  %v6113_v43 = vld [vmem:[%s12796_s2 + $0x238] sm:$0xf0] }
  0xa6   : > { %2017 = vmatpush.bf16.msra.mxu3 %v6512_v61  ;;  %v6180_v61 = vor.u32 %v8340_v50, %v6177_v52  ;;  %v8356_v46 = vld [vmem:[%s12796_s2 + $0x32c] sm:$0xf]  ;;  %v6513_v52 = vld [vmem:[%s12796_s2 + $0x558] sm:$0xf0] }
  0xa7   : > { %2055 = vmatpush.bf16.msra.mxu0 %v6020_v0  ;;  %v6308_v0 = vor.u32 %v8372_v54, %v6305_v56  ;;  %v8424_v50 = vld [vmem:[%s12796_s2 + $0x54c] sm:$0xf]  ;;  %v6116_v54 = vor.u32 %v8324_v42, %v6113_v43  ;;  %v8469_v42 = vld [vmem:[%s12798_s4 + $0x8c] sm:$0xf0] }
  0xa8   : > { %2005 = vmatpush.bf16.msra.mxu1 %v6368_v6  ;;  %v6436_v6 = vor.u32 %v8404_v62, %v6433_v63  ;;  %v8388_v56 = vld [vmem:[%s12796_s2 + $0x42c] sm:$0xf]  ;;  %v6225_v63 = vld [vmem:[%s12796_s2 + $0x318] sm:$0xf0] }
  0xa9   : > { %2043 = vmatpush.bf16.msrb.mxu2 %v5876_v3  ;;  %v6580_v3 = vor.u32 %v8440_v59, %v6577_v60  ;;  %v8320_v59 = vld [vmem:[%s12796_s2 + $0x20c] sm:$0xf]  ;;  %v6244_v60 = vor.u32 %v8356_v46, %v6241_v47  ;;  %v6667_v46 = vld [vmem:[%s12798_s4 + $0x60] sm:$0xf] }
  0xaa   : > { %2018 = vmatpush.bf16.msra.mxu3 %v6496_v11  ;;  %v8400_v11 = vld [vmem:[%s12796_s2 + $0x48c] sm:$0xf] }
  0xab   : > { %2056 = vmatpush.bf16.msra.mxu0 %v6004_v15  ;;  %v6564_v15 = vor.u32 %v8436_v8, %v6561_v9  ;;  %v8352_v62 = vld [vmem:[%s12796_s2 + $0x30c] sm:$0xf]  ;;  %v6497_v9 = vld [vmem:[%s12796_s2 + $0x538] sm:$0xf0] }
  0xac   : > { %2006 = vmatpush.bf16.msra.mxu1 %v6352_v23  ;;  %v6401_v23 = vld [vmem:[%s12796_s2 + $0x478] sm:$0xf0]  ;;  %v10132_v28 = vpop.f32.mrf.mxu1  ;;  %v8420_v8 = vld [vmem:[%s12796_s2 + $0x52c] sm:$0xf]  ;;  %v6228_v14 = vor.u32 %v8352_v62, %v6225_v63  ;;  %v8497_v62 = vld [vmem:[%s12798_s4 + $0x16c] sm:$0xf0] }
  0xad   : > { %2044 = vmatpush.bf16.msrb.mxu2 %v5860_v19  ;;  %v8432_v19 = vld [vmem:[%s12796_s2 + $0x58c] sm:$0xf] }
  0xae   : > { %2019 = vmatpush.bf16.msra.mxu3 %v6480_v26  ;;  %v6129_v26 = vld [vmem:[%s12796_s2 + $0x258] sm:$0xf0] }
  0xaf   : > { %2057 = vmatpush.bf16.msra.mxu0 %v5988_v32  ;;  %2007 = vmatmul.bf16.vlgmr.msra.gmra.mxu1 %v9425_v30  ;;  %v6404_v32 = vor.u32 %v8396_v22, %v6401_v23  ;;  %v6859_v22 = vld [vmem:[%s12798_s4 + $0x1e0] sm:$0xf]  ;;  %v8513_v23 = vld [vmem:[%s12798_s4 + $0x1ec] sm:$0xf0] }
  0xb0   : > { %2064 = vmatpush.bf16.msrb.mxu1 %v6212_v27  ;;  %v6548_v27 = vor.u32 %v8432_v19, %v6545_v20  ;;  %v6715_v19 = vld [vmem:[%s12798_s4 + $0xc0] sm:$0xf] }
  0xb1   : > { %2045 = vmatpush.bf16.msrb.mxu2 %v5844_v37  ;;  %2020 = vmatmul.bf16.vlgmr.msra.gmra.mxu3 %v9436_v35  ;;  %v10112_v17 = vpop.f32.mrf.mxu0  ;;  %v6132_v37 = vor.u32 %v8328_v25, %v6129_v26  ;;  %v6481_v25 = vld [vmem:[%s12796_s2 + $0x518] sm:$0xf0]  ;;  %v6860_v26 = vor.u32 %v8513_v23, %v6859_v22  ;;  %v6747_v22 = vld [vmem:[%s12798_s4 + $0x100] sm:$0xf]  ;;  %v8485_v23 = vld [vmem:[%s12798_s4 + $0x10c] sm:$0xf0] }
  0xb2   : > { %2077 = vmatpush.bf16.msrb.mxu3 %v6340_v31  ;;  %v6257_v31 = vld [vmem:[%s12796_s2 + $0x358] sm:$0xf0] }
  0xb3   : > { %2058 = vmatpush.bf16.msra.mxu0 %v5972_v49  ;;  %v6260_v40 = vor.u32 %v8360_v29, %v6257_v31  ;;  %v6388_v49 = vor.u32 %v8392_v38, %v6385_v39  ;;  %v6699_v31 = vld [vmem:[%s12798_s4 + $0xa0] sm:$0xf] }
  0xb4   : > { %2065 = vmatpush.bf16.msrb.mxu1 %v6196_v44  ;;  %2046 = vmatmul.bf16.vlgmr.msrb.gmra.mxu2 %v9230_v55  ;;  %v6417_v55 = vld [vmem:[%s12796_s2 + $0x498] sm:$0xf0]  ;;  %v6532_v44 = vor.u32 %v8428_v33, %v6529_v34  ;;  %v1789_v2 = vpop.f32.mrf.mxu1  ;;  %v8473_v33 = vld [vmem:[%s12798_s4 + $0xac] sm:$0xf0] }
  0xb5   : > { %2090 = vmatpush.bf16.msra.mxu2 %v6468_v41  ;;  %v6420_v18 = vor.u32 %v8400_v11, %v6417_v55  ;;  %v10154_v41 = vpop.f32.mrf.mxu3  ;;  %v8384_v55 = vld [vmem:[%s12796_s2 + $0x40c] sm:$0xf]  ;;  %v8509_v34 = vld [vmem:[%s12798_s4 + $0x1cc] sm:$0xf0]  ;;  %v6700_v39 = vor.u32 %v8473_v33, %v6699_v31  ;;  %v8471_v33 = vld [vmem:[%s12798_s4 + $0xa4] sm:$0xf] }
  0xb6   : > { %2078 = vmatpush.bf16.msrb.mxu3 %v6324_v48  ;;  %2059 = vmatmul.bf16.vlgmr.msra.gmra.mxu0 %v9261_v7  ;;  %v6273_v7 = vld [vmem:[%s12796_s2 + $0x378] sm:$0xf0]  ;;  %v10146_v36 = vpop.f32.mrf.mxu2  ;;  %v8457_v2 = vld [vmem:[%s12798_s4 + $0x2c] sm:$0xf0] }
  0xb7   : > { %2103 = vmatpush.bf16.msrb.mxu0 %v6596_v53  ;;  %v6276_v24 = vor.u32 %v8364_v16, %v6273_v7  ;;  %v10177_v53 = vld [vmem:[%s12797_s3] sm:$0xf] }
  0xb8   : > { %2066 = vmatpush.bf16.msrb.mxu1 %v6180_v61  ;;  %v6097_v61 = vld [vmem:[%s12796_s2 + $0x218] sm:$0xf0]  ;;  %v773_v13 = vperm.slane %v10177_v53, 0 }
  0xb9   : > { %2091 = vmatpush.bf16.msra.mxu2 %v6452_v58  ;;  %v1776_v48 = vpop.f32.mrf.mxu0  ;;  %v6369_v58 = vld [vmem:[%s12796_s2 + $0x438] sm:$0xf0]  ;;  %v6100_v11 = vor.u32 %v8320_v59, %v6097_v61  ;;  %v6795_v61 = vld [vmem:[%s12798_s4 + $0x160] sm:$0xf] }
  0xba   : > { %2079 = vmatpush.bf16.msrb.mxu3 %v6308_v0  ;;  %v6516_v0 = vor.u32 %v8424_v50, %v6513_v52  ;;  %v6372_v5 = vor.u32 %v8388_v56, %v6369_v58  ;;  %v8465_v48 = vld [vmem:[%s12798_s4 + $0x6c] sm:$0xf0]  ;;  %v6651_v58 = vld [vmem:[%s12798_s4 + $0x40] sm:$0xf] }
  0xbb   : > { %2104 = vmatpush.bf16.msrb.mxu0 %v6580_v3  ;;  %v8448_v3 = vld [vmem:[%s12796_s2 + $0x60c] sm:$0xf]  ;;  %v6668_v56 = vor.u32 %v8465_v48, %v6667_v46  ;;  %v6653_v46 = vld [vmem:[%s12798_s4 + $0x50] sm:$0xf0] }
  0xbc   : > { %2067 = vmatpush.bf16.msrb.mxu1 %v6164_v10 }
  0xbd   : > { %2092 = vmatpush.bf16.msra.mxu2 %v6436_v6  ;;  %v8481_v6 = vld [vmem:[%s12798_s4 + $0xec] sm:$0xf0]  ;;  %v1815_v16 = vpop.f32.mrf.mxu3 }
  0xbe   : > { %2080 = vmatpush.bf16.msrb.mxu3 %v6292_v12  ;;  %v1802_v10 = vpop.f32.mrf.mxu2  ;;  %v6353_v12 = vld [vmem:[%s12796_s2 + $0x418] sm:$0xf0]  ;;  %v6732_v7 = vor.u32 %v8481_v6, %v6731_v1  ;;  %v8493_v6 = vld [vmem:[%s12798_s4 + $0x14c] sm:$0xf0]  ;;  %v6733_v16 = vld [vmem:[%s12798_s4 + $0xf0] sm:$0xf0] }
  0xbf   : > { %2105 = vmatpush.bf16.msrb.mxu0 %v6564_v15  ;;  %v6612_v15 = vor.u32 %v8448_v3, %v6609_v4  ;;  %v6356_v20 = vor.u32 %v8384_v55, %v6353_v12  ;;  %v8453_v12 = vld [vmem:[%s12798_s4 + $0xc] sm:$0xf0] }
  0xc0   : > { %2068 = vmatpush.bf16.msrb.mxu1 %v6148_v21  ;;  %v8477_v21 = vld [vmem:[%s12798_s4 + $0xcc] sm:$0xf0] }
  0xc1   : > { %2093 = vmatpush.bf16.msra.mxu2 %v6420_v18  ;;  %v6500_v18 = vor.u32 %v8420_v8, %v6497_v9  ;;  %v6716_v29 = vor.u32 %v8477_v21, %v6715_v19 }
  0xc2   : > { %2081 = vmatpush.bf16.msrb.mxu3 %v6276_v24  ;;  %v8416_v24 = vld [vmem:[%s12796_s2 + $0x50c] sm:$0xf] }
  0xc3   : > { %2106 = vmatpush.bf16.msrb.mxu0 %v6548_v27  ;;  %v1775_v27 = vadd.f32 %v10112_v17, %v773_v13  ;;  %v6843_v17 = vld [vmem:[%s12798_s4 + $0x1c0] sm:$0xf] }
  0xc4   : > { %2069 = vmatpush.bf16.msrb.mxu1 %v6132_v37  ;;  %v6844_v38 = vor.u32 %v8509_v34, %v6843_v17  ;;  %v6763_v13 = vld [vmem:[%s12798_s4 + $0x120] sm:$0xf]  ;;  %v6701_v17 = vld [vmem:[%s12798_s4 + $0xb0] sm:$0xf0] }
  0xc5   : > { %2094 = vmatpush.bf16.msra.mxu2 %v6404_v32  ;;  %v6484_v32 = vor.u32 %v8416_v24, %v6481_v25  ;;  %v8475_v24 = vld [vmem:[%s12798_s4 + $0xc4] sm:$0xf]  ;;  %v6717_v25 = vld [vmem:[%s12798_s4 + $0xd0] sm:$0xf0] }
  0xc6   : > { %2082 = vmatpush.bf16.msrb.mxu3 %v6260_v40  ;;  %v1852_v37 = vpop.f32.mrf.mxu2  ;;  %v6683_v40 = vld [vmem:[%s12798_s4 + $0x80] sm:$0xf] }
  0xc7   : > { %2107 = vmatpush.bf16.msrb.mxu0 %v6532_v44  ;;  %v6684_v44 = vor.u32 %v8469_v42, %v6683_v40  ;;  %v8463_v42 = vld [vmem:[%s12798_s4 + $0x64] sm:$0xf] }
  0xc8   : > { %2070 = vmatpush.bf16.msrb.mxu1 %v6116_v54 }
  0xc9   : > { %2095 = vmatpush.bf16.msra.mxu2 %v6388_v49  ;;  %v6811_v49 = vld [vmem:[%s12798_s4 + $0x180] sm:$0xf] }
  0xca   : > { %2083 = vmatpush.bf16.msrb.mxu3 %v6244_v60  ;;  %v8461_v60 = vld [vmem:[%s12798_s4 + $0x4c] sm:$0xf0] }
  0xcb   : > { %2108 = vmatpush.bf16.msrb.mxu0 %v6516_v0  ;;  %v1826_v47 = vpop.f32.mrf.mxu0  ;;  %v6652_v63 = vor.u32 %v8461_v60, %v6651_v58  ;;  %v6635_v0 = vld [vmem:[%s12798_s4 + $0x20] sm:$0xf]  ;;  %v8543_v58 = vld [vmem:[%s12798_s4 + $0x2e4] sm:$0xf] }
  0xcc   : > { %2071 = vmatpush.bf16.msrb.mxu1 %v6100_v11  ;;  %v6619_v11 = vld [vmem:[%s12798_s4] sm:$0xf] }
  0xcd   : > { %2096 = vmatpush.bf16.msra.mxu2 %v6372_v5  ;;  %v6779_v5 = vld [vmem:[%s12798_s4 + $0x140] sm:$0xf] }
  0xce   : > { %2084 = vmatpush.bf16.msrb.mxu3 %v6228_v14  ;;  %v1854_v50 = vpop.f32.mrf.mxu2  ;;  %v6780_v9 = vor.u32 %v8493_v6, %v6779_v5  ;;  %v8489_v14 = vld [vmem:[%s12798_s4 + $0x12c] sm:$0xf0]  ;;  %v6867_v5 = vld [vmem:[%s12798_s4 + $0x1e8] sm:$0xf]  ;;  %v8514_v6 = vld [vmem:[%s12798_s4 + $0x1f4] sm:$0xf0] }
  0xcf   : > { %2109 = vmatpush.bf16.msrb.mxu0 %v6500_v18  ;;  %2072 = vmatmul.bf16.vlgmr.msrb.gmra.mxu1 %v9219_v51  ;;  %v1788_v51 = vadd.f32 %v10132_v28, %v1775_v27  ;;  %v8505_v28 = vld [vmem:[%s12798_s4 + $0x1ac] sm:$0xf0]  ;;  %v6620_v18 = vor.u32 %v8453_v12, %v6619_v11  ;;  %v6868_v12 = vor.u32 %v8514_v6, %v6867_v5  ;;  %v6771_v6 = vld [vmem:[%s12798_s4 + $0x128] sm:$0xf] }
  0xd0   : > { %2123 = vmatpush.bf16.msra.mxu1 %v6612_v15  ;;  %v8479_v15 = vld [vmem:[%s12798_s4 + $0xe4] sm:$0xf] }
  0xd1   : > { %2097 = vmatpush.bf16.msra.mxu2 %v6356_v20  ;;  %2085 = vmatmul.bf16.vlgmr.msrb.gmra.mxu3 %v9232_v57  ;;  %v6827_v57 = vld [vmem:[%s12798_s4 + $0x1a0] sm:$0xf]  ;;  %v1801_v43 = vadd.f32 %v10146_v36, %v1788_v51  ;;  %v8501_v36 = vld [vmem:[%s12798_s4 + $0x18c] sm:$0xf0]  ;;  %v6736_v20 = vor.u32 %v8479_v15, %v6733_v16  ;;  %v6685_v51 = vld [vmem:[%s12798_s4 + $0x90] sm:$0xf0] }
  0xd2   : > { %2750 = vmatpush.bf16.msra.mxu3 %v6732_v7  ;;  %v6812_v52 = vor.u32 %v8501_v36, %v6811_v49  ;;  %v6764_v7 = vor.u32 %v8489_v14, %v6763_v13  ;;  %v8455_v36 = vld [vmem:[%s12798_s4 + $0x24] sm:$0xf]  ;;  %v6851_v13 = vld [vmem:[%s12798_s4 + $0x1c8] sm:$0xf]  ;;  %v8510_v14 = vld [vmem:[%s12798_s4 + $0x1d4] sm:$0xf0] }
  0xd3   : > { %2110 = vmatpush.bf16.msrb.mxu0 %v6484_v32  ;;  %v1814_v54 = vadd.f32 %v10154_v41, %v1801_v43  ;;  %v6796_v41 = vor.u32 %v8497_v62, %v6795_v61  ;;  %v1828_v3 = vpop.f32.mrf.mxu0  ;;  %v6720_v32 = vor.u32 %v8475_v24, %v6717_v25  ;;  %v6989_v62 = vld [vmem:[%s12798_s4 + $0x2f0] sm:$0xf0] }
  0xd4   : > { %2763 = vmatpush.bf16.msrb.mxu1 %v6860_v26  ;;  %2098 = vmatmul.bf16.vlgmr.msra.gmra.mxu2 %v9425_v30  ;;  %v6828_v30 = vor.u32 %v8505_v28, %v6827_v57  ;;  %v1865_v4 = vpop.f32.mrf.mxu3  ;;  %v6748_v26 = vor.u32 %v8485_v23, %v6747_v22  ;;  %v6669_v57 = vld [vmem:[%s12798_s4 + $0x70] sm:$0xf0]  ;;  %v8541_v3 = vld [vmem:[%s12798_s4 + $0x2cc] sm:$0xf0] }
  0xd5   : > { %v1827_v59 = vadd.f32 %v1826_v47, %v1814_v54  ;;  %v6672_v43 = vor.u32 %v8463_v42, %v6669_v57  ;;  %v6987_v54 = vld [vmem:[%s12798_s4 + $0x2e0] sm:$0xf]  ;;  %v6957_v23 = vld [vmem:[%s12798_s4 + $0x2b0] sm:$0xf0]  ;;  %v8502_v42 = vld [vmem:[%s12798_s4 + $0x194] sm:$0xf0] }
  0xd6   : > { %2751 = vmatpush.bf16.msra.mxu3 %v6716_v29  ;;  %2111 = vmatmul.bf16.vlgmr.msrb.gmra.mxu0 %v9436_v35  ;;  %v1839_v35 = vpop.f32.mrf.mxu1  ;;  %v774_v29 = vperm.slane %v10177_v53, 1 }
  0xd7   : > { %v1840_v1 = vadd.f32 %v1839_v35, %v1827_v59  ;;  %v1878_v10 = vpop.f32.mrf.mxu2  ;;  %v6637_v35 = vld [vmem:[%s12798_s4 + $0x30] sm:$0xf0] }
  0xd8   : > { %2764 = vmatpush.bf16.msrb.mxu1 %v6844_v38  ;;  %v1866_v34 = vadd.f32 %v1865_v4, %v774_v29  ;;  %v8467_v38 = vld [vmem:[%s12798_s4 + $0x84] sm:$0xf]  ;;  %v8506_v29 = vld [vmem:[%s12798_s4 + $0x1b4] sm:$0xf0] }
  0xd9   : > { %v1853_v55 = vadd.f32 %v1852_v37, %v1840_v1  ;;  %v6704_v37 = vor.u32 %v8471_v33, %v6701_v17  ;;  %v6688_v40 = vor.u32 %v8467_v38, %v6685_v51  ;;  %v6992_v1 = vor.u32 %v8543_v58, %v6989_v62  ;;  %v8539_v4 = vld [vmem:[%s12798_s4 + $0x2c4] sm:$0xf]  ;;  %v8533_v33 = vld [vmem:[%s12798_s4 + $0x28c] sm:$0xf0]  ;;  %v6941_v38 = vld [vmem:[%s12798_s4 + $0x290] sm:$0xf0] }
  0xda   : > { %2752 = vmatpush.bf16.msra.mxu3 %v6700_v39  ;;  %v1879_v39 = vadd.f32 %v1878_v10, %v1866_v34  ;;  %v6973_v10 = vld [vmem:[%s12798_s4 + $0x2d0] sm:$0xf0]  ;;  %v8531_v17 = vld [vmem:[%s12798_s4 + $0x284] sm:$0xf] }
  0xdb   : > { %v2129_v19 = vmax.f32 %v1853_v55, 0.0  ;;  %v6976_v11 = vor.u32 %v8539_v4, %v6973_v10  ;;  %v6944_v51 = vor.u32 %v8531_v17, %v6941_v38  ;;  %v8517_v10 = vld [vmem:[%s12798_s4 + $0x20c] sm:$0xf0] }
  0xdc   : > { %2765 = vmatpush.bf16.msrb.mxu1 %v6828_v30  ;;  %v1867_v21 = vpop.f32.mrf.mxu3 }
  0xdd   : > { %v10341_v31 = vpack.c.bf16 %v2129_v19, %v2129_v19  ;;  %v8535_v19 = vld [vmem:[%s12798_s4 + $0x2a4] sm:$0xf] }
  0xde   : > { %2753 = vmatpush.bf16.msra.mxu3 %v6684_v44  ;;  %v1841_v8 = vpop.f32.mrf.mxu1  ;;  %v8459_v44 = vld [vmem:[%s12798_s4 + $0x44] sm:$0xf]  ;;  %v6960_v24 = vor.u32 %v8535_v19, %v6957_v23  ;;  %v8544_v19 = vld [vmem:[%s12798_s4 + $0x2ec] sm:$0xf] }
  0xdf   : > { %6616 = vmatmul.msk.bf16.vlgmr.msra.gmra.mxu1 %vm1761_vm0, %v9338_v45  ;;  %v6636_v45 = vor.u32 %v8457_v2, %v6635_v0  ;;  %v1880_v27 = vpop.f32.mrf.mxu2  ;;  %v6656_v49 = vor.u32 %v8459_v44, %v6653_v46  ;;  %v6621_v0 = vld [vmem:[%s12798_s4 + $0x10] sm:$0xf0]  ;;  %v6971_v2 = vld [vmem:[%s12798_s4 + $0x2c0] sm:$0xf] }
  0xe0   : > { %2766 = vmatpush.bf16.msrb.mxu1 %v6812_v52  ;;  %v6835_v27 = vld [vmem:[%s12798_s4 + $0x1a8] sm:$0xf]  ;;  %v6925_v46 = vld [vmem:[%s12798_s4 + $0x270] sm:$0xf0] }
  0xe2   : > { %2754 = vmatpush.bf16.msra.mxu3 %v6668_v56  ;;  %v8545_v56 = vld [vmem:[%s12798_s4 + $0x2ec] sm:$0xf0] }
  0xe3   : > { %v6988_v61 = vor.u32 %v8545_v56, %v6987_v54  ;;  %v6909_v56 = vld [vmem:[%s12798_s4 + $0x250] sm:$0xf0] }
  0xe4   : > { %2767 = vmatpush.bf16.msrb.mxu1 %v6796_v41  ;;  %v6640_v41 = vor.u32 %v8455_v36, %v6637_v35  ;;  %v8498_v36 = vld [vmem:[%s12798_s4 + $0x174] sm:$0xf0]  ;;  %v6907_v35 = vld [vmem:[%s12798_s4 + $0x240] sm:$0xf] }
  0xe5   : > { %2776 = vmatpush.bf16.msrb.mxu2 %v6988_v61  ;;  %v8494_v61 = vld [vmem:[%s12798_s4 + $0x154] sm:$0xf0] }
  0xe6   : > { %2755 = vmatpush.bf16.msra.mxu3 %v6652_v63  ;;  %v8451_v63 = vld [vmem:[%s12798_s4 + $0x4] sm:$0xf] }
  0xe7   : > { %v6624_v55 = vor.u32 %v8451_v63, %v6621_v0  ;;  %v8521_v63 = vld [vmem:[%s12798_s4 + $0x22c] sm:$0xf0]  ;;  %v8519_v0 = vld [vmem:[%s12798_s4 + $0x224] sm:$0xf] }
  0xe8   : > { %2768 = vmatpush.bf16.msrb.mxu1 %v6780_v9  ;;  %v6972_v9 = vor.u32 %v8541_v3, %v6971_v2  ;;  %v6893_v3 = vld [vmem:[%s12798_s4 + $0x230] sm:$0xf0] }
  0xe9   : > { %v6896_v4 = vor.u32 %v8519_v0, %v6893_v3  ;;  %v6813_v3 = vld [vmem:[%s12798_s4 + $0x190] sm:$0xf0] }
  0xea   : > { %2756 = vmatpush.bf16.msra.mxu3 %v6636_v45  ;;  %2777 = vmatpush.bf16.msrb.mxu2 %v6972_v9  ;;  %v6875_v9 = vld [vmem:[%s12798_s4 + $0x200] sm:$0xf] }
  0xeb   : > { %v1891_v28 = vpop.f32.mrf.mxu0 }
  0xec   : > { %2769 = vmatpush.bf16.msrb.mxu1 %v6764_v7  ;;  %v1892_v30 = vadd.f32 %v1891_v28, %v1879_v39  ;;  %v1904_v47 = vpop.f32.mrf.mxu1  ;;  %v6955_v7 = vld [vmem:[%s12798_s4 + $0x2a0] sm:$0xf]  ;;  %v6836_v39 = vor.u32 %v8506_v29, %v6835_v27  ;;  %v775_v27 = vperm.slane %v10177_v53, 2 }
  0xed   : > { %v6923_v28 = vld [vmem:[%s12798_s4 + $0x260] sm:$0xf] }
  0xee   : > { %2757 = vmatpush.bf16.msra.mxu3 %v6620_v18  ;;  %v1905_v48 = vadd.f32 %v1904_v47, %v1892_v30  ;;  %v8537_v18 = vld [vmem:[%s12798_s4 + $0x2ac] sm:$0xf0]  ;;  %v7003_v29 = vld [vmem:[%s12798_s4 + $0x300] sm:$0xf] }
  0xef   : > { %v6956_v22 = vor.u32 %v8537_v18, %v6955_v7  ;;  %v8529_v30 = vld [vmem:[%s12798_s4 + $0x26c] sm:$0xf0]  ;;  %v8486_v7 = vld [vmem:[%s12798_s4 + $0x114] sm:$0xf0] }
  0xf0   : > { %2770 = vmatpush.bf16.msrb.mxu1 %v6748_v26  ;;  %v6852_v26 = vor.u32 %v8510_v14, %v6851_v13  ;;  %v6924_v44 = vor.u32 %v8529_v30, %v6923_v28 }
  0xf1   : > { %2758 = vmatmul.bf16.vlgmr.msra.gmra.mxu3 %v10341_v31  ;;  %2778 = vmatpush.bf16.msrb.mxu2 %v6956_v22 }
  0xf2   : > { %2802 = vmatpush.bf16.msrb.mxu3 %v6736_v20 }
  0xf3   : > { %v1893_v50 = vpop.f32.mrf.mxu0 }
  0xf4   : > { %v1917_v52 = vpop.f32.mrf.mxu3  ;;  %v1906_v8 = vpop.f32.mrf.mxu1  ;;  %2828 = vmatpush.bf16.msra.mxu1 %v6992_v1  ;;  %v8525_v50 = vld [vmem:[%s12798_s4 + $0x24c] sm:$0xf0] }
  0xf5   : > { %v1918_v59 = vadd.f32 %v1917_v52, %v1905_v48  ;;  %v8523_v52 = vld [vmem:[%s12798_s4 + $0x244] sm:$0xf]  ;;  %v6908_v54 = vor.u32 %v8525_v50, %v6907_v35  ;;  %v8490_v8 = vld [vmem:[%s12798_s4 + $0x134] sm:$0xf0]  ;;  %v6949_v35 = vld [vmem:[%s12798_s4 + $0x298] sm:$0xf0] }
  0xf6   : > { %2803 = vmatpush.bf16.msrb.mxu3 %v6720_v32  ;;  %v6939_v32 = vld [vmem:[%s12798_s4 + $0x280] sm:$0xf]  ;;  %v6912_v58 = vor.u32 %v8523_v52, %v6909_v56  ;;  %v6772_v14 = vor.u32 %v8490_v8, %v6771_v6  ;;  %v8503_v56 = vld [vmem:[%s12798_s4 + $0x1a4] sm:$0xf]  ;;  %v8550_v6 = vld [vmem:[%s12798_s4 + $0x314] sm:$0xf0] }
  0xf7   : > { %v1930_v60 = vpop.f32.mrf.mxu2 }
  0xf8   : > { %v1931_v45 = vadd.f32 %v1930_v60, %v1918_v59  ;;  %2829 = vmatpush.bf16.msra.mxu1 %v6976_v11  ;;  %v6787_v60 = vld [vmem:[%s12798_s4 + $0x148] sm:$0xf] }
  0xf9   : > { %v6788_v5 = vor.u32 %v8494_v61, %v6787_v60  ;;  %v6933_v60 = vld [vmem:[%s12798_s4 + $0x278] sm:$0xf0] }
  0xfa   : > { %2804 = vmatpush.bf16.msrb.mxu3 %v6704_v37  ;;  %v6940_v37 = vor.u32 %v8533_v33, %v6939_v32  ;;  %v8549_v32 = vld [vmem:[%s12798_s4 + $0x30c] sm:$0xf0]  ;;  %v8547_v33 = vld [vmem:[%s12798_s4 + $0x304] sm:$0xf] }
  0xfb   : > { %v1943_v15 = vpop.f32.mrf.mxu0  ;;  %v7004_v38 = vor.u32 %v8549_v32, %v7003_v29  ;;  %v8516_v29 = vld [vmem:[%s12798_s4 + $0x20c] sm:$0xf]  ;;  %v6885_v32 = vld [vmem:[%s12798_s4 + $0x218] sm:$0xf0] }
  0xfc   : > { %v1919_v16 = vpop.f32.mrf.mxu3  ;;  %v1944_v20 = vadd.f32 %v1943_v15, %v1931_v45  ;;  %2830 = vmatpush.bf16.msra.mxu1 %v6960_v24  ;;  %2779 = vmatpush.bf16.msrb.mxu2 %v6940_v37  ;;  %v8515_v45 = vld [vmem:[%s12798_s4 + $0x204] sm:$0xf]  ;;  %v8540_v24 = vld [vmem:[%s12798_s4 + $0x2cc] sm:$0xf] }
  0xfd   : > { %v6755_v16 = vld [vmem:[%s12798_s4 + $0x108] sm:$0xf]  ;;  %2796 = vmatpush.bf16.msra.mxu0 %v7004_v38 }
  0xfe   : > { %2805 = vmatpush.bf16.msrb.mxu3 %v6688_v40  ;;  %v2130_v25 = vmax.f32 %v1944_v20, 0.0  ;;  %v6819_v40 = vld [vmem:[%s12798_s4 + $0x188] sm:$0xf]  ;;  %v6997_v20 = vld [vmem:[%s12798_s4 + $0x2f8] sm:$0xf0]  ;;  %v6756_v22 = vor.u32 %v8486_v7, %v6755_v16 }
  0xff   : > { %v1932_v21 = vpop.f32.mrf.mxu2  ;;  %v6820_v48 = vor.u32 %v8502_v42, %v6819_v40  ;;  %v7000_v23 = vor.u32 %v8544_v19, %v6997_v20  ;;  %v6861_v40 = vld [vmem:[%s12798_s4 + $0x1f0] sm:$0xf0]  ;;  %v8536_v42 = vld [vmem:[%s12798_s4 + $0x2ac] sm:$0xf]  ;;  %v6739_v19 = vld [vmem:[%s12798_s4 + $0xe8] sm:$0xf] }
 0x100   : > { %v10443_v34 = vpack.c.bf16 %v2130_v25, %v2130_v25  ;;  %2831 = vmatpush.bf16.msra.mxu1 %v6944_v51  ;;  %2780 = vmatpush.bf16.msrb.mxu2 %v6924_v44  ;;  %v6981_v25 = vld [vmem:[%s12798_s4 + $0x2d8] sm:$0xf0]  ;;  %v7005_v51 = vld [vmem:[%s12798_s4 + $0x310] sm:$0xf0]  ;;  %v8507_v44 = vld [vmem:[%s12798_s4 + $0x1c4] sm:$0xf] }
 0x101   : > { %v6984_v17 = vor.u32 %v8540_v24, %v6981_v25  ;;  %v7008_v30 = vor.u32 %v8547_v33, %v7005_v51  ;;  %v8482_v20 = vld [vmem:[%s12798_s4 + $0xf4] sm:$0xf0]  ;;  %v6741_v25 = vld [vmem:[%s12798_s4 + $0xf8] sm:$0xf0]  ;;  %v6723_v38 = vld [vmem:[%s12798_s4 + $0xc8] sm:$0xf] }
 0x102   : > { %2806 = vmatpush.bf16.msrb.mxu3 %v6672_v43  ;;  %2771 = vmatmul.bf16.vlgmr.msrb.gmra.mxu1 %v10443_v34  ;;  %v8527_v43 = vld [vmem:[%s12798_s4 + $0x264] sm:$0xf] }
 0x103   : > { %v1945_v57 = vpop.f32.mrf.mxu0  ;;  %v6928_v47 = vor.u32 %v8527_v43, %v6925_v46 }
 0x104   : > { %2781 = vmatpush.bf16.msrb.mxu2 %v6908_v54  ;;  %v6965_v57 = vld [vmem:[%s12798_s4 + $0x2b8] sm:$0xf0] }
 0x105   : > { %2832 = vmatpush.bf16.msra.mxu1 %v6928_v47  ;;  %v6845_v47 = vld [vmem:[%s12798_s4 + $0x1d0] sm:$0xf0] }
 0x106   : > { %2807 = vmatpush.bf16.msrb.mxu3 %v6656_v49  ;;  %v6803_v49 = vld [vmem:[%s12798_s4 + $0x168] sm:$0xf] }
 0x107   : > { %v6804_v59 = vor.u32 %v8498_v36, %v6803_v49  ;;  %v6968_v49 = vor.u32 %v8536_v42, %v6965_v57  ;;  %v8532_v36 = vld [vmem:[%s12798_s4 + $0x28c] sm:$0xf]  ;;  %v8478_v57 = vld [vmem:[%s12798_s4 + $0xd4] sm:$0xf0] }
 0x108   : > { %v6952_v52 = vor.u32 %v8532_v36, %v6949_v35  ;;  %v8474_v35 = vld [vmem:[%s12798_s4 + $0xb4] sm:$0xf0] }
 0x109   : > { %2833 = vmatpush.bf16.msra.mxu1 %v6912_v58  ;;  %v6829_v58 = vld [vmem:[%s12798_s4 + $0x1b0] sm:$0xf0] }
 0x10a   : > { %2808 = vmatpush.bf16.msrb.mxu3 %v6640_v41  ;;  %v6891_v41 = vld [vmem:[%s12798_s4 + $0x220] sm:$0xf]  ;;  %v6832_v61 = vor.u32 %v8503_v56, %v6829_v58  ;;  %v8472_v56 = vld [vmem:[%s12798_s4 + $0xac] sm:$0xf]  ;;  %v6709_v58 = vld [vmem:[%s12798_s4 + $0xb8] sm:$0xf0] }
 0x10b   : > { %v6892_v2 = vor.u32 %v8521_v63, %v6891_v41 }
 0x10c   : > { %v1956_v1 = vpop.f32.mrf.mxu1 }
 0x10d   : > { %2782 = vmatpush.bf16.msrb.mxu2 %v6892_v2  ;;  %2834 = vmatpush.bf16.msra.mxu1 %v6896_v4  ;;  %v1957_v46 = vadd.f32 %v1956_v1, %v775_v27  ;;  %v8524_v1 = vld [vmem:[%s12798_s4 + $0x24c] sm:$0xf]  ;;  %v8499_v2 = vld [vmem:[%s12798_s4 + $0x184] sm:$0xf]  ;;  %v6781_v27 = vld [vmem:[%s12798_s4 + $0x150] sm:$0xf0] }
 0x10e   : > { %2809 = vmatpush.bf16.msrb.mxu3 %v6624_v55  ;;  %v6876_v55 = vor.u32 %v8517_v10, %v6875_v9  ;;  %v6816_v4 = vor.u32 %v8499_v2, %v6813_v3  ;;  %v6693_v2 = vld [vmem:[%s12798_s4 + $0x98] sm:$0xf0] }
 0x10f   : > { %v10492_v62 = vpop.f32.mrf.mxu0 }
 0x111   : > { %2810 = vmatmul.bf16.vlgmr.msrb.gmra.mxu3 %v10341_v31  ;;  %2783 = vmatpush.bf16.msrb.mxu2 %v6876_v55  ;;  %v8495_v55 = vld [vmem:[%s12798_s4 + $0x164] sm:$0xf] }
 0x112   : > { %2867 = vmatpush.bf16.msra.mxu3 %v6868_v12  ;;  %v6877_v12 = vld [vmem:[%s12798_s4 + $0x210] sm:$0xf0] }
 0x113   : > { %v6880_v13 = vor.u32 %v8515_v45, %v6877_v12  ;;  %v6797_v12 = vld [vmem:[%s12798_s4 + $0x170] sm:$0xf0] }
 0x114   : > { %v1969_v11 = vpop.f32.mrf.mxu3  ;;  %v1958_v21 = vpop.f32.mrf.mxu1  ;;  %v6800_v16 = vor.u32 %v8495_v55, %v6797_v12  ;;  %v8462_v55 = vld [vmem:[%s12798_s4 + $0x54] sm:$0xf0] }
 0x115   : > { %2835 = vmatpush.bf16.msra.mxu1 %v6880_v13  ;;  %2848 = vmatpush.bf16.msra.mxu2 %v7008_v30  ;;  %v1970_v50 = vadd.f32 %v1969_v11, %v1957_v46  ;;  %v8480_v21 = vld [vmem:[%s12798_s4 + $0xec] sm:$0xf]  ;;  %v6765_v30 = vld [vmem:[%s12798_s4 + $0x130] sm:$0xf0]  ;;  %v6725_v46 = vld [vmem:[%s12798_s4 + $0xd8] sm:$0xf0] }
 0x116   : > { %2868 = vmatpush.bf16.msra.mxu3 %v6852_v26  ;;  %v6744_v51 = vor.u32 %v8480_v21, %v6741_v25  ;;  %v6645_v21 = vld [vmem:[%s12798_s4 + $0x38] sm:$0xf0] }
 0x117   : > { %v1984_v15 = vpop.f32.mrf.mxu0  ;;  %v1995_v18 = vpop.f32.mrf.mxu2  ;;  %v1983_v41 = vadd.f32 %v10492_v62, %v1970_v50  ;;  %v6917_v62 = vld [vmem:[%s12798_s4 + $0x258] sm:$0xf0] }
 0x118   : > { %v6920_v45 = vor.u32 %v8524_v1, %v6917_v62  ;;  %v6901_v15 = vld [vmem:[%s12798_s4 + $0x238] sm:$0xf0]  ;;  %v8468_v1 = vld [vmem:[%s12798_s4 + $0x8c] sm:$0xf]  ;;  %v6675_v62 = vld [vmem:[%s12798_s4 + $0x68] sm:$0xf] }
 0x119   : > { %v1996_v8 = vadd.f32 %v1995_v18, %v1983_v41  ;;  %v8470_v41 = vld [vmem:[%s12798_s4 + $0x94] sm:$0xf0] }
 0x11a   : > { %2869 = vmatpush.bf16.msra.mxu3 %v6836_v39  ;;  %v8511_v39 = vld [vmem:[%s12798_s4 + $0x1e4] sm:$0xf] }
 0x11b   : > { %v6864_v43 = vor.u32 %v8511_v39, %v6861_v40  ;;  %v6888_v40 = vor.u32 %v8516_v29, %v6885_v32  ;;  %v6627_v29 = vld [vmem:[%s12798_s4 + $0x8] sm:$0xf]  ;;  %v8454_v32 = vld [vmem:[%s12798_s4 + $0x14] sm:$0xf0] }
 0x11c   : > { %v1971_v26 = vpop.f32.mrf.mxu3 }
 0x11d   : > { %2815 = vmatpush.bf16.msrb.mxu0 %v6864_v43  ;;  %v8491_v26 = vld [vmem:[%s12798_s4 + $0x144] sm:$0xf] }
 0x11e   : > { %2870 = vmatpush.bf16.msra.mxu3 %v6820_v48  ;;  %v6848_v48 = vor.u32 %v8507_v44, %v6845_v47  ;;  %v6784_v33 = vor.u32 %v8491_v26, %v6781_v27  ;;  %v8476_v44 = vld [vmem:[%s12798_s4 + $0xcc] sm:$0xf] }
 0x11f   : > { %v10552_v37 = vpop.f32.mrf.mxu0  ;;  %v1997_v28 = vpop.f32.mrf.mxu2  ;;  %v6728_v50 = vor.u32 %v8476_v44, %v6725_v46  ;;  %v6995_v46 = vld [vmem:[%s12798_s4 + $0x2e8] sm:$0xf] }
 0x120   : > { %v8487_v28 = vld [vmem:[%s12798_s4 + $0x124] sm:$0xf] }
 0x121   : > { %2816 = vmatpush.bf16.msrb.mxu0 %v6848_v48  ;;  %v6768_v47 = vor.u32 %v8487_v28, %v6765_v30  ;;  %v6724_v48 = vor.u32 %v8478_v57, %v6723_v38 }
 0x122   : > { %2871 = vmatpush.bf16.msra.mxu3 %v6804_v59  ;;  %v8528_v59 = vld [vmem:[%s12798_s4 + $0x26c] sm:$0xf] }
 0x123   : > { %v6936_v0 = vor.u32 %v8528_v59, %v6933_v60 }
 0x125   : > { %2817 = vmatpush.bf16.msrb.mxu0 %v6832_v61  ;;  %v6691_v61 = vld [vmem:[%s12798_s4 + $0x88] sm:$0xf] }
 0x126   : > { %2872 = vmatpush.bf16.msra.mxu3 %v6788_v5  ;;  %v7011_v5 = vld [vmem:[%s12798_s4 + $0x308] sm:$0xf]  ;;  %v6692_v3 = vor.u32 %v8470_v41, %v6691_v61 }
 0x127   : > { %v2036_v54 = vpop.f32.mrf.mxu0  ;;  %v7012_v9 = vor.u32 %v8550_v6, %v7011_v5  ;;  %v8464_v6 = vld [vmem:[%s12798_s4 + $0x6c] sm:$0xf] }
 0x128   : > { %v6749_v54 = vld [vmem:[%s12798_s4 + $0x110] sm:$0xf0] }
 0x129   : > { %2818 = vmatpush.bf16.msrb.mxu0 %v6816_v4  ;;  %2900 = vmatpush.bf16.msrb.mxu1 %v7012_v9  ;;  %v8466_v4 = vld [vmem:[%s12798_s4 + $0x74] sm:$0xf0] }
 0x12a   : > { %2873 = vmatpush.bf16.msra.mxu3 %v6772_v14  ;;  %v8520_v14 = vld [vmem:[%s12798_s4 + $0x22c] sm:$0xf] }
 0x12c   : > { %v2008_v63 = vpop.f32.mrf.mxu1 }
 0x12d   : > { %v2009_v10 = vadd.f32 %v2008_v63, %v1996_v8  ;;  %2819 = vmatpush.bf16.msrb.mxu0 %v6800_v16  ;;  %v6712_v63 = vor.u32 %v8472_v56, %v6709_v58  ;;  %v6677_v8 = vld [vmem:[%s12798_s4 + $0x78] sm:$0xf0]  ;;  %v8542_v56 = vld [vmem:[%s12798_s4 + $0x2d4] sm:$0xf0]  ;;  %v8508_v58 = vld [vmem:[%s12798_s4 + $0x1cc] sm:$0xf] }
 0x12e   : > { %2874 = vmatpush.bf16.msra.mxu3 %v6756_v22  ;;  %v6680_v12 = vor.u32 %v8464_v6, %v6677_v8  ;;  %v6821_v6 = vld [vmem:[%s12798_s4 + $0x198] sm:$0xf0] }
 0x131   : > { %2875 = vmatmul.bf16.vlgmr.msra.gmra.mxu3 %v10443_v34  ;;  %2820 = vmatpush.bf16.msrb.mxu0 %v6784_v33 }
 0x132   : > { %2932 = vmatpush.bf16.msrb.mxu3 %v7000_v23  ;;  %v6904_v23 = vor.u32 %v8520_v14, %v6901_v15  ;;  %v8460_v14 = vld [vmem:[%s12798_s4 + $0x4c] sm:$0xf]  ;;  %v6661_v15 = vld [vmem:[%s12798_s4 + $0x58] sm:$0xf0] }
 0x133   : > { %v10613_v11 = vpop.f32.mrf.mxu0 }
 0x134   : > { %v2021_v13 = vpop.f32.mrf.mxu3  ;;  %v2010_v18 = vpop.f32.mrf.mxu1 }
 0x135   : > { %v2022_v7 = vadd.f32 %v2021_v13, %v2009_v10  ;;  %2821 = vmatpush.bf16.msrb.mxu0 %v6768_v47  ;;  %v6676_v10 = vor.u32 %v8466_v4, %v6675_v62  ;;  %v8458_v18 = vld [vmem:[%s12798_s4 + $0x34] sm:$0xf0]  ;;  %v6947_v4 = vld [vmem:[%s12798_s4 + $0x288] sm:$0xf] }
 0x136   : > { %2933 = vmatpush.bf16.msrb.mxu3 %v6984_v17  ;;  %v8546_v47 = vld [vmem:[%s12798_s4 + $0x2f4] sm:$0xf0] }
 0x137   : > { %v2035_v22 = vadd.f32 %v10552_v37, %v2022_v7  ;;  %v2047_v24 = vpop.f32.mrf.mxu2  ;;  %v6740_v37 = vor.u32 %v8482_v20, %v6739_v19  ;;  %v6643_v7 = vld [vmem:[%s12798_s4 + $0x28] sm:$0xf]  ;;  %v8456_v20 = vld [vmem:[%s12798_s4 + $0x2c] sm:$0xf] }
 0x138   : > { %v6644_v26 = vor.u32 %v8458_v18, %v6643_v7  ;;  %v6648_v33 = vor.u32 %v8456_v20, %v6645_v21  ;;  %v8526_v7 = vld [vmem:[%s12798_s4 + $0x254] sm:$0xf0]  ;;  %v8492_v18 = vld [vmem:[%s12798_s4 + $0x14c] sm:$0xf]  ;;  %v6899_v21 = vld [vmem:[%s12798_s4 + $0x228] sm:$0xf] }
 0x139   : > { %v2131_v17 = vmax.f32 %v2035_v22, 0.0 }
 0x13a   : > { %2934 = vmatpush.bf16.msrb.mxu3 %v6968_v49  ;;  %v6707_v49 = vld [vmem:[%s12798_s4 + $0xa8] sm:$0xf] }
 0x13b   : > { %v10655_v39 = vpack.c.bf16 %v2131_v17, %v2131_v17  ;;  %v2062_v42 = vpop.f32.mrf.mxu0  ;;  %v6708_v60 = vor.u32 %v8474_v35, %v6707_v49  ;;  %v8452_v17 = vld [vmem:[%s12798_s4 + $0xc] sm:$0xf]  ;;  %v6869_v49 = vld [vmem:[%s12798_s4 + $0x1f8] sm:$0xf0]  ;;  %v6996_v35 = vor.u32 %v8546_v47, %v6995_v46 }
 0x13c   : > { %v2023_v43 = vpop.f32.mrf.mxu3 }
 0x13d   : > { %2784 = vmatmul.bf16.vlgmr.msrb.gmra.mxu2 %v10655_v39  ;;  %2836 = vmatmul.bf16.vlgmr.msra.gmra.mxu1 %v10655_v39 }
 0x13e   : > { %2935 = vmatpush.bf16.msrb.mxu3 %v6952_v52  ;;  %2854 = vmatpush.bf16.msrb.mxu2 %v6740_v37  ;;  %v8483_v52 = vld [vmem:[%s12798_s4 + $0x104] sm:$0xf]  ;;  %v6629_v37 = vld [vmem:[%s12798_s4 + $0x18] sm:$0xf0] }
 0x13f   : > { %2906 = vmatpush.bf16.msra.mxu1 %v6744_v51  ;;  %v2049_v36 = vpop.f32.mrf.mxu2  ;;  %v6752_v59 = vor.u32 %v8483_v52, %v6749_v54  ;;  %v6628_v51 = vor.u32 %v8454_v32, %v6627_v29  ;;  %v6979_v54 = vld [vmem:[%s12798_s4 + $0x2c8] sm:$0xf]  ;;  %v8518_v29 = vld [vmem:[%s12798_s4 + $0x214] sm:$0xf0]  ;;  %v8484_v32 = vld [vmem:[%s12798_s4 + $0x10c] sm:$0xf] }
 0x140   : > { %v6980_v61 = vor.u32 %v8542_v56, %v6979_v54  ;;  %v8553_v54 = vld [vmem:[%s12800_s6 + $0x10] sm:$0xff] }
 0x141   : > { %2822 = vmatpush.bf16.msrb.mxu0 %v6752_v59  ;;  %v6853_v59 = vld [vmem:[%s12798_s4 + $0x1d8] sm:$0xf0] }
 0x142   : > { %2936 = vmatpush.bf16.msrb.mxu3 %v6936_v0  ;;  %2855 = vmatpush.bf16.msrb.mxu2 %v6724_v48  ;;  %v776_v0 = vperm.slane %v10177_v53, 3  ;;  %v6696_v53 = vor.u32 %v8468_v1, %v6693_v2  ;;  %v8512_v48 = vld [vmem:[%s12798_s4 + $0x1ec] sm:$0xf]  ;;  %v6856_v41 = vor.u32 %v8508_v58, %v6853_v59  ;;  %v6837_v2 = vld [vmem:[%s12798_s4 + $0x1b8] sm:$0xf0]  ;;  %v8565_v59 = vld [vmem:[%s12800_s6 + $0x70] sm:$0xff] }
 0x143   : > { %2907 = vmatpush.bf16.msra.mxu1 %v6728_v50  ;;  %v6872_v52 = vor.u32 %v8512_v48, %v6869_v49  ;;  %v8504_v1 = vld [vmem:[%s12798_s4 + $0x1ac] sm:$0xf]  ;;  %v8558_v48 = vld [vmem:[%s12800_s6 + $0x38] sm:$0xff] }
 0x144   : > { %v2048_v5 = vadd.f32 %v2047_v24, %v776_v0  ;;  %v8538_v0 = vld [vmem:[%s12798_s4 + $0x2b4] sm:$0xf0]  ;;  %v6840_v62 = vor.u32 %v8504_v1, %v6837_v2  ;;  %v8556_v49 = vld [vmem:[%s12800_s6 + $0x28] sm:$0xff]  ;;  %v8563_v1 = vld [vmem:[%s12800_s6 + $0x60] sm:$0xff] }
 0x145   : > { %v8552_v58 = vld [vmem:[%s12800_s6 + $0x8] sm:$0xff]  ;;  %v8574_v2 = vld [vmem:[%s12800_s6 + $0xb8] sm:$0xff] }
 0x146   : > { %2937 = vmatpush.bf16.msrb.mxu3 %v6920_v45  ;;  %2856 = vmatpush.bf16.msrb.mxu2 %v6708_v60  ;;  %v6659_v45 = vld [vmem:[%s12798_s4 + $0x48] sm:$0xf]  ;;  %v2061_v13 = vadd.f32 %v10613_v11, %v2048_v5  ;;  %v6664_v11 = vor.u32 %v8460_v14, %v6661_v15  ;;  %v8500_v5 = vld [vmem:[%s12798_s4 + $0x18c] sm:$0xf] }
 0x147   : > { %2908 = vmatpush.bf16.msra.mxu1 %v6712_v63  ;;  %v6660_v16 = vor.u32 %v8462_v55, %v6659_v45  ;;  %v6963_v63 = vld [vmem:[%s12798_s4 + $0x2a8] sm:$0xf]  ;;  %v8530_v45 = vld [vmem:[%s12798_s4 + $0x274] sm:$0xf0]  ;;  %v8496_v55 = vld [vmem:[%s12798_s4 + $0x16c] sm:$0xf] }
 0x14a   : > { %2938 = vmatpush.bf16.msrb.mxu3 %v6904_v23  ;;  %2857 = vmatpush.bf16.msrb.mxu2 %v6692_v3  ;;  %v6964_v3 = vor.u32 %v8538_v0, %v6963_v63 }
 0x14b   : > { %2909 = vmatpush.bf16.msra.mxu1 %v6696_v53  ;;  %v8534_v53 = vld [vmem:[%s12798_s4 + $0x294] sm:$0xf0] }
 0x14c   : > { %v2073_v9 = vpop.f32.mrf.mxu1  ;;  %v6948_v8 = vor.u32 %v8534_v53, %v6947_v4  ;;  %v8573_v4 = vld [vmem:[%s12800_s6 + $0xb0] sm:$0xff] }
 0x14d   : > { %v2074_v19 = vadd.f32 %v2073_v9, %v2061_v13  ;;  %v6824_v9 = vor.u32 %v8500_v5, %v6821_v6  ;;  %v8561_v5 = vld [vmem:[%s12800_s6 + $0x50] sm:$0xff]  ;;  %v8572_v6 = vld [vmem:[%s12800_s6 + $0xa8] sm:$0xff] }
 0x14e   : > { %2939 = vmatpush.bf16.msrb.mxu3 %v6888_v40  ;;  %2858 = vmatpush.bf16.msrb.mxu2 %v6676_v10  ;;  %v6632_v40 = vor.u32 %v8452_v17, %v6629_v37  ;;  %v6931_v10 = vld [vmem:[%s12798_s4 + $0x268] sm:$0xf]  ;;  %v8548_v17 = vld [vmem:[%s12798_s4 + $0x30c] sm:$0xf]  ;;  %v7013_v37 = vld [vmem:[%s12798_s4 + $0x318] sm:$0xf0] }
 0x14f   : > { %2910 = vmatpush.bf16.msra.mxu1 %v6680_v12  ;;  %v6805_v12 = vld [vmem:[%s12798_s4 + $0x178] sm:$0xf0]  ;;  %v6932_v14 = vor.u32 %v8530_v45, %v6931_v10  ;;  %v8559_v10 = vld [vmem:[%s12800_s6 + $0x40] sm:$0xff] }
 0x150   : > { %v6808_v15 = vor.u32 %v8496_v55, %v6805_v12  ;;  %v8570_v45 = vld [vmem:[%s12800_s6 + $0x98] sm:$0xff]  ;;  %v8569_v55 = vld [vmem:[%s12800_s6 + $0x90] sm:$0xff] }
 0x151   : > { %2940 = vmatmul.bf16.vlgmr.msrb.gmra.mxu3 %v10655_v39 }
 0x152   : > { %2859 = vmatpush.bf16.msrb.mxu2 %v6660_v16  ;;  %v6915_v16 = vld [vmem:[%s12798_s4 + $0x248] sm:$0xf] }
 0x153   : > { %v2112_v23 = vpop.f32.mrf.mxu0  ;;  %2911 = vmatpush.bf16.msra.mxu1 %v6664_v11  ;;  %v6789_v11 = vld [vmem:[%s12798_s4 + $0x158] sm:$0xf0] }
 0x154   : > { %v2086_v22 = vpop.f32.mrf.mxu3  ;;  %v2075_v25 = vpop.f32.mrf.mxu1  ;;  %v6792_v20 = vor.u32 %v8492_v18, %v6789_v11  ;;  %v8567_v11 = vld [vmem:[%s12800_s6 + $0x80] sm:$0xff] }
 0x155   : > { %v2087_v24 = vadd.f32 %v2086_v22, %v2074_v19  ;;  %v6916_v19 = vor.u32 %v8526_v7, %v6915_v16  ;;  %v8522_v22 = vld [vmem:[%s12798_s4 + $0x234] sm:$0xf0]  ;;  %v8568_v16 = vld [vmem:[%s12800_s6 + $0x88] sm:$0xff] }
 0x156   : > { %2860 = vmatpush.bf16.msrb.mxu2 %v6644_v26  ;;  %v6900_v25 = vor.u32 %v8522_v22, %v6899_v21 }
 0x157   : > { %v2099_v27 = vpop.f32.mrf.mxu2  ;;  %2912 = vmatpush.bf16.msra.mxu1 %v6648_v33  ;;  %v6757_v33 = vld [vmem:[%s12798_s4 + $0x118] sm:$0xf0] }
 0x158   : > { %v2100_v38 = vadd.f32 %v2099_v27, %v2087_v24  ;;  %v6883_v27 = vld [vmem:[%s12798_s4 + $0x208] sm:$0xf] }
 0x15a   : > { %v2113_v28 = vadd.f32 %v2112_v23, %v2100_v38  ;;  %2861 = vmatpush.bf16.msrb.mxu2 %v6628_v51  ;;  %v8488_v23 = vld [vmem:[%s12798_s4 + $0x12c] sm:$0xf]  ;;  %v6884_v38 = vor.u32 %v8518_v29, %v6883_v27  ;;  %v6760_v51 = vor.u32 %v8484_v32, %v6757_v33  ;;  %v8575_v29 = vld [vmem:[%s12800_s6 + $0xc0] sm:$0xff] }
 0x15b   : > { %v2114_v57 = vpop.f32.mrf.mxu0  ;;  %2913 = vmatpush.bf16.msra.mxu1 %v6632_v40  ;;  %v7016_v40 = vor.u32 %v8548_v17, %v7013_v37  ;;  %3219 = vmatpush.bf16.msra.mxu3 %v8575_v29  ;;  %v8578_v29 = vld [vmem:[%s12802_s8 + $0xc] sm:$0xf0] }
 0x15c   : > { %v2088_v42 = vpop.f32.mrf.mxu3  ;;  %v2125_v30 = vpop.f32.mrf.mxu1 }
 0x15d   : > { %v2126_v43 = vadd.f32 %v2125_v30, %v2113_v28  ;;  %v10871_v42 = vld [vmem:[%s12799_s5] sm:$0xf] }
 0x15e   : > { %v2239_v57 = vperm.slane %v10871_v42, 0  ;;  %v2240_v22 = vperm.slane %v10871_v42, 1  ;;  %v2241_v37 = vperm.slane %v10871_v42, 2 }
 0x15f   : > { %v2101_v44 = vpop.f32.mrf.mxu2  ;;  %v2132_v36 = vmax.f32 %v2126_v43, 0.0 }
 0x161   : > { %v10767_v50 = vpack.c.bf16 %v2132_v36, %v2132_v36  ;;  %v8566_v36 = vld [vmem:[%s12800_s6 + $0x78] sm:$0xff] }
 0x163   : > { %7017 = vmatmul.msk.bf16.vlgmr.msra.gmra.mxu0 %vm1761_vm0, %v10767_v50  ;;  %7018 = vmatmul.msk.bf16.vlgmr.msra.gmra.mxu2 %vm1761_vm0, %v10767_v50 }
 0x164   : > { %7019 = vmatmul.msk.bf16.vlgmr.msrb.gmra.mxu1 %vm1761_vm0, %v10767_v50  ;;  %v2127_v60 = vpop.f32.mrf.mxu1  ;;  %2880 = vmatpush.bf16.msra.mxu0 %v6996_v35  ;;  %v8555_v35 = vld [vmem:[%s12800_s6 + $0x20] sm:$0xff] }
 0x165   : > { %2919 = vmatpush.bf16.msra.mxu2 %v6872_v52  ;;  %3186 = vmatpush.bf16.msrb.mxu1 %v8566_v36  ;;  %v8554_v52 = vld [vmem:[%s12800_s6 + $0x18] sm:$0xff] }
 0x168   : > { %2881 = vmatpush.bf16.msra.mxu0 %v6980_v61  ;;  %v8551_v61 = vld [vmem:[%s12800_s6] sm:$0xff] }
 0x169   : > { %2920 = vmatpush.bf16.msra.mxu2 %v6856_v41  ;;  %3187 = vmatpush.bf16.msrb.mxu1 %v8565_v59  ;;  %v8564_v41 = vld [vmem:[%s12800_s6 + $0x68] sm:$0xff] }
 0x16c   : > { %2882 = vmatpush.bf16.msra.mxu0 %v6964_v3  ;;  %v8562_v3 = vld [vmem:[%s12800_s6 + $0x58] sm:$0xff] }
 0x16d   : > { %2921 = vmatpush.bf16.msra.mxu2 %v6840_v62  ;;  %3188 = vmatpush.bf16.msrb.mxu1 %v8564_v41 }
 0x170   : > { %2883 = vmatpush.bf16.msra.mxu0 %v6948_v8  ;;  %v8560_v8 = vld [vmem:[%s12800_s6 + $0x48] sm:$0xff] }
 0x171   : > { %2922 = vmatpush.bf16.msra.mxu2 %v6824_v9  ;;  %3189 = vmatpush.bf16.msrb.mxu1 %v8563_v1  ;;  %v8571_v9 = vld [vmem:[%s12800_s6 + $0xa0] sm:$0xff] }
 0x173   : > { %2823 = vmatmul.bf16.vlgmr.msrb.gmra.mxu0 %v10443_v34  ;;  %2862 = vmatmul.bf16.vlgmr.msrb.gmra.mxu2 %v10341_v31 }
 0x174   : > { %v2759_v13 = vpop.f32.mrf.mxu3  ;;  %2914 = vmatmul.bf16.vlgmr.msra.gmra.mxu1 %v10341_v31  ;;  %2884 = vmatpush.bf16.msra.mxu0 %v6932_v14  ;;  %v6773_v31 = vld [vmem:[%s12798_s4 + $0x138] sm:$0xf0] }
 0x175   : > { %2923 = vmatpush.bf16.msra.mxu2 %v6808_v15  ;;  %v6776_v26 = vor.u32 %v8488_v23, %v6773_v31  ;;  %v2760_v28 = vadd.f32 %v2759_v13, %v2239_v57  ;;  %3190 = vmatpush.bf16.msrb.mxu1 %v8562_v3  ;;  %v3252_v3 = vld [vmem:[%s12802_s8 + $0x28] sm:$0x33] }
 0x178   : > { %2885 = vmatpush.bf16.msra.mxu0 %v6916_v19 }
 0x179   : > { %2924 = vmatpush.bf16.msra.mxu2 %v6792_v20  ;;  %3191 = vmatpush.bf16.msrb.mxu1 %v8561_v5 }
 0x17c   : > { %v2761_v24 = vpop.f32.mrf.mxu3  ;;  %2886 = vmatpush.bf16.msra.mxu0 %v6900_v25 }
 0x17d   : > { %2925 = vmatpush.bf16.msra.mxu2 %v6776_v26  ;;  %3192 = vmatpush.bf16.msrb.mxu1 %v8560_v8 }
 0x17f   : > { %v2772_v30 = vpop.f32.mrf.mxu1 }
 0x180   : > { %2887 = vmatpush.bf16.msra.mxu0 %v6884_v38  ;;  %v2773_v43 = vadd.f32 %v2772_v30, %v2760_v28 }
 0x181   : > { %2926 = vmatpush.bf16.msra.mxu2 %v6760_v51  ;;  %3193 = vmatpush.bf16.msrb.mxu1 %v8559_v10  ;;  %v3233_v51 = vld [vmem:[%s546_s0] sm:$0xff]  ;;  %s554_s0 = scalar_lea.vmem %s12809_s15, %s10959_s18 }
 0x182   : > { %3235 = vrot.lane.b32.xlu0 %v3233_v51, %s8878_s17 }
 0x183   : > { %2888 = vmatmul.bf16.vlgmr.msra.gmra.mxu0 %v10655_v39 }
 0x184   : > { %2952 = vmatpush.bf16.msrb.mxu0 %v7016_v40  ;;  %2927 = vmatmul.bf16.vlgmr.msra.gmra.mxu2 %v10443_v34  ;;  %v8557_v34 = vld [vmem:[%s12800_s6 + $0x30] sm:$0xff] }
 0x185   : > { %3199 = vmatpush.bf16.msrb.mxu2 %v8574_v2  ;;  %v3251_v2 = vld [vmem:[%s12802_s8 + $0x20] sm:$0x33] }
 0x187   : > { %v2774_v46 = vpop.f32.mrf.mxu1 }
 0x188   : > { %3173 = vmatpush.bf16.msra.mxu0 %v8558_v48  ;;  %v2242_v48 = vperm.slane %v10871_v42, 3 }
 0x189   : > { %3200 = vmatpush.bf16.msrb.mxu2 %v8573_v4  ;;  %v3279_v4 = vunpack.c.l.b16 %v3252_v3 }
 0x18b   : > { %v3287_v8 = vpack.c.b16 %v3279_v4, %v3279_v4  ;;  %v8630_v4 = vld [vmem:[%s12804_s10 + $0x18c] sm:$0xf0] }
 0x18c   : > { %3174 = vmatpush.bf16.msra.mxu0 %v8557_v34 }
 0x18d   : > { %3201 = vmatpush.bf16.msrb.mxu2 %v8572_v6 }
 0x190   : > { %3175 = vmatpush.bf16.msra.mxu0 %v8556_v49 }
 0x191   : > { %3202 = vmatpush.bf16.msrb.mxu2 %v8571_v9 }
 0x193   : > { %7020 = vmatmul.msk.bf16.vlgmr.msrb.gmra.mxu0 %vm1761_vm0, %v10767_v50 }
 0x194   : > { %v10876_v44 = vpop.f32.mrf.mxu3  ;;  %3176 = vmatpush.bf16.msra.mxu0 %v8555_v35 }
 0x195   : > { %3203 = vmatpush.bf16.msrb.mxu2 %v8570_v45  ;;  %v2812_v31 = vadd.f32 %v10876_v44, %v2240_v22 }
 0x198   : > { %3177 = vmatpush.bf16.msra.mxu0 %v8554_v52 }
 0x199   : > { %3204 = vmatpush.bf16.msrb.mxu2 %v8569_v55 }
 0x19c   : > { %v2813_v47 = vpop.f32.mrf.mxu3  ;;  %3178 = vmatpush.bf16.msra.mxu0 %v8553_v54 }
 0x19d   : > { %3205 = vmatpush.bf16.msrb.mxu2 %v8568_v16 }
 0x1a0   : > { %3179 = vmatpush.bf16.msra.mxu0 %v8552_v58 }
 0x1a1   : > { %3206 = vmatpush.bf16.msrb.mxu2 %v8567_v11 }
 0x1a4   : > { %3180 = vmatpush.bf16.msra.mxu0 %v8551_v61 }
 0x1b4   : > { %v10883_v39 = vpop.f32.mrf.mxu3 }
 0x1ba   : > { %v2837_v56 = vpop.f32.mrf.mxu1 }
 0x1bc   : > { %v2878_v50 = vpop.f32.mrf.mxu3 }
 0x1c0   : > { %v2785_v60 = vpop.f32.mrf.mxu2 }
 0x1c1   : > { %v2786_v12 = vadd.f32 %v2785_v60, %v2773_v43 }
 0x1c2   : > { %v2839_v63 = vpop.f32.mrf.mxu1 }
 0x1c8   : > { %v2787_v62 = vpop.f32.mrf.mxu2 }
 0x1c9   : > { %v3278_v62 = vunpack.c.h.b16 %v3251_v2 }
 0x1cb   : > { %v3286_v6 = vpack.c.b16 %v3278_v62, %v3278_v62  ;;  %v7336_v62 = vld [vmem:[%s12804_s10 + $0x180] sm:$0xf] }
 0x1cd   : > { %v3301_v55 = vsel %vm3296_vm1, %v3286_v6, 0  ;;  %v8666_v6 = vld [vmem:[%s12804_s10 + $0x2ac] sm:$0xf0] }
 0x1ce   : > { %3328 = vmatpush.bf16.msrb.mxu0 %v3301_v55  ;;  %v8594_v55 = vld [vmem:[%s12804_s10 + $0x6c] sm:$0xf0] }
 0x1d4   : > { %v10915_v0 = vpop.f32.mrf.mxu3 }
 0x1dc   : > { %v2943_v53 = vpop.f32.mrf.mxu3 }
 0x1dd   : > { %v3280_v53 = vunpack.c.h.b16 %v3252_v3  ;;  %v7496_v3 = vld [vmem:[%s12804_s10 + $0x2c0] sm:$0xf] }
 0x1df   : > { %v3288_v9 = vpack.c.b16 %v3280_v53, %v3280_v53 }
 0x1e0   : > { %v2798_v13 = vpop.f32.mrf.mxu0 }
 0x1e1   : > { %v2799_v14 = vadd.f32 %v2798_v13, %v2786_v12  ;;  %v2902_v15 = vpop.f32.mrf.mxu1  ;;  %v3304_v12 = vsel %vm3296_vm1, %v3287_v8, 0  ;;  %v3307_v13 = vsel %vm3296_vm1, %v3288_v9, 0  ;;  %v7528_v8 = vld [vmem:[%s12804_s10 + $0x300] sm:$0xf] }
 0x1e2   : > { %3341 = vmatpush.bf16.msra.mxu1 %v3304_v12  ;;  %3354 = vmatpush.bf16.msra.mxu2 %v3307_v13  ;;  %v7337_v12 = vor.u32 %v8630_v4, %v7336_v62  ;;  %v7498_v62 = vld [vmem:[%s12804_s10 + $0x2d0] sm:$0xf0] }
 0x1e3   : > { %v2958_v7 = vmax.f32 %v2799_v14, 0.0  ;;  %v8867_v14 = vld [vmem:[%s12801_s7] ss:$0 sm:$0xff] }
 0x1e5   : > { %v2962_v18 = vpack.c.bf16 %v2958_v7, %v2958_v7 }
 0x1e6   : > { %v2850_v19 = vpop.f32.mrf.mxu2 }
 0x1e7   : > { %3181 = vmatmul.bf16.vlgmr.msra.gmra.mxu0 %v2962_v18 }
 0x1e8   : > { %v2800_v20 = vpop.f32.mrf.mxu0 }
 0x1e9   : > { %v2904_v21 = vpop.f32.mrf.mxu1  ;;  %v3227_v20 = vlaneseq }
 0x1eb   : > { %v3228_v22 = vand.u32 127, %v3227_v20  ;;  %v7176_v20 = vld [vmem:[%s12804_s10 + $0x40] sm:$0xf] }
 0x1ed   : > { %vm3229_vm2 = vcmp.ge.s32.totalorder %v3228_v22, 20 }
 0x1ee   : > { %v2852_v23 = vpop.f32.mrf.mxu2 }
 0x1f0   : > { %v2824_v24 = vpop.f32.mrf.mxu0 }
 0x1f1   : > { %v2825_v25 = vadd.f32 %v2824_v24, %v2812_v31  ;;  %v2915_v26 = vpop.f32.mrf.mxu1 }
 0x1f2   : > { %v2916_v50 = vadd.f32 %v2915_v26, %v2242_v48  ;;  %v8606_v48 = vld [vmem:[%s12804_s10 + $0xcc] sm:$0xf0] }
 0x1f3   : > { %v2838_v27 = vadd.f32 %v2837_v56, %v2825_v25 }
 0x1f4   : > { %v3236_v31 = vpop.permute.xlu0 %3235 }
 0x1f5   : > { %v2851_v32 = vadd.f32 %v2850_v19, %v2838_v27  ;;  %v7124_v27 = vld [vmem:[%s12802_s8] sm:$0xf] }
 0x1f6   : > { %v2863_v33 = vpop.f32.mrf.mxu2 }
 0x1f7   : > { %v2959_v17 = vmax.f32 %v2851_v32, 0.0  ;;  %v2864_v28 = vadd.f32 %v2863_v33, %v2241_v37  ;;  %v8576_v32 = vld [vmem:[%s12802_s8 + $0x4] sm:$0xf]  ;;  %v7125_v33 = vor.u32 %v8578_v29, %v7124_v27  ;;  %v7132_v37 = vld [vmem:[%s12802_s8 + $0x8] sm:$0xf] }
 0x1f8   : > { %v2826_v38 = vpop.f32.mrf.mxu0  ;;  %v7160_v29 = vld [vmem:[%s12804_s10 + $0x20] sm:$0xf] }
 0x1f9   : > { %v2963_v40 = vpack.c.bf16 %v2959_v17, %v2959_v17  ;;  %v2917_v57 = vpop.f32.mrf.mxu1  ;;  %v2877_v43 = vadd.f32 %v10883_v39, %v2864_v28  ;;  %v7126_v17 = vld [vmem:[%s12802_s8 + $0x10] sm:$0xf0]  ;;  %v8579_v38 = vld [vmem:[%s12802_s8 + $0x14] sm:$0xf0]  ;;  %v7134_v28 = vld [vmem:[%s12802_s8 + $0x18] sm:$0xf0] }
 0x1fa   : > { %v7129_v51 = vor.u32 %v8576_v32, %v7126_v17  ;;  %v8577_v57 = vld [vmem:[%s12802_s8 + $0xc] sm:$0xf]  ;;  %v8586_v32 = vld [vmem:[%s12804_s10 + $0x2c] sm:$0xf0]  ;;  %v7288_v17 = vld [vmem:[%s12804_s10 + $0x120] sm:$0xf] }
 0x1fb   : > { %3194 = vmatmul.bf16.vlgmr.msrb.gmra.mxu1 %v2963_v40  ;;  %v7133_v40 = vor.u32 %v8579_v38, %v7132_v37  ;;  %v8618_v37 = vld [vmem:[%s12804_s10 + $0x12c] sm:$0xf0] }
 0x1fc   : > { %3329 = vmatpush.bf16.msrb.mxu0 %v7129_v51  ;;  %v7432_v51 = vld [vmem:[%s12804_s10 + $0x240] sm:$0xf] }
 0x1fd   : > { %3342 = vmatpush.bf16.msra.mxu1 %v7133_v40  ;;  %v8654_v40 = vld [vmem:[%s12804_s10 + $0x24c] sm:$0xf0] }
 0x1fe   : > { %v2865_v30 = vpop.f32.mrf.mxu2 }
 0x1ff   : > { %v7137_v30 = vor.u32 %v8577_v57, %v7134_v28  ;;  %v7161_v57 = vor.u32 %v8586_v32, %v7160_v29  ;;  %v7289_v28 = vor.u32 %v8618_v37, %v7288_v17  ;;  %v8588_v32 = vld [vmem:[%s12804_s10 + $0x44] sm:$0xf] }
 0x200   : > { %v2889_v44 = vpop.f32.mrf.mxu0  ;;  %v8660_v17 = vld [vmem:[%s12804_s10 + $0x284] sm:$0xf] }
 0x201   : > { %v2890_v46 = vadd.f32 %v2889_v44, %v2877_v43  ;;  %3355 = vmatpush.bf16.msra.mxu2 %v7137_v30  ;;  %v7256_v43 = vld [vmem:[%s12804_s10 + $0xe0] sm:$0xf]  ;;  %v8610_v44 = vld [vmem:[%s12804_s10 + $0xec] sm:$0xf0] }
 0x202   : > { %v7144_v30 = vld [vmem:[%s12804_s10] sm:$0xf] }
 0x203   : > { %v2903_v47 = vadd.f32 %v2902_v15, %v2890_v46  ;;  %v7240_v46 = vld [vmem:[%s12804_s10 + $0xc0] sm:$0xf] }
 0x205   : > { %v2960_v34 = vmax.f32 %v2903_v47, 0.0  ;;  %v7257_v47 = vor.u32 %v8610_v44, %v7256_v43  ;;  %v8582_v43 = vld [vmem:[%s12804_s10 + $0xc] sm:$0xf0]  ;;  %v8608_v44 = vld [vmem:[%s12804_s10 + $0xe4] sm:$0xf] }
 0x207   : > { %v2964_v49 = vpack.c.bf16 %v2960_v34, %v2960_v34  ;;  %v2928_v36 = vpop.f32.mrf.mxu2  ;;  %v7384_v34 = vld [vmem:[%s12804_s10 + $0x1e0] sm:$0xf] }
 0x208   : > { %v2891_v35 = vpop.f32.mrf.mxu0  ;;  %v2929_v52 = vadd.f32 %v2928_v36, %v2916_v50  ;;  %v7241_v50 = vor.u32 %v8606_v48, %v7240_v46  ;;  %v7433_v46 = vor.u32 %v8654_v40, %v7432_v51  ;;  %v7258_v48 = vld [vmem:[%s12804_s10 + $0xf0] sm:$0xf0]  ;;  %v8620_v51 = vld [vmem:[%s12804_s10 + $0x144] sm:$0xf] }
 0x209   : > { %3207 = vmatmul.bf16.vlgmr.msrb.gmra.mxu2 %v2964_v49  ;;  %v8642_v49 = vld [vmem:[%s12804_s10 + $0x1ec] sm:$0xf0]  ;;  %v7368_v35 = vld [vmem:[%s12804_s10 + $0x1c0] sm:$0xf]  ;;  %v7306_v40 = vld [vmem:[%s12804_s10 + $0x150] sm:$0xf0] }
 0x20a   : > { %v2942_v56 = vadd.f32 %v10915_v0, %v2929_v52  ;;  %v3277_v0 = vunpack.c.l.b16 %v3251_v2  ;;  %v7385_v36 = vor.u32 %v8642_v49, %v7384_v34  ;;  %v8638_v52 = vld [vmem:[%s12804_s10 + $0x1cc] sm:$0xf0]  ;;  %v8640_v34 = vld [vmem:[%s12804_s10 + $0x1e4] sm:$0xf]  ;;  %v7386_v49 = vld [vmem:[%s12804_s10 + $0x1f0] sm:$0xf0] }
 0x20c   : > { %v3285_v5 = vpack.c.b16 %v3277_v0, %v3277_v0  ;;  %3995 = vmatpush.bf16.msra.mxu0 %v7385_v36  ;;  %v8670_v0 = vld [vmem:[%s12804_s10 + $0x2cc] sm:$0xf0] }
 0x20d   : > { %v7497_v53 = vor.u32 %v8670_v0, %v7496_v3  ;;  %v8668_v0 = vld [vmem:[%s12804_s10 + $0x2c4] sm:$0xf] }
 0x20e   : > { %v3298_v45 = vsel %vm3296_vm1, %v3285_v5, 0  ;;  %v7480_v5 = vld [vmem:[%s12804_s10 + $0x2a0] sm:$0xf] }
 0x20f   : > { %v2930_v54 = vpop.f32.mrf.mxu2  ;;  %3315 = vmatpush.bf16.msrb.mxu3 %v3298_v45  ;;  %v7192_v45 = vld [vmem:[%s12804_s10 + $0x60] sm:$0xf] }
 0x210   : > { %v2954_v58 = vpop.f32.mrf.mxu0  ;;  %v7224_v54 = vld [vmem:[%s12804_s10 + $0xa0] sm:$0xf] }
 0x211   : > { %v2955_v59 = vadd.f32 %v2954_v58, %v2942_v56  ;;  %v8602_v56 = vld [vmem:[%s12804_s10 + $0xac] sm:$0xf0]  ;;  %v7369_v58 = vor.u32 %v8638_v52, %v7368_v35  ;;  %v7272_v35 = vld [vmem:[%s12804_s10 + $0x100] sm:$0xf]  ;;  %v8672_v52 = vld [vmem:[%s12804_s10 + $0x2e4] sm:$0xf] }
 0x213   : > { %v2961_v60 = vmax.f32 %v2955_v59, 0.0  ;;  %3316 = vmatpush.bf16.msrb.mxu3 %v7125_v33  ;;  %v7352_v59 = vld [vmem:[%s12804_s10 + $0x1a0] sm:$0xf]  ;;  %3996 = vmatpush.bf16.msra.mxu0 %v7369_v58 }
 0x215   : > { %v2965_v61 = vpack.c.bf16 %v2961_v60, %v2961_v60  ;;  %v8634_v60 = vld [vmem:[%s12804_s10 + $0x1ac] sm:$0xf0] }
 0x216   : > { %v7353_v2 = vor.u32 %v8634_v60, %v7352_v59  ;;  %v7145_v59 = vor.u32 %v8582_v43, %v7144_v30  ;;  %v7261_v60 = vor.u32 %v8608_v44, %v7258_v48  ;;  %v8676_v30 = vld [vmem:[%s12804_s10 + $0x304] sm:$0xf]  ;;  %v7530_v43 = vld [vmem:[%s12804_s10 + $0x310] sm:$0xf0] }
 0x217   : > { %7121 = vmatmul.msk.bf16.vlgmr.msra.gmra.mxu3 %vm1761_vm0, %v2965_v61  ;;  %v7512_v61 = vld [vmem:[%s12804_s10 + $0x2e0] sm:$0xf]  ;;  %v7533_v44 = vor.u32 %v8676_v30, %v7530_v43  ;;  %v8656_v48 = vld [vmem:[%s12804_s10 + $0x264] sm:$0xf] }
 0x218   : > { %v2956_v39 = vpop.f32.mrf.mxu0  ;;  %3982 = vmatpush.bf16.msra.mxu3 %v7257_v47  ;;  %3997 = vmatpush.bf16.msra.mxu0 %v7353_v2 }
 0x219   : > { %v8674_v39 = vld [vmem:[%s12804_s10 + $0x2ec] sm:$0xf0] }
 0x21c   : > { %3983 = vmatpush.bf16.msra.mxu3 %v7241_v50  ;;  %3998 = vmatpush.bf16.msra.mxu0 %v7337_v12  ;;  %v8614_v50 = vld [vmem:[%s12804_s10 + $0x10c] sm:$0xf0]  ;;  %v8596_v12 = vld [vmem:[%s12804_s10 + $0x84] sm:$0xf] }
 0x264   : > { %v3182_v41 = vpop.f32.mrf.mxu0 }
 0x265   : > { %v3183_v16 = vadd.f32 %v8867_v14, %v3182_v41  ;;  %v7225_v41 = vor.u32 %v8602_v56, %v7224_v54  ;;  %v7320_v14 = vld [vmem:[%s12804_s10 + $0x160] sm:$0xf]  ;;  %v7514_v54 = vld [vmem:[%s12804_s10 + $0x2f0] sm:$0xf0]  ;;  %v8650_v56 = vld [vmem:[%s12804_s10 + $0x22c] sm:$0xf0] }
 0x266   : > { %v7517_v2 = vor.u32 %v8672_v52, %v7514_v54  ;;  %v8580_v54 = vld [vmem:[%s12804_s10 + $0x4] sm:$0xf] }
 0x267   : > { %3984 = vmatpush.bf16.msra.mxu3 %v7225_v41  ;;  %v7242_v41 = vld [vmem:[%s12804_s10 + $0xd0] sm:$0xf0] }
 0x26c   : > { %v3184_v63 = vpop.f32.mrf.mxu0 }
 0x26d   : > { %v7208_v63 = vld [vmem:[%s12804_s10 + $0x80] sm:$0xf] }
 0x278   : > { %v3195_v42 = vpop.f32.mrf.mxu1 }
 0x279   : > { %v3196_v7 = vadd.f32 %v3195_v42, %v3183_v16  ;;  %v7513_v42 = vor.u32 %v8674_v39, %v7512_v61  ;;  %v7481_v16 = vor.u32 %v8666_v6, %v7480_v5  ;;  %v7389_v61 = vor.u32 %v8640_v34, %v7386_v49  ;;  %v8604_v39 = vld [vmem:[%s12804_s10 + $0xc4] sm:$0xf]  ;;  %v7226_v6 = vld [vmem:[%s12804_s10 + $0xb0] sm:$0xf0] }
 0x27a   : > { %v7245_v4 = vor.u32 %v8604_v39, %v7242_v41  ;;  %v8600_v5 = vld [vmem:[%s12804_s10 + $0xa4] sm:$0xf]  ;;  %v7450_v49 = vld [vmem:[%s12804_s10 + $0x270] sm:$0xf0] }
 0x27b   : > { %4008 = vmatpush.bf16.msrb.mxu1 %v7513_v42  ;;  %v8636_v42 = vld [vmem:[%s12804_s10 + $0x1c4] sm:$0xf] }
 0x27f   : > { %4009 = vmatpush.bf16.msrb.mxu1 %v7497_v53 }
 0x280   : > { %v3197_v1 = vpop.f32.mrf.mxu1 }
 0x281   : > { %v8598_v1 = vld [vmem:[%s12804_s10 + $0x8c] sm:$0xf0] }
 0x282   : > { %v7209_v9 = vor.u32 %v8598_v1, %v7208_v63  ;;  %v7273_v63 = vor.u32 %v8614_v50, %v7272_v35  ;;  %v7370_v1 = vld [vmem:[%s12804_s10 + $0x1d0] sm:$0xf0]  ;;  %v7453_v50 = vor.u32 %v8656_v48, %v7450_v49  ;;  %v7376_v48 = vld [vmem:[%s12804_s10 + $0x1c8] sm:$0xf] }
 0x283   : > { %4010 = vmatpush.bf16.msrb.mxu1 %v7481_v16  ;;  %v7373_v53 = vor.u32 %v8636_v42, %v7370_v1  ;;  %v7290_v35 = vld [vmem:[%s12804_s10 + $0x130] sm:$0xf0] }
 0x284   : > { %3985 = vmatpush.bf16.msra.mxu3 %v7209_v9  ;;  %v7354_v9 = vld [vmem:[%s12804_s10 + $0x1b0] sm:$0xf0] }
 0x285   : > { %v7418_v42 = vld [vmem:[%s12804_s10 + $0x230] sm:$0xf0] }
 0x28c   : > { %v3208_v10 = vpop.f32.mrf.mxu2 }
 0x28d   : > { %v3209_v18 = vadd.f32 %v3208_v10, %v3196_v7  ;;  %v8678_v10 = vld [vmem:[%s12804_s10 + $0x30c] sm:$0xf0]  ;;  %v7464_v7 = vld [vmem:[%s12804_s10 + $0x280] sm:$0xf] }
 0x28e   : > { %v7529_v13 = vor.u32 %v8678_v10, %v7528_v8  ;;  %v8632_v8 = vld [vmem:[%s12804_s10 + $0x1a4] sm:$0xf]  ;;  %v7501_v10 = vor.u32 %v8668_v0, %v7498_v62  ;;  %v3253_v62 = vld [vmem:[%s12803_s9] sm:$0xf] }
 0x290   : > { %4028 = vmatpush.bf16.msrb.mxu2 %v7529_v13  ;;  %v7210_v13 = vld [vmem:[%s12804_s10 + $0x90] sm:$0xf0] }
 0x291   : > { %v7213_v16 = vor.u32 %v8596_v12, %v7210_v13  ;;  %v8611_v12 = vld [vmem:[%s12804_s10 + $0xf4] sm:$0xf0] }
 0x294   : > { %v3210_v15 = vpop.f32.mrf.mxu2 }
 0x295   : > { %v8626_v15 = vld [vmem:[%s12804_s10 + $0x16c] sm:$0xf0] }
 0x296   : > { %v7321_v22 = vor.u32 %v8626_v15, %v7320_v14  ;;  %v8628_v14 = vld [vmem:[%s12804_s10 + $0x184] sm:$0xf]  ;;  %v7338_v15 = vld [vmem:[%s12804_s10 + $0x190] sm:$0xf0] }
 0x298   : > { %3999 = vmatpush.bf16.msra.mxu0 %v7321_v22  ;;  %v7482_v22 = vld [vmem:[%s12804_s10 + $0x2b0] sm:$0xf0] }
 0x29a   : > { %v3221_v11 = vpop.f32.mrf.mxu3 }
 0x29b   : > { %v10982_v19 = vadd.f32 %v3221_v11, %v3209_v18  ;;  %v8662_v18 = vld [vmem:[%s12804_s10 + $0x28c] sm:$0xf0]  ;;  %v7193_v11 = vor.u32 %v8594_v55, %v7192_v45  ;;  %v7229_v45 = vor.u32 %v8600_v5, %v7226_v6  ;;  %v7357_v55 = vor.u32 %v8632_v8, %v7354_v9  ;;  %v7536_v9 = vld [vmem:[%s12804_s10 + $0x308] sm:$0xf] }
 0x29d   : > { %v3225_v21 = vmul.f32 1.442695, %v10982_v19  ;;  %3986 = vmatpush.bf16.msra.mxu3 %v7193_v11  ;;  %v7194_v11 = vld [vmem:[%s12804_s10 + $0x70] sm:$0xf0] }
 0x29f   : > { %8868 = vpow2.f32 %v3225_v21  ;;  %v8590_v21 = vld [vmem:[%s12804_s10 + $0x4c] sm:$0xf0] }
 0x2a0   : > { %v7177_v27 = vor.u32 %v8590_v21, %v7176_v20  ;;  %v8664_v20 = vld [vmem:[%s12804_s10 + $0x2a4] sm:$0xf] }
 0x2a2   : > { %v3223_v23 = vpop.f32.mrf.mxu3  ;;  %3987 = vmatpush.bf16.msra.mxu3 %v7177_v27  ;;  %v8646_v27 = vld [vmem:[%s12804_s10 + $0x20c] sm:$0xf0] }
 0x2a3   : > { %v7304_v23 = vld [vmem:[%s12804_s10 + $0x140] sm:$0xf] }
 0x2a5   : > { %v8869_v24 = vpop.eup %8868 }
 0x2a6   : > { %v3230_v25 = vsel %vm3229_vm2, %v8869_v24, %v10982_v19  ;;  %v3238_v26 = vmul.f32 %v8869_v24, %v3236_v31  ;;  %v8622_v31 = vld [vmem:[%s12804_s10 + $0x14c] sm:$0xf0]  ;;  %v7465_v24 = vor.u32 %v8662_v18, %v7464_v7  ;;  %3988 = vmatpush.bf16.msra.mxu3 %v7161_v57  ;;  %v7341_v7 = vor.u32 %v8628_v14, %v7338_v15  ;;  %v8592_v18 = vld [vmem:[%s12804_s10 + $0x64] sm:$0xf] }
 0x2a7   : > { %3232 = vst.msk [vmem:[%s550_s29] sm:$0xff] %vm3231_vm3, %v3230_v25  ;;  %v7448_v25 = vld [vmem:[%s12804_s10 + $0x260] sm:$0xf]  ;;  %v7305_v33 = vor.u32 %v8622_v31, %v7304_v23  ;;  %v7197_v21 = vor.u32 %v8592_v18, %v7194_v11  ;;  %v8624_v23 = vld [vmem:[%s12804_s10 + $0x164] sm:$0xf]  ;;  %v3255_v14 = vperm.slane %v3253_v62, 0 }
 0x2a8   : > { %3240 = vrot.lane.b32.xlu0 %v3238_v26, %s8879_s30  ;;  %v8658_v26 = vld [vmem:[%s12804_s10 + $0x26c] sm:$0xf0]  ;;  %4011 = vmatpush.bf16.msrb.mxu1 %v7465_v24  ;;  %v7322_v31 = vld [vmem:[%s12804_s10 + $0x170] sm:$0xf0]  ;;  %v7485_v24 = vor.u32 %v8664_v20, %v7482_v22  ;;  %v7248_v22 = vld [vmem:[%s12804_s10 + $0xc8] sm:$0xf] }
 0x2a9   : > { %v7449_v38 = vor.u32 %v8658_v26, %v7448_v25  ;;  %4000 = vmatpush.bf16.msra.mxu0 %v7305_v33  ;;  %v7325_v25 = vor.u32 %v8624_v23, %v7322_v31  ;;  %v7400_v26 = vld [vmem:[%s12804_s10 + $0x200] sm:$0xf]  ;;  %v7178_v33 = vld [vmem:[%s12804_s10 + $0x50] sm:$0xf0]  ;;  %v8607_v23 = vld [vmem:[%s12804_s10 + $0xd4] sm:$0xf0] }
 0x2aa   : > { %3989 = vmatpush.bf16.msra.mxu3 %v7145_v59  ;;  %v7401_v29 = vor.u32 %v8646_v27, %v7400_v26  ;;  %v7181_v37 = vor.u32 %v8588_v32, %v7178_v33  ;;  %v7434_v59 = vld [vmem:[%s12804_s10 + $0x250] sm:$0xf0]  ;;  %v8675_v26 = vld [vmem:[%s12804_s10 + $0x2f4] sm:$0xf0]  ;;  %v7392_v32 = vld [vmem:[%s12804_s10 + $0x1e8] sm:$0xf] }
 0x2ab   : > { %v8643_v33 = vld [vmem:[%s12804_s10 + $0x1f4] sm:$0xf0] }
 0x2ac   : > { %4012 = vmatpush.bf16.msrb.mxu1 %v7449_v38  ;;  %v7466_v38 = vld [vmem:[%s12804_s10 + $0x290] sm:$0xf0]  ;;  %v7393_v43 = vor.u32 %v8643_v33, %v7392_v32  ;;  %v8623_v32 = vld [vmem:[%s12804_s10 + $0x154] sm:$0xf0] }
 0x2ad   : > { %4001 = vmatpush.bf16.msra.mxu0 %v7289_v28  ;;  %v7469_v57 = vor.u32 %v8660_v17, %v7466_v38  ;;  %v7309_v28 = vor.u32 %v8620_v51, %v7306_v40  ;;  %v7249_v38 = vor.u32 %v8607_v23, %v7248_v22  ;;  %v7168_v23 = vld [vmem:[%s12804_s10 + $0x28] sm:$0xf] }
 0x2b0   : > { %4013 = vmatpush.bf16.msrb.mxu1 %v7433_v46  ;;  %v8584_v46 = vld [vmem:[%s12804_s10 + $0x24] sm:$0xf] }
 0x2b1   : > { %4002 = vmatpush.bf16.msra.mxu0 %v7273_v63  ;;  %v8648_v63 = vld [vmem:[%s12804_s10 + $0x224] sm:$0xf] }
 0x2b2   : > { %v7421_v1 = vor.u32 %v8648_v63, %v7418_v42  ;;  %v7200_v42 = vld [vmem:[%s12804_s10 + $0x68] sm:$0xf] }
 0x31a   : > { %v3241_v47 = vpop.permute.xlu0 %3240 }
 0x31b   : > { %v3243_v36 = vadd.f32 %v3241_v47, %v10982_v19  ;;  %v7416_v19 = vld [vmem:[%s12804_s10 + $0x220] sm:$0xf]  ;;  %v7162_v47 = vld [vmem:[%s12804_s10 + $0x30] sm:$0xf0] }
 0x31c   : > { %v7417_v3 = vor.u32 %v8650_v56, %v7416_v19  ;;  %v7165_v34 = vor.u32 %v8584_v46, %v7162_v47  ;;  %v7146_v19 = vld [vmem:[%s12804_s10 + $0x10] sm:$0xf0]  ;;  %v8652_v56 = vld [vmem:[%s12804_s10 + $0x244] sm:$0xf]  ;;  %v8671_v46 = vld [vmem:[%s12804_s10 + $0x2d4] sm:$0xf0] }
 0x31d   : > { %3245 = vst.msk [vmem:[%s554_s0] sm:$0xff] %vm3244_vm4, %v3243_v36  ;;  %v3246_v58 = vpack.c.bf16 %v3243_v36, %v3243_v36  ;;  %v8616_v36 = vld [vmem:[%s12804_s10 + $0x124] sm:$0xf]  ;;  %v7437_v39 = vor.u32 %v8652_v56, %v7434_v59  ;;  %v7488_v56 = vld [vmem:[%s12804_s10 + $0x2a8] sm:$0xf] }
 0x31e   : > { %4014 = vmatpush.bf16.msrb.mxu1 %v7417_v3  ;;  %v7293_v52 = vor.u32 %v8616_v36, %v7290_v35  ;;  %v7402_v3 = vld [vmem:[%s12804_s10 + $0x210] sm:$0xf0]  ;;  %v7360_v59 = vld [vmem:[%s12804_s10 + $0x1a8] sm:$0xf] }
 0x31f   : > { %7138 = vmatmul.msk.bf16.vlgmr.msrb.gmra.mxu3 %vm3244_vm4, %v3246_v58  ;;  %7139 = vmatmul.msk.bf16.vlgmr.msrb.gmra.mxu0 %vm3244_vm4, %v3246_v58 }
 0x320   : > { %7140 = vmatmul.msk.bf16.vlgmr.msra.gmra.mxu1 %vm3244_vm4, %v3246_v58  ;;  %7141 = vmatmul.msk.bf16.vlgmr.msra.gmra.mxu2 %vm3244_vm4, %v3246_v58  ;;  %v7149_v58 = vor.u32 %v8580_v54, %v7146_v19 }
 0x321   : > { %4034 = vmatpush.bf16.msra.mxu2 %v7261_v60  ;;  %4047 = vmatpush.bf16.msrb.mxu3 %v7389_v61  ;;  %v8612_v60 = vld [vmem:[%s12804_s10 + $0x104] sm:$0xf]  ;;  %v7274_v61 = vld [vmem:[%s12804_s10 + $0x110] sm:$0xf0] }
 0x322   : > { %4060 = vmatpush.bf16.msrb.mxu0 %v7517_v2  ;;  %4015 = vmatpush.bf16.msrb.mxu1 %v7401_v29  ;;  %v7277_v41 = vor.u32 %v8612_v60, %v7274_v61  ;;  %v8644_v2 = vld [vmem:[%s12804_s10 + $0x204] sm:$0xf]  ;;  %v8635_v60 = vld [vmem:[%s12804_s10 + $0x1b4] sm:$0xf0] }
 0x323   : > { %v7405_v0 = vor.u32 %v8644_v2, %v7402_v3  ;;  %v7361_v2 = vor.u32 %v8635_v60, %v7360_v59  ;;  %v7472_v3 = vld [vmem:[%s12804_s10 + $0x288] sm:$0xf]  ;;  %v8615_v60 = vld [vmem:[%s12804_s10 + $0x114] sm:$0xf0] }
 0x325   : > { %4035 = vmatpush.bf16.msra.mxu2 %v7245_v4  ;;  %4048 = vmatpush.bf16.msrb.mxu3 %v7373_v53  ;;  %v3256_v4 = vperm.slane %v3253_v62, 1  ;;  %v3257_v53 = vperm.slane %v3253_v62, 2 }
 0x326   : > { %4061 = vmatpush.bf16.msrb.mxu0 %v7501_v10  ;;  %4080 = vmatpush.bf16.msra.mxu1 %v7533_v44  ;;  %v8679_v10 = vld [vmem:[%s12804_s10 + $0x314] sm:$0xf0]  ;;  %v7504_v44 = vld [vmem:[%s12804_s10 + $0x2c8] sm:$0xf] }
 0x327   : > { %v7505_v35 = vor.u32 %v8671_v46, %v7504_v44  ;;  %v7424_v44 = vld [vmem:[%s12804_s10 + $0x228] sm:$0xf]  ;;  %v8651_v46 = vld [vmem:[%s12804_s10 + $0x234] sm:$0xf0] }
 0x329   : > { %4036 = vmatpush.bf16.msra.mxu2 %v7229_v45  ;;  %4049 = vmatpush.bf16.msrb.mxu3 %v7357_v55  ;;  %v7264_v55 = vld [vmem:[%s12804_s10 + $0xe8] sm:$0xf] }
 0x32a   : > { %4062 = vmatpush.bf16.msrb.mxu0 %v7485_v24  ;;  %v7265_v11 = vor.u32 %v8611_v12, %v7264_v55  ;;  %v7456_v12 = vld [vmem:[%s12804_s10 + $0x268] sm:$0xf] }
 0x32d   : > { %4037 = vmatpush.bf16.msra.mxu2 %v7213_v16  ;;  %4050 = vmatpush.bf16.msrb.mxu3 %v7341_v7  ;;  %v3258_v16 = vperm.slane %v3253_v62, 3  ;;  %v7537_v7 = vor.u32 %v8679_v10, %v7536_v9  ;;  %v7184_v10 = vld [vmem:[%s12804_s10 + $0x48] sm:$0xf] }
 0x32e   : > { %4063 = vmatpush.bf16.msrb.mxu0 %v7469_v57  ;;  %v7232_v57 = vld [vmem:[%s12804_s10 + $0xa8] sm:$0xf] }
 0x331   : > { %4038 = vmatpush.bf16.msra.mxu2 %v7197_v21  ;;  %4051 = vmatpush.bf16.msrb.mxu3 %v7325_v25  ;;  %v7520_v25 = vld [vmem:[%s12804_s10 + $0x2e8] sm:$0xf] }
 0x332   : > { %4064 = vmatpush.bf16.msrb.mxu0 %v7453_v50  ;;  %v7521_v40 = vor.u32 %v8675_v26, %v7520_v25  ;;  %v7216_v50 = vld [vmem:[%s12804_s10 + $0x88] sm:$0xf]  ;;  %v8655_v26 = vld [vmem:[%s12804_s10 + $0x254] sm:$0xf0] }
 0x333   : > { %v7440_v25 = vld [vmem:[%s12804_s10 + $0x248] sm:$0xf] }
 0x335   : > { %4039 = vmatpush.bf16.msra.mxu2 %v7181_v37  ;;  %4052 = vmatpush.bf16.msrb.mxu3 %v7309_v28  ;;  %v8603_v28 = vld [vmem:[%s12804_s10 + $0xb4] sm:$0xf0] }
 0x336   : > { %4065 = vmatpush.bf16.msrb.mxu0 %v7437_v39  ;;  %v7233_v49 = vor.u32 %v8603_v28, %v7232_v57  ;;  %v8609_v39 = vld [vmem:[%s12804_s10 + $0xec] sm:$0xf] }
 0x337   : > { %v8641_v57 = vld [vmem:[%s12804_s10 + $0x1ec] sm:$0xf] }
 0x339   : > { %4040 = vmatpush.bf16.msra.mxu2 %v7165_v34  ;;  %4053 = vmatpush.bf16.msrb.mxu3 %v7293_v52  ;;  %v8639_v34 = vld [vmem:[%s12804_s10 + $0x1d4] sm:$0xf0] }
 0x33a   : > { %4066 = vmatpush.bf16.msrb.mxu0 %v7421_v1  ;;  %v8599_v52 = vld [vmem:[%s12804_s10 + $0x94] sm:$0xf0]  ;;  %v7377_v19 = vor.u32 %v8639_v34, %v7376_v48  ;;  %v7296_v34 = vld [vmem:[%s12804_s10 + $0x128] sm:$0xf] }
 0x33b   : > { %v7217_v61 = vor.u32 %v8599_v52, %v7216_v50  ;;  %v8595_v1 = vld [vmem:[%s12804_s10 + $0x74] sm:$0xf0]  ;;  %v7202_v50 = vld [vmem:[%s12804_s10 + $0x78] sm:$0xf0] }
 0x33d   : > { %4041 = vmatpush.bf16.msra.mxu2 %v7149_v58  ;;  %4054 = vmatpush.bf16.msrb.mxu3 %v7277_v41  ;;  %v8667_v58 = vld [vmem:[%s12804_s10 + $0x2b4] sm:$0xf0]  ;;  %v7266_v41 = vld [vmem:[%s12804_s10 + $0xf8] sm:$0xf0] }
 0x33e   : > { %4067 = vmatpush.bf16.msrb.mxu0 %v7405_v0  ;;  %v7489_v63 = vor.u32 %v8667_v58, %v7488_v56  ;;  %v8663_v0 = vld [vmem:[%s12804_s10 + $0x294] sm:$0xf0]  ;;  %v7269_v62 = vor.u32 %v8609_v39, %v7266_v41  ;;  %v7378_v56 = vld [vmem:[%s12804_s10 + $0x1d8] sm:$0xf0]  ;;  %v7280_v58 = vld [vmem:[%s12804_s10 + $0x108] sm:$0xf] }
 0x33f   : > { %v7473_v9 = vor.u32 %v8663_v0, %v7472_v3  ;;  %v8647_v39 = vld [vmem:[%s12804_s10 + $0x214] sm:$0xf0]  ;;  %v8589_v3 = vld [vmem:[%s12804_s10 + $0x4c] sm:$0xf]  ;;  %v7186_v0 = vld [vmem:[%s12804_s10 + $0x58] sm:$0xf0] }
 0x39c   : > { %v3331_v5 = vpop.f32.mrf.mxu0 }
 0x39d   : > { %v3332_v6 = vadd.f32 %v3331_v5, %v3256_v4  ;;  %v3344_v8 = vpop.f32.mrf.mxu1  ;;  %v7344_v4 = vld [vmem:[%s12804_s10 + $0x188] sm:$0xf]  ;;  %v7201_v5 = vor.u32 %v8595_v1, %v7200_v42  ;;  %v8677_v42 = vld [vmem:[%s12804_s10 + $0x30c] sm:$0xf]  ;;  %v7538_v1 = vld [vmem:[%s12804_s10 + $0x318] sm:$0xf0] }
 0x39e   : > { %v3345_v45 = vadd.f32 %v3344_v8, %v3257_v53  ;;  %v8631_v53 = vld [vmem:[%s12804_s10 + $0x194] sm:$0xf0]  ;;  %v7250_v8 = vld [vmem:[%s12804_s10 + $0xd8] sm:$0xf0] }
 0x39f   : > { %v3362_v13 = vmax.f32 %v3332_v6, 0.0  ;;  %v8605_v6 = vld [vmem:[%s12804_s10 + $0xcc] sm:$0xf]  ;;  %v7345_v55 = vor.u32 %v8631_v53, %v7344_v4  ;;  %v7281_v53 = vor.u32 %v8615_v60, %v7280_v58  ;;  %v7298_v60 = vld [vmem:[%s12804_s10 + $0x138] sm:$0xf0] }
 0x3a0   : > { %v3363_v15 = vmax.f32 %v3345_v45, 0.0  ;;  %v8591_v45 = vld [vmem:[%s12804_s10 + $0x54] sm:$0xf0] }
 0x3a1   : > { %v11339_v18 = vpack.c.bf16 %v3362_v13, %v3362_v13  ;;  %v8659_v13 = vld [vmem:[%s12804_s10 + $0x274] sm:$0xf0] }
 0x3a2   : > { %v11341_v20 = vpack.c.bf16 %v3363_v15, %v3363_v15  ;;  %v3318_v21 = vpop.f32.mrf.mxu3  ;;  %v7328_v15 = vld [vmem:[%s12804_s10 + $0x168] sm:$0xf]  ;;  %v7457_v22 = vor.u32 %v8659_v13, %v7456_v12  ;;  %v8585_v12 = vld [vmem:[%s12804_s10 + $0x2c] sm:$0xf]  ;;  %v7170_v13 = vld [vmem:[%s12804_s10 + $0x38] sm:$0xf0] }
 0x3a3   : > { %v3319_v31 = vadd.f32 %v3318_v21, %v3255_v14  ;;  %v3357_v24 = vpop.f32.mrf.mxu2  ;;  %4003 = vmatmul.bf16.vlgmr.msra.gmra.mxu0 %v11339_v18  ;;  %v7253_v14 = vor.u32 %v8605_v6, %v7250_v8  ;;  %v7234_v21 = vld [vmem:[%s12804_s10 + $0xb8] sm:$0xf0]  ;;  %v7541_v8 = vor.u32 %v8677_v42, %v7538_v1 }
 0x3a4   : > { %v3358_v27 = vadd.f32 %v3357_v24, %v3258_v16  ;;  %4016 = vmatmul.bf16.vlgmr.msrb.gmra.mxu1 %v11341_v20  ;;  %v3333_v29 = vpop.f32.mrf.mxu0  ;;  %4132 = vmatpush.bf16.msra.mxu0 %v7537_v7  ;;  %v8627_v16 = vld [vmem:[%s12804_s10 + $0x174] sm:$0xf0]  ;;  %v7185_v7 = vor.u32 %v8591_v45, %v7184_v10  ;;  %v7362_v6 = vld [vmem:[%s12804_s10 + $0x1b8] sm:$0xf0]  ;;  %v7189_v10 = vor.u32 %v8589_v3, %v7186_v0  ;;  %v8669_v45 = vld [vmem:[%s12804_s10 + $0x2cc] sm:$0xf] }
 0x3a5   : > { %v3361_v17 = vmax.f32 %v3319_v31, 0.0  ;;  %4086 = vmatpush.bf16.msrb.mxu1 %v7265_v11  ;;  %v3346_v37 = vpop.f32.mrf.mxu1  ;;  %v8601_v11 = vld [vmem:[%s12804_s10 + $0xac] sm:$0xf]  ;;  %v8587_v31 = vld [vmem:[%s12804_s10 + $0x34] sm:$0xf0]  ;;  %v7329_v24 = vor.u32 %v8627_v16, %v7328_v15 }
 0x3a6   : > { %v3364_v51 = vmax.f32 %v3358_v27, 0.0  ;;  %v7237_v27 = vor.u32 %v8601_v11, %v7234_v21  ;;  %v7312_v29 = vld [vmem:[%s12804_s10 + $0x148] sm:$0xf]  ;;  %v7169_v33 = vor.u32 %v8587_v31, %v7168_v23  ;;  %v7218_v37 = vld [vmem:[%s12804_s10 + $0x98] sm:$0xf0] }
 0x3a7   : > { %v11369_v30 = vpack.c.bf16 %v3361_v17, %v3361_v17  ;;  %v8597_v17 = vld [vmem:[%s12804_s10 + $0x8c] sm:$0xf]  ;;  %v7313_v28 = vor.u32 %v8623_v32, %v7312_v29  ;;  %v7346_v16 = vld [vmem:[%s12804_s10 + $0x198] sm:$0xf0]  ;;  %v8732_v11 = vld [vmem:[%s12806_s12 + $0x1a0] sm:$0xf0] }
 0x3a8   : > { %v11377_v47 = vpack.c.bf16 %v3364_v51, %v3364_v51  ;;  %v7152_v51 = vld [vmem:[%s12804_s10 + $0x8] sm:$0xf]  ;;  %v7221_v48 = vor.u32 %v8597_v17, %v7218_v37  ;;  %v8629_v15 = vld [vmem:[%s12804_s10 + $0x18c] sm:$0xf]  ;;  %v7154_v29 = vld [vmem:[%s12804_s10 + $0x18] sm:$0xf0] }
 0x3a9   : > { %4087 = vmatpush.bf16.msrb.mxu1 %v7249_v38  ;;  %3990 = vmatmul.bf16.vlgmr.msra.gmra.mxu3 %v11369_v30  ;;  %v7441_v38 = vor.u32 %v8655_v26, %v7440_v25  ;;  %v8665_v23 = vld [vmem:[%s12804_s10 + $0x2ac] sm:$0xf]  ;;  %v7490_v26 = vld [vmem:[%s12804_s10 + $0x2b8] sm:$0xf0]  ;;  %v7349_v32 = vor.u32 %v8629_v15, %v7346_v16  ;;  %v7548_v15 = vld [vmem:[%s12806_s12] sm:$0xf] }
 0x3aa   : > { %7542 = vmatmul.msk.bf16.vlgmr.msrb.gmra.mxu2 %vm1761_vm0, %v11377_v47  ;;  %v3320_v36 = vpop.f32.mrf.mxu3  ;;  %4112 = vmatpush.bf16.msra.mxu3 %v7521_v40  ;;  %v8583_v40 = vld [vmem:[%s12804_s10 + $0x14] sm:$0xf0]  ;;  %v8725_v25 = vld [vmem:[%s12806_s12 + $0x168] sm:$0xf0]  ;;  %v7330_v17 = vld [vmem:[%s12804_s10 + $0x178] sm:$0xf0] }
 0x3ab   : > { %4099 = vmatpush.bf16.msrb.mxu2 %v7393_v43  ;;  %v3359_v54 = vpop.f32.mrf.mxu2  ;;  %v7394_v43 = vld [vmem:[%s12804_s10 + $0x1f8] sm:$0xf0]  ;;  %v7153_v36 = vor.u32 %v8583_v40, %v7152_v51  ;;  %v7493_v51 = vor.u32 %v8665_v23, %v7490_v26  ;;  %v8781_v23 = vld [vmem:[%s12806_s12 + $0x328] sm:$0xf0]  ;;  %v7912_v26 = vld [vmem:[%s12806_s12 + $0x2d8] sm:$0xf] }
 0x3ac   : > { %v7397_v52 = vor.u32 %v8641_v57, %v7394_v43  ;;  %v7425_v54 = vor.u32 %v8651_v46, %v7424_v44  ;;  %v8718_v57 = vld [vmem:[%s12806_s12 + $0x130] sm:$0xf0]  ;;  %v8788_v43 = vld [vmem:[%s12806_s12 + $0x360] sm:$0xf0]  ;;  %v8661_v44 = vld [vmem:[%s12804_s10 + $0x28c] sm:$0xf] }
 0x3ad   : > { %4088 = vmatpush.bf16.msrb.mxu1 %v7233_v49  ;;  %v8619_v49 = vld [vmem:[%s12804_s10 + $0x134] sm:$0xf0]  ;;  %v7474_v46 = vld [vmem:[%s12804_s10 + $0x298] sm:$0xf0] }
 0x3ae   : > { %4113 = vmatpush.bf16.msra.mxu3 %v7505_v35  ;;  %v8593_v35 = vld [vmem:[%s12804_s10 + $0x6c] sm:$0xf]  ;;  %v7297_v59 = vor.u32 %v8619_v49, %v7296_v34  ;;  %v7442_v42 = vld [vmem:[%s12804_s10 + $0x258] sm:$0xf0] }
 0x3af   : > { %4100 = vmatpush.bf16.msrb.mxu2 %v7377_v19  ;;  %v8637_v19 = vld [vmem:[%s12804_s10 + $0x1cc] sm:$0xf]  ;;  %v7205_v41 = vor.u32 %v8593_v35, %v7202_v50  ;;  %v7477_v50 = vor.u32 %v8661_v44, %v7474_v46  ;;  %v7282_v3 = vld [vmem:[%s12804_s10 + $0x118] sm:$0xf0]  ;;  %v8760_v44 = vld [vmem:[%s12806_s12 + $0x280] sm:$0xf0] }
 0x3b0   : > { %v8621_v49 = vld [vmem:[%s12804_s10 + $0x14c] sm:$0xf]  ;;  %v8683_v16 = vld [vmem:[%s12806_s12 + $0x18] sm:$0xf0] }
 0x3b1   : > { %4089 = vmatpush.bf16.msrb.mxu1 %v7217_v61  ;;  %v7408_v61 = vld [vmem:[%s12804_s10 + $0x208] sm:$0xf]  ;;  %v8757_v46 = vld [vmem:[%s12806_s12 + $0x26c] sm:$0xf] }
 0x3b2   : > { %4114 = vmatpush.bf16.msra.mxu3 %v7489_v63  ;;  %v8673_v63 = vld [vmem:[%s12804_s10 + $0x2ec] sm:$0xf]  ;;  %v7409_v4 = vor.u32 %v8647_v39, %v7408_v61 }
 0x3b3   : > { %4101 = vmatpush.bf16.msrb.mxu2 %v7361_v2  ;;  %4068 = vmatmul.bf16.vlgmr.msrb.gmra.mxu0 %v11341_v20  ;;  %v7522_v2 = vld [vmem:[%s12804_s10 + $0x2f8] sm:$0xf0] }
 0x3b4   : > { %7543 = vmatmul.msk.bf16.vlgmr.msra.gmra.mxu1 %vm1761_vm0, %v11377_v47  ;;  %4138 = vmatpush.bf16.msrb.mxu0 %v7269_v62  ;;  %v7381_v62 = vor.u32 %v8637_v19, %v7378_v56  ;;  %v8657_v19 = vld [vmem:[%s12804_s10 + $0x26c] sm:$0xf]  ;;  %v7458_v56 = vld [vmem:[%s12804_s10 + $0x278] sm:$0xf0] }
 0x3b5   : > { %4090 = vmatpush.bf16.msrb.mxu1 %v7201_v5  ;;  %v8633_v5 = vld [vmem:[%s12804_s10 + $0x1ac] sm:$0xf]  ;;  %v7461_v39 = vor.u32 %v8657_v19, %v7458_v56  ;;  %v7800_v56 = vld [vmem:[%s12806_s12 + $0x1f8] sm:$0xf] }
 0x3b6   : > { %4115 = vmatpush.bf16.msra.mxu3 %v7473_v9  ;;  %v7525_v9 = vor.u32 %v8673_v63, %v7522_v2  ;;  %v8653_v63 = vld [vmem:[%s12804_s10 + $0x24c] sm:$0xf] }
 0x3b7   : > { %4102 = vmatpush.bf16.msrb.mxu2 %v7345_v55  ;;  %v7506_v55 = vld [vmem:[%s12804_s10 + $0x2d8] sm:$0xf0]  ;;  %v8613_v2 = vld [vmem:[%s12804_s10 + $0x10c] sm:$0xf] }
 0x3b8   : > { %4139 = vmatpush.bf16.msrb.mxu0 %v7253_v14  ;;  %v7365_v14 = vor.u32 %v8633_v5, %v7362_v6  ;;  %v7509_v21 = vor.u32 %v8669_v45, %v7506_v55  ;;  %v8649_v5 = vld [vmem:[%s12804_s10 + $0x22c] sm:$0xf]  ;;  %v7426_v6 = vld [vmem:[%s12804_s10 + $0x238] sm:$0xf0]  ;;  %v7576_v45 = vld [vmem:[%s12806_s12 + $0x38] sm:$0xf] }
 0x3b9   : > { %4091 = vmatpush.bf16.msrb.mxu1 %v7185_v7  ;;  %4055 = vmatmul.bf16.vlgmr.msrb.gmra.mxu3 %v11339_v18  ;;  %v7744_v7 = vld [vmem:[%s12806_s12 + $0x188] sm:$0xf]  ;;  %v8645_v55 = vld [vmem:[%s12804_s10 + $0x20c] sm:$0xf] }
 0x3ba   : > { %4042 = vmatmul.bf16.vlgmr.msra.gmra.mxu2 %v11369_v30  ;;  %4116 = vmatpush.bf16.msra.mxu3 %v7457_v22  ;;  %v7173_v22 = vor.u32 %v8585_v12, %v7170_v13  ;;  %v7745_v31 = vor.u32 %v8732_v11, %v7744_v7  ;;  %v7410_v12 = vld [vmem:[%s12804_s10 + $0x218] sm:$0xf0]  ;;  %v8785_v7 = vld [vmem:[%s12806_s12 + $0x34c] sm:$0xf]  ;;  %v7970_v11 = vld [vmem:[%s12806_s12 + $0x364] sm:$0xf0] }
 0x3bb   : > { %4103 = vmatpush.bf16.msrb.mxu2 %v7329_v24  ;;  %v7716_v24 = vld [vmem:[%s12806_s12 + $0x150] sm:$0xf] }
 0x3bc   : > { %4140 = vmatpush.bf16.msrb.mxu0 %v7237_v27  ;;  %v8581_v27 = vld [vmem:[%s12804_s10 + $0xc] sm:$0xf]  ;;  %v7717_v37 = vor.u32 %v8725_v25, %v7716_v24  ;;  %v7942_v25 = vld [vmem:[%s12806_s12 + $0x32c] sm:$0xf0] }
 0x3bd   : > { %4092 = vmatpush.bf16.msrb.mxu1 %v7169_v33  ;;  %v8625_v33 = vld [vmem:[%s12804_s10 + $0x16c] sm:$0xf]  ;;  %v7157_v40 = vor.u32 %v8581_v27, %v7154_v29  ;;  %v8774_v27 = vld [vmem:[%s12806_s12 + $0x2f0] sm:$0xf0]  ;;  %v8771_v29 = vld [vmem:[%s12806_s12 + $0x2dc] sm:$0xf] }
 0x3be   : > { %4117 = vmatpush.bf16.msra.mxu3 %v7441_v38  ;;  %v7688_v38 = vld [vmem:[%s12806_s12 + $0x118] sm:$0xf]  ;;  %v7333_v34 = vor.u32 %v8625_v33, %v7330_v17 }
 0x3bf   : > { %4104 = vmatpush.bf16.msrb.mxu2 %v7313_v28  ;;  %v7968_v28 = vld [vmem:[%s12806_s12 + $0x348] sm:$0xf]  ;;  %v7689_v35 = vor.u32 %v8718_v57, %v7688_v38  ;;  %v7914_v33 = vld [vmem:[%s12806_s12 + $0x2f4] sm:$0xf0]  ;;  %v8767_v38 = vld [vmem:[%s12806_s12 + $0x2b8] sm:$0xf0] }
 0x3c0   : > { %4141 = vmatpush.bf16.msrb.mxu0 %v7221_v48  ;;  %v7969_v48 = vor.u32 %v8788_v43, %v7968_v28  ;;  %v7917_v17 = vor.u32 %v8771_v29, %v7914_v33  ;;  %v7886_v57 = vld [vmem:[%s12806_s12 + $0x2bc] sm:$0xf0]  ;;  %v7856_v43 = vld [vmem:[%s12806_s12 + $0x268] sm:$0xf] }
 0x3c1   : > { %4093 = vmatpush.bf16.msrb.mxu1 %v7153_v36  ;;  %v7314_v36 = vld [vmem:[%s12804_s10 + $0x158] sm:$0xf0]  ;;  %v8082_v33 = vld [vmem:[%s12806_s12 + $0x444] sm:$0xf0] }
 0x3c2   : > { %4118 = vmatpush.bf16.msra.mxu3 %v7425_v54  ;;  %v8711_v54 = vld [vmem:[%s12806_s12 + $0xf8] sm:$0xf0]  ;;  %v7317_v58 = vor.u32 %v8621_v49, %v7314_v36  ;;  %v7828_v36 = vld [vmem:[%s12806_s12 + $0x230] sm:$0xf] }
 0x3c3   : > { %4105 = vmatpush.bf16.msrb.mxu2 %v7297_v59  ;;  %7544 = vmatmul.msk.bf16.vlgmr.msra.gmra.mxu0 %vm1761_vm0, %v11377_v47  ;;  %v8617_v59 = vld [vmem:[%s12804_s10 + $0x12c] sm:$0xf] }
 0x3c4   : > { %4094 = vmatmul.bf16.vlgmr.msrb.gmra.mxu1 %v11369_v30  ;;  %4142 = vmatpush.bf16.msrb.mxu0 %v7205_v41  ;;  %v7632_v41 = vld [vmem:[%s12806_s12 + $0xa8] sm:$0xf]  ;;  %v7301_v1 = vor.u32 %v8617_v59, %v7298_v60  ;;  %v8743_v59 = vld [vmem:[%s12806_s12 + $0x1fc] sm:$0xf] }
 0x3c5   : > { %4151 = vmatpush.bf16.msra.mxu1 %v7397_v52  ;;  %v7660_v52 = vld [vmem:[%s12806_s12 + $0xe0] sm:$0xf] }
 0x3c6   : > { %4119 = vmatpush.bf16.msra.mxu3 %v7409_v4  ;;  %v7661_v61 = vor.u32 %v8711_v54, %v7660_v52  ;;  %v7604_v4 = vld [vmem:[%s12806_s12 + $0x70] sm:$0xf] }
 0x3c7   : > { %4106 = vmatpush.bf16.msrb.mxu2 %v7281_v53  ;;  %v8697_v53 = vld [vmem:[%s12806_s12 + $0x88] sm:$0xf0]  ;;  %v7830_v54 = vld [vmem:[%s12806_s12 + $0x24c] sm:$0xf0] }
 0x3c8   : > { %4143 = vmatpush.bf16.msrb.mxu0 %v7189_v10  ;;  %v7429_v10 = vor.u32 %v8649_v5, %v7426_v6  ;;  %v8164_v6 = vld [vmem:[%s12806_s12 + $0x4d0] sm:$0xf] }
 0x3c9   : > { %4152 = vmatpush.bf16.msra.mxu1 %v7381_v62  ;;  %4120 = vmatmul.bf16.vlgmr.msra.gmra.mxu3 %v11341_v20  ;;  %v7445_v62 = vor.u32 %v8653_v63, %v7442_v42  ;;  %v7772_v42 = vld [vmem:[%s12806_s12 + $0x1c0] sm:$0xf] }
 0x3ca   : > { %4184 = vmatpush.bf16.msrb.mxu3 %v7541_v8  ;;  %4107 = vmatmul.bf16.vlgmr.msrb.gmra.mxu2 %v11339_v18  ;;  %v7285_v8 = vor.u32 %v8613_v2, %v7282_v3  ;;  %v8736_v2 = vld [vmem:[%s12806_s12 + $0x1c4] sm:$0xf] }
 0x3cb   : > { %4164 = vmatpush.bf16.msra.mxu2 %v7525_v9  ;;  %v7605_v9 = vor.u32 %v8697_v53, %v7604_v4  ;;  %v8194_v4 = vld [vmem:[%s12806_s12 + $0x524] sm:$0xf0] }
 0x3cc   : > { %4144 = vmatpush.bf16.msrb.mxu0 %v7173_v22  ;;  %v7973_v22 = vor.u32 %v8785_v7, %v7970_v11 }
 0x3cd   : > { %4153 = vmatpush.bf16.msra.mxu1 %v7365_v14  ;;  %v7413_v14 = vor.u32 %v8645_v55, %v7410_v12  ;;  %v8136_v55 = vld [vmem:[%s12806_s12 + $0x498] sm:$0xf]  ;;  %v8830_v12 = vld [vmem:[%s12806_s12 + $0x4b0] sm:$0xf0] }
 0x3ce   : > { %5317 = vmatpush.bf16.msra.mxu3 %v7745_v31  ;;  %v8778_v31 = vld [vmem:[%s12806_s12 + $0x314] sm:$0xf] }
 0x3cf   : > { %4165 = vmatpush.bf16.msra.mxu2 %v7509_v21  ;;  %v7549_v21 = vor.u32 %v8683_v16, %v7548_v15  ;;  %v8827_v15 = vld [vmem:[%s12806_s12 + $0x49c] sm:$0xf]  ;;  %v8138_v16 = vld [vmem:[%s12806_s12 + $0x4b4] sm:$0xf0] }
 0x3d0   : > { %4145 = vmatpush.bf16.msrb.mxu0 %v7157_v40  ;;  %v8141_v11 = vor.u32 %v8827_v15, %v8138_v16  ;;  %v8722_v15 = vld [vmem:[%s12806_s12 + $0x154] sm:$0xf]  ;;  %v7718_v16 = vld [vmem:[%s12806_s12 + $0x16c] sm:$0xf0] }
 0x3d1   : > { %4154 = vmatpush.bf16.msra.mxu1 %v7349_v32  ;;  %v7913_v32 = vor.u32 %v8774_v27, %v7912_v26  ;;  %v8816_v26 = vld [vmem:[%s12806_s12 + $0x440] sm:$0xf0] }
 0x3d2   : > { %5318 = vmatpush.bf16.msra.mxu3 %v7717_v37  ;;  %v7884_v37 = vld [vmem:[%s12806_s12 + $0x2a0] sm:$0xf] }
 0x3d3   : > { %4166 = vmatpush.bf16.msra.mxu2 %v7493_v51  ;;  %4146 = vmatmul.bf16.vlgmr.msrb.gmra.mxu0 %v11369_v30  ;;  %v8704_v30 = vld [vmem:[%s12806_s12 + $0xc0] sm:$0xf0]  ;;  %v7885_v40 = vor.u32 %v8767_v38, %v7884_v37 }
 0x3d4   : > { %5330 = vmatpush.bf16.msra.mxu0 %v7969_v48  ;;  %v7633_v0 = vor.u32 %v8704_v30, %v7632_v41  ;;  %v8764_v51 = vld [vmem:[%s12806_s12 + $0x2a4] sm:$0xf]  ;;  %v7857_v48 = vor.u32 %v8760_v44, %v7856_v43  ;;  %v8192_v41 = vld [vmem:[%s12806_s12 + $0x508] sm:$0xf]  ;;  %v8806_v43 = vld [vmem:[%s12806_s12 + $0x3f4] sm:$0xf] }
 0x3d5   : > { %4155 = vmatpush.bf16.msra.mxu1 %v7333_v34  ;;  %v7889_v28 = vor.u32 %v8764_v51, %v7886_v57  ;;  %v7858_v34 = vld [vmem:[%s12806_s12 + $0x284] sm:$0xf0]  ;;  %v8844_v30 = vld [vmem:[%s12806_s12 + $0x520] sm:$0xf0]  ;;  %v8052_v51 = vld [vmem:[%s12806_s12 + $0x3f0] sm:$0xf] }
 0x3d6   : > { %5319 = vmatpush.bf16.msra.mxu3 %v7689_v35  ;;  %v7861_v49 = vor.u32 %v8757_v46, %v7858_v34  ;;  %v8753_v35 = vld [vmem:[%s12806_s12 + $0x248] sm:$0xf0]  ;;  %v8193_v63 = vor.u32 %v8844_v30, %v8192_v41  ;;  %v8054_v44 = vld [vmem:[%s12806_s12 + $0x40c] sm:$0xf0]  ;;  %v8795_v41 = vld [vmem:[%s12806_s12 + $0x398] sm:$0xf0] }
 0x3d7   : > { %4167 = vmatpush.bf16.msra.mxu2 %v7477_v50  ;;  %v8750_v50 = vld [vmem:[%s12806_s12 + $0x234] sm:$0xf]  ;;  %v7829_v52 = vor.u32 %v8753_v35, %v7828_v36  ;;  %v8057_v34 = vor.u32 %v8806_v43, %v8054_v44  ;;  %v8220_v30 = vld [vmem:[%s12806_s12 + $0x540] sm:$0xf] }
 0x3d8   : > { %v7833_v19 = vor.u32 %v8750_v50, %v7830_v54  ;;  %v8802_v36 = vld [vmem:[%s12806_s12 + $0x3d0] sm:$0xf0]  ;;  %v8799_v54 = vld [vmem:[%s12806_s12 + $0x3bc] sm:$0xf] }
 0x3d9   : > { %4156 = vmatpush.bf16.msra.mxu1 %v7317_v58  ;;  %7545 = vmatmul.msk.bf16.vlgmr.msrb.gmra.mxu3 %vm1761_vm0, %v11377_v47  ;;  %v8690_v47 = vld [vmem:[%s12806_s12 + $0x50] sm:$0xf0] }
 0x3da   : > { %5320 = vmatpush.bf16.msra.mxu3 %v7661_v61  ;;  %v7577_v13 = vor.u32 %v8690_v47, %v7576_v45  ;;  %v8746_v58 = vld [vmem:[%s12806_s12 + $0x210] sm:$0xf0]  ;;  %v7802_v61 = vld [vmem:[%s12806_s12 + $0x214] sm:$0xf0]  ;;  %v8166_v45 = vld [vmem:[%s12806_s12 + $0x4ec] sm:$0xf0] }
 0x3db   : > { %4168 = vmatpush.bf16.msra.mxu2 %v7461_v39  ;;  %v7801_v60 = vor.u32 %v8746_v58, %v7800_v56  ;;  %v7805_v39 = vor.u32 %v8743_v59, %v7802_v61  ;;  %v8200_v59 = vld [vmem:[%s12806_s12 + $0x510] sm:$0xf] }
 0x3dd   : > { %4157 = vmatpush.bf16.msra.mxu1 %v7301_v1  ;;  %v8739_v1 = vld [vmem:[%s12806_s12 + $0x1d8] sm:$0xf0] }
 0x3de   : > { %5321 = vmatpush.bf16.msra.mxu3 %v7633_v0  ;;  %v7773_v3 = vor.u32 %v8739_v1, %v7772_v42  ;;  %v7774_v0 = vld [vmem:[%s12806_s12 + $0x1dc] sm:$0xf0]  ;;  %v8851_v1 = vld [vmem:[%s12806_s12 + $0x558] sm:$0xf0] }
 0x3df   : > { %4169 = vmatpush.bf16.msra.mxu2 %v7445_v62  ;;  %v8841_v62 = vld [vmem:[%s12806_s12 + $0x50c] sm:$0xf]  ;;  %v7777_v53 = vor.u32 %v8736_v2, %v7774_v0 }
 0x3e0   : > { %v8197_v5 = vor.u32 %v8841_v62, %v8194_v4  ;;  %v8729_v2 = vld [vmem:[%s12806_s12 + $0x18c] sm:$0xf]  ;;  %v8221_v62 = vor.u32 %v8851_v1, %v8220_v30  ;;  %v8810_v1 = vld [vmem:[%s12806_s12 + $0x410] sm:$0xf0] }
 0x3e1   : > { %4158 = vmatpush.bf16.msra.mxu1 %v7285_v8  ;;  %v8837_v8 = vld [vmem:[%s12806_s12 + $0x4e8] sm:$0xf0] }
 0x3e2   : > { %5322 = vmatpush.bf16.msra.mxu3 %v7605_v9  ;;  %v8165_v9 = vor.u32 %v8837_v8, %v8164_v6 }
 0x3e3   : > { %4170 = vmatpush.bf16.msra.mxu2 %v7429_v10  ;;  %v8834_v10 = vld [vmem:[%s12806_s12 + $0x4d4] sm:$0xf] }
 0x3e4   : > { %4159 = vmatmul.bf16.vlgmr.msra.gmra.mxu1 %v11339_v18  ;;  %v7940_v18 = vld [vmem:[%s12806_s12 + $0x310] sm:$0xf]  ;;  %v8169_v47 = vor.u32 %v8834_v10, %v8166_v45  ;;  %v8848_v10 = vld [vmem:[%s12806_s12 + $0x544] sm:$0xf] }
 0x3e5   : > { %v7941_v24 = vor.u32 %v8781_v23, %v7940_v18  ;;  %5343 = vmatpush.bf16.msrb.mxu1 %v8193_v63  ;;  %v8820_v23 = vld [vmem:[%s12806_s12 + $0x464] sm:$0xf] }
 0x3e6   : > { %5323 = vmatpush.bf16.msra.mxu3 %v7577_v13  ;;  %v8137_v13 = vor.u32 %v8830_v12, %v8136_v55  ;;  %v8222_v55 = vld [vmem:[%s12806_s12 + $0x55c] sm:$0xf0] }
 0x3e7   : > { %4171 = vmatpush.bf16.msra.mxu2 %v7413_v14  ;;  %5331 = vmatpush.bf16.msra.mxu0 %v7941_v24 }
 0x3e9   : > { %5344 = vmatpush.bf16.msrb.mxu1 %v8165_v9 }
 0x3ea   : > { %4172 = vmatmul.bf16.vlgmr.msra.gmra.mxu2 %v11341_v20  ;;  %5324 = vmatpush.bf16.msra.mxu3 %v7549_v21  ;;  %v7945_v20 = vor.u32 %v8778_v31, %v7942_v25  ;;  %v8108_v21 = vld [vmem:[%s12806_s12 + $0x460] sm:$0xf] }
 0x3eb   : > { %5332 = vmatpush.bf16.msra.mxu0 %v7913_v32  ;;  %v8110_v31 = vld [vmem:[%s12806_s12 + $0x47c] sm:$0xf0]  ;;  %v8813_v32 = vld [vmem:[%s12806_s12 + $0x42c] sm:$0xf]  ;;  %5363 = vmatpush.bf16.msrb.mxu2 %v8221_v62  ;;  %v8687_v62 = vld [vmem:[%s12806_s12 + $0x3c] sm:$0xf] }
 0x3ec   : > { %v8113_v24 = vor.u32 %v8820_v23, %v8110_v31  ;;  %v11850_v25 = vld [vmem:[%s12805_s11] sm:$0xf]  ;;  %v8085_v38 = vor.u32 %v8813_v32, %v8082_v33  ;;  %v8831_v31 = vld [vmem:[%s12806_s12 + $0x4b8] sm:$0xf0] }
 0x3ed   : > { %5345 = vmatpush.bf16.msrb.mxu1 %v8137_v13  ;;  %v3471_v37 = vperm.slane %v11850_v25, 0  ;;  %v8838_v13 = vld [vmem:[%s12806_s12 + $0x4f0] sm:$0xf0]  ;;  %v8144_v23 = vld [vmem:[%s12806_s12 + $0x4a0] sm:$0xf]  ;;  %v3473_v30 = vperm.slane %v11850_v25, 2 }
 0x3ee   : > { %5382 = vmatpush.bf16.msrb.mxu3 %v7973_v22  ;;  %v8823_v22 = vld [vmem:[%s12806_s12 + $0x478] sm:$0xf0]  ;;  %v8145_v33 = vor.u32 %v8831_v31, %v8144_v23  ;;  %v7752_v23 = vld [vmem:[%s12806_s12 + $0x190] sm:$0xf]  ;;  %v8733_v31 = vld [vmem:[%s12806_s12 + $0x1a8] sm:$0xf0] }
 0x3ef   : > { %5333 = vmatpush.bf16.msra.mxu0 %v7885_v40  ;;  %v8109_v18 = vor.u32 %v8823_v22, %v8108_v21  ;;  %v8809_v40 = vld [vmem:[%s12806_s12 + $0x408] sm:$0xf0]  ;;  %v3472_v22 = vperm.slane %v11850_v25, 1 }
 0x3f0   : > { %v8053_v57 = vor.u32 %v8809_v40, %v8052_v51  ;;  %v7662_v51 = vld [vmem:[%s12806_s12 + $0xfc] sm:$0xf0] }
 0x3f1   : > { %5346 = vmatpush.bf16.msrb.mxu1 %v8109_v18 }
 0x3f2   : > { %5383 = vmatpush.bf16.msrb.mxu3 %v7945_v20  ;;  %v8080_v20 = vld [vmem:[%s12806_s12 + $0x428] sm:$0xf] }
 0x3f3   : > { %5334 = vmatpush.bf16.msra.mxu0 %v7857_v48  ;;  %v8081_v27 = vor.u32 %v8816_v26, %v8080_v20  ;;  %v7690_v20 = vld [vmem:[%s12806_s12 + $0x134] sm:$0xf0] }
 0x3f5   : > { %5347 = vmatpush.bf16.msrb.mxu1 %v8081_v27 }
 0x3f6   : > { %5384 = vmatpush.bf16.msrb.mxu3 %v7917_v17 }
 0x3f7   : > { %5335 = vmatpush.bf16.msra.mxu0 %v7829_v52 }
 0x3f9   : > { %5348 = vmatpush.bf16.msrb.mxu1 %v8053_v57 }
 0x3fa   : > { %5385 = vmatpush.bf16.msrb.mxu3 %v7889_v28 }
 0x3fb   : > { %5336 = vmatpush.bf16.msra.mxu0 %v7801_v60  ;;  %v8845_v60 = vld [vmem:[%s12806_s12 + $0x528] sm:$0xf0] }
 0x3fc   : > { %v8201_v45 = vor.u32 %v8845_v60, %v8200_v59 }
 0x3fe   : > { %5386 = vmatpush.bf16.msrb.mxu3 %v7861_v49  ;;  %v8024_v49 = vld [vmem:[%s12806_s12 + $0x3b8] sm:$0xf] }
 0x3ff   : > { %5337 = vmatpush.bf16.msra.mxu0 %v7773_v3  ;;  %v8025_v50 = vor.u32 %v8802_v36, %v8024_v49  ;;  %v7746_v3 = vld [vmem:[%s12806_s12 + $0x1a4] sm:$0xf0] }
 0x400   : > { %v7749_v4 = vor.u32 %v8729_v2, %v7746_v3  ;;  %v7634_v49 = vld [vmem:[%s12806_s12 + $0xc4] sm:$0xf0] }
 0x401   : > { %5349 = vmatpush.bf16.msrb.mxu1 %v8025_v50  ;;  %v8817_v50 = vld [vmem:[%s12806_s12 + $0x448] sm:$0xf0] }
 0x402   : > { %5387 = vmatpush.bf16.msrb.mxu3 %v7833_v19  ;;  %v8026_v19 = vld [vmem:[%s12806_s12 + $0x3d4] sm:$0xf0]  ;;  %5369 = vmatpush.bf16.msra.mxu2 %v7749_v4 }
 0x403   : > { %5395 = vmatpush.bf16.msrb.mxu0 %v8197_v5  ;;  %v8029_v61 = vor.u32 %v8799_v54, %v8026_v19  ;;  %v7998_v5 = vld [vmem:[%s12806_s12 + $0x39c] sm:$0xf0]  ;;  %v8852_v54 = vld [vmem:[%s12806_s12 + $0x560] sm:$0xf0]  ;;  %v7578_v4 = vld [vmem:[%s12806_s12 + $0x54] sm:$0xf0] }
 0x406   : > { %5388 = vmatpush.bf16.msrb.mxu3 %v7805_v39  ;;  %v7996_v39 = vld [vmem:[%s12806_s12 + $0x380] sm:$0xf] }
 0x407   : > { %5396 = vmatpush.bf16.msrb.mxu0 %v8169_v47  ;;  %v7997_v42 = vor.u32 %v8795_v41, %v7996_v39  ;;  %v8172_v47 = vld [vmem:[%s12806_s12 + $0x4d8] sm:$0xf]  ;;  %v7606_v39 = vld [vmem:[%s12806_s12 + $0x8c] sm:$0xf0] }
 0x408   : > { %v8173_v18 = vor.u32 %v8838_v13, %v8172_v47  ;;  %v7550_v13 = vld [vmem:[%s12806_s12 + $0x1c] sm:$0xf0] }
 0x409   : > { %5350 = vmatpush.bf16.msrb.mxu1 %v7997_v42  ;;  %v8060_v42 = vld [vmem:[%s12806_s12 + $0x3f8] sm:$0xf] }
 0x40a   : > { %5389 = vmatpush.bf16.msrb.mxu3 %v7777_v53  ;;  %v8792_v53 = vld [vmem:[%s12806_s12 + $0x384] sm:$0xf] }
 0x40b   : > { %5397 = vmatpush.bf16.msrb.mxu0 %v8141_v11  ;;  %v8001_v9 = vor.u32 %v8792_v53, %v7998_v5  ;;  %v7721_v11 = vor.u32 %v8722_v15, %v7718_v16  ;;  %v8004_v16 = vld [vmem:[%s12806_s12 + $0x388] sm:$0xf] }
 0x40d   : > { %5370 = vmatpush.bf16.msra.mxu2 %v7721_v11 }
 0x40f   : > { %5398 = vmatpush.bf16.msrb.mxu0 %v8113_v24  ;;  %v8715_v24 = vld [vmem:[%s12806_s12 + $0x11c] sm:$0xf] }
 0x410   : > { %v7693_v27 = vor.u32 %v8715_v24, %v7690_v20  ;;  %v8730_v20 = vld [vmem:[%s12806_s12 + $0x194] sm:$0xf] }
 0x412   : > { %5371 = vmatpush.bf16.msra.mxu2 %v7693_v27 }
 0x413   : > { %5399 = vmatpush.bf16.msrb.mxu0 %v8085_v38  ;;  %v8708_v38 = vld [vmem:[%s12806_s12 + $0xe4] sm:$0xf] }
 0x417   : > { %5400 = vmatpush.bf16.msrb.mxu0 %v8057_v34  ;;  %v8701_v34 = vld [vmem:[%s12806_s12 + $0xac] sm:$0xf] }
 0x418   : > { %v7637_v19 = vor.u32 %v8701_v34, %v7634_v49  ;;  %v7732_v34 = vld [vmem:[%s12806_s12 + $0x160] sm:$0xf]  ;;  %v8727_v49 = vld [vmem:[%s12806_s12 + $0x178] sm:$0xf0] }
 0x41b   : > { %5401 = vmatpush.bf16.msrb.mxu0 %v8029_v61 }
 0x41f   : > { %5402 = vmatpush.bf16.msrb.mxu0 %v8001_v9  ;;  %v7581_v9 = vor.u32 %v8687_v62, %v7578_v4  ;;  %v8713_v62 = vld [vmem:[%s12806_s12 + $0x108] sm:$0xf0] }
 0x420   : > { %v4004_v14 = vpop.f32.mrf.mxu0 }
 0x421   : > { %v4017_v7 = vpop.f32.mrf.mxu1 }
 0x428   : > { %v4006_v29 = vpop.f32.mrf.mxu0 }
 0x429   : > { %v4019_v17 = vpop.f32.mrf.mxu1 }
 0x42a   : > { %v8116_v17 = vld [vmem:[%s12806_s12 + $0x468] sm:$0xf] }
 0x42c   : > { %v3991_v28 = vpop.f32.mrf.mxu3 }
 0x42d   : > { %v3992_v46 = vadd.f32 %v3991_v28, %v3471_v37  ;;  %v4030_v48 = vpop.f32.mrf.mxu2  ;;  %v8824_v37 = vld [vmem:[%s12806_s12 + $0x480] sm:$0xf0]  ;;  %v7665_v28 = vor.u32 %v8708_v38, %v7662_v51  ;;  %v7753_v38 = vor.u32 %v8733_v31, %v7752_v23  ;;  %v7614_v23 = vld [vmem:[%s12806_s12 + $0x94] sm:$0xf0]  ;;  %v7620_v31 = vld [vmem:[%s12806_s12 + $0x80] sm:$0xf] }
 0x42f   : > { %v4005_v35 = vadd.f32 %v4004_v14, %v3992_v46  ;;  %v8225_v14 = vor.u32 %v8848_v10, %v8222_v55  ;;  %v8117_v46 = vor.u32 %v8824_v37, %v8116_v17  ;;  %5372 = vmatpush.bf16.msra.mxu2 %v7665_v28  ;;  %v8680_v55 = vld [vmem:[%s12806_s12 + $0x4] sm:$0xf]  ;;  %v8734_v17 = vld [vmem:[%s12806_s12 + $0x1b0] sm:$0xf0] }
 0x430   : > { %v11883_v52 = vpop.f32.mrf.mxu0  ;;  %v7553_v11 = vor.u32 %v8680_v55, %v7550_v13  ;;  %v7648_v55 = vld [vmem:[%s12806_s12 + $0xb8] sm:$0xf] }
 0x431   : > { %v4018_v56 = vadd.f32 %v4017_v7, %v4005_v35  ;;  %v11891_v58 = vpop.f32.mrf.mxu1  ;;  %5415 = vmatpush.bf16.msra.mxu1 %v8225_v14 }
 0x433   : > { %v4031_v63 = vadd.f32 %v4030_v48, %v4018_v56  ;;  %v8088_v48 = vld [vmem:[%s12806_s12 + $0x430] sm:$0xf]  ;;  %5373 = vmatpush.bf16.msra.mxu2 %v7637_v19  ;;  %v8716_v19 = vld [vmem:[%s12806_s12 + $0x124] sm:$0xf] }
 0x434   : > { %v3993_v0 = vpop.f32.mrf.mxu3  ;;  %v8089_v60 = vor.u32 %v8817_v50, %v8088_v48  ;;  %v7726_v48 = vld [vmem:[%s12806_s12 + $0x174] sm:$0xf0]  ;;  %v8719_v50 = vld [vmem:[%s12806_s12 + $0x138] sm:$0xf0] }
 0x435   : > { %v4190_v6 = vmax.f32 %v4031_v63, 0.0  ;;  %v4032_v8 = vpop.f32.mrf.mxu2  ;;  %v8061_v0 = vor.u32 %v8810_v1, %v8060_v42 }
 0x436   : > { %v8803_v8 = vld [vmem:[%s12806_s12 + $0x3d8] sm:$0xf0] }
 0x437   : > { %v11932_v12 = vpack.c.bf16 %v4190_v6, %v4190_v6  ;;  %v8032_v6 = vld [vmem:[%s12806_s12 + $0x3c0] sm:$0xf] }
 0x438   : > { %v4071_v7 = vpop.f32.mrf.mxu0  ;;  %v8033_v47 = vor.u32 %v8803_v8, %v8032_v6  ;;  %v3474_v6 = vperm.slane %v11850_v25, 3  ;;  %v8706_v25 = vld [vmem:[%s12806_s12 + $0xd0] sm:$0xf0] }
 0x439   : > { %v4084_v21 = vpop.f32.mrf.mxu1  ;;  %5325 = vmatmul.bf16.vlgmr.msra.gmra.mxu3 %v11932_v12  ;;  %v8796_v7 = vld [vmem:[%s12806_s12 + $0x3a0] sm:$0xf0] }
 0x43a   : > { %5447 = vmatpush.bf16.msra.mxu3 %v8201_v45  ;;  %v8849_v21 = vld [vmem:[%s12806_s12 + $0x54c] sm:$0xf]  ;;  %v8005_v24 = vor.u32 %v8796_v7, %v8004_v16  ;;  %v7612_v16 = vld [vmem:[%s12806_s12 + $0x78] sm:$0xf]  ;;  %v8698_v7 = vld [vmem:[%s12806_s12 + $0x90] sm:$0xf0] }
 0x43c   : > { %v4056_v26 = vpop.f32.mrf.mxu3 }
 0x43d   : > { %v4043_v29 = vpop.f32.mrf.mxu2 }
 0x43e   : > { %v4044_v32 = vadd.f32 %v4043_v29, %v3472_v22  ;;  %5448 = vmatpush.bf16.msra.mxu3 %v8173_v18  ;;  %v8230_v22 = vld [vmem:[%s12806_s12 + $0x564] sm:$0xf0] }
 0x440   : > { %v4057_v40 = vadd.f32 %v4056_v26, %v4044_v32  ;;  %v4134_v57 = vpop.f32.mrf.mxu0  ;;  %v7754_v26 = vld [vmem:[%s12806_s12 + $0x1ac] sm:$0xf0]  ;;  %v8233_v32 = vor.u32 %v8849_v21, %v8230_v22  ;;  %v7649_v22 = vor.u32 %v8706_v25, %v7648_v55  ;;  %v7956_v55 = vld [vmem:[%s12806_s12 + $0x320] sm:$0xf]  ;;  %v8783_v25 = vld [vmem:[%s12806_s12 + $0x338] sm:$0xf0] }
 0x441   : > { %v4095_v43 = vpop.f32.mrf.mxu1  ;;  %v7757_v28 = vor.u32 %v8730_v20, %v7754_v26  ;;  %v7613_v20 = vor.u32 %v8698_v7, %v7612_v16  ;;  %v7958_v16 = vld [vmem:[%s12806_s12 + $0x33c] sm:$0xf0]  ;;  %v8772_v7 = vld [vmem:[%s12806_s12 + $0x2e4] sm:$0xf] }
 0x442   : > { %v4070_v44 = vadd.f32 %v11883_v52, %v4057_v40  ;;  %5449 = vmatpush.bf16.msra.mxu3 %v8145_v33  ;;  %v8228_v52 = vld [vmem:[%s12806_s12 + $0x548] sm:$0xf]  ;;  %v4096_v53 = vadd.f32 %v4095_v43, %v3473_v30  ;;  %v7760_v33 = vld [vmem:[%s12806_s12 + $0x198] sm:$0xf] }
 0x443   : > { %v8229_v61 = vor.u32 %v8852_v54, %v8228_v52  ;;  %v7724_v40 = vld [vmem:[%s12806_s12 + $0x158] sm:$0xf]  ;;  %v7761_v43 = vor.u32 %v8734_v17, %v7760_v33  ;;  %v7733_v54 = vor.u32 %v8727_v49, %v7732_v34  ;;  %v7668_v30 = vld [vmem:[%s12806_s12 + $0xe8] sm:$0xf]  ;;  %v8684_v49 = vld [vmem:[%s12806_s12 + $0x20] sm:$0xf0] }
 0x444   : > { %v4083_v36 = vadd.f32 %v11891_v58, %v4070_v44  ;;  %v4058_v35 = vpop.f32.mrf.mxu3  ;;  %v8694_v58 = vld [vmem:[%s12806_s12 + $0x74] sm:$0xf]  ;;  %v8723_v44 = vld [vmem:[%s12806_s12 + $0x15c] sm:$0xf]  ;;  %v7556_v34 = vld [vmem:[%s12806_s12 + $0x8] sm:$0xf] }
 0x445   : > { %v4045_v56 = vpop.f32.mrf.mxu2  ;;  %v7609_v2 = vor.u32 %v8694_v58, %v7606_v39  ;;  %v7696_v35 = vld [vmem:[%s12806_s12 + $0x120] sm:$0xf]  ;;  %v7729_v52 = vor.u32 %v8723_v44, %v7726_v48  ;;  %v7592_v44 = vld [vmem:[%s12806_s12 + $0x48] sm:$0xf] }
 0x446   : > { %v4191_v59 = vmax.f32 %v4083_v36, 0.0  ;;  %5450 = vmatpush.bf16.msra.mxu3 %v8117_v46  ;;  %v7697_v58 = vor.u32 %v8719_v50, %v7696_v35  ;;  %v8786_v35 = vld [vmem:[%s12806_s12 + $0x354] sm:$0xf]  ;;  %v7978_v50 = vld [vmem:[%s12806_s12 + $0x36c] sm:$0xf0] }
 0x447   : > { %5374 = vmatpush.bf16.msra.mxu2 %v7609_v2  ;;  %v8709_v2 = vld [vmem:[%s12806_s12 + $0xec] sm:$0xf] }
 0x448   : > { %v11995_v41 = vpack.c.bf16 %v4191_v59, %v4191_v59  ;;  %v4136_v63 = vpop.f32.mrf.mxu0  ;;  %v7698_v59 = vld [vmem:[%s12806_s12 + $0x13c] sm:$0xf0] }
 0x449   : > { %v4097_v3 = vpop.f32.mrf.mxu1  ;;  %v8712_v63 = vld [vmem:[%s12806_s12 + $0x100] sm:$0xf0]  ;;  %v7701_v42 = vor.u32 %v8716_v19, %v7698_v59  ;;  %v7948_v19 = vld [vmem:[%s12806_s12 + $0x318] sm:$0xf]  ;;  %v8681_v59 = vld [vmem:[%s12806_s12 + $0xc] sm:$0xf] }
 0x44a   : > { %5338 = vmatmul.bf16.vlgmr.msra.gmra.mxu0 %v11995_v41  ;;  %5390 = vmatmul.bf16.vlgmr.msrb.gmra.mxu3 %v11995_v41  ;;  %v7670_v3 = vld [vmem:[%s12806_s12 + $0x104] sm:$0xf0]  ;;  %v7669_v4 = vor.u32 %v8712_v63, %v7668_v30  ;;  %v7564_v30 = vld [vmem:[%s12806_s12 + $0x10] sm:$0xf]  ;;  %v8685_v63 = vld [vmem:[%s12806_s12 + $0x28] sm:$0xf0] }
 0x44b   : > { %5451 = vmatpush.bf16.msra.mxu3 %v8089_v60  ;;  %5467 = vmatpush.bf16.msra.mxu0 %v8229_v61  ;;  %v7704_v60 = vld [vmem:[%s12806_s12 + $0x128] sm:$0xf]  ;;  %v8720_v61 = vld [vmem:[%s12806_s12 + $0x140] sm:$0xf0]  ;;  %v7673_v8 = vor.u32 %v8709_v2, %v7670_v3  ;;  %v8790_v2 = vld [vmem:[%s12806_s12 + $0x370] sm:$0xf0] }
 0x44c   : > { %v4121_v5 = vpop.f32.mrf.mxu3  ;;  %5375 = vmatpush.bf16.msra.mxu2 %v7581_v9  ;;  %v7705_v1 = vor.u32 %v8720_v61, %v7704_v60  ;;  %v8787_v3 = vld [vmem:[%s12806_s12 + $0x35c] sm:$0xf] }
 0x44d   : > { %v4108_v10 = vpop.f32.mrf.mxu2 }
 0x44e   : > { %v4109_v45 = vadd.f32 %v4108_v10, %v4096_v53  ;;  %v7640_v53 = vld [vmem:[%s12806_s12 + $0xb0] sm:$0xf]  ;;  %v8702_v10 = vld [vmem:[%s12806_s12 + $0xb4] sm:$0xf] }
 0x44f   : > { %5452 = vmatpush.bf16.msra.mxu3 %v8061_v0  ;;  %v7676_v0 = vld [vmem:[%s12806_s12 + $0xf0] sm:$0xf] }
 0x450   : > { %v4122_v14 = vadd.f32 %v4121_v5, %v4109_v45  ;;  %v12024_v15 = vpop.f32.mrf.mxu0  ;;  %5376 = vmatpush.bf16.msra.mxu2 %v7553_v11  ;;  %v8705_v5 = vld [vmem:[%s12806_s12 + $0xc8] sm:$0xf0]  ;;  %v7677_v9 = vor.u32 %v8713_v62, %v7676_v0  ;;  %v7986_v62 = vld [vmem:[%s12806_s12 + $0x374] sm:$0xf0] }
 0x451   : > { %v7641_v13 = vor.u32 %v8705_v5, %v7640_v53  ;;  %v4148_v11 = vadd.f32 %v12024_v15, %v3474_v6  ;;  %v8699_v15 = vld [vmem:[%s12806_s12 + $0x98] sm:$0xf0]  ;;  %v7950_v53 = vld [vmem:[%s12806_s12 + $0x334] sm:$0xf0]  ;;  %v7920_v6 = vld [vmem:[%s12806_s12 + $0x2e0] sm:$0xf] }
 0x452   : > { %v4135_v18 = vadd.f32 %v4134_v57, %v4122_v14  ;;  %v8726_v57 = vld [vmem:[%s12806_s12 + $0x170] sm:$0xf0]  ;;  %v7621_v17 = vor.u32 %v8699_v15, %v7620_v31  ;;  %v7928_v15 = vld [vmem:[%s12806_s12 + $0x2e8] sm:$0xf] }
 0x453   : > { %5453 = vmatpush.bf16.msra.mxu3 %v8033_v47  ;;  %v7725_v36 = vor.u32 %v8726_v57, %v7724_v40  ;;  %v7642_v47 = vld [vmem:[%s12806_s12 + $0xcc] sm:$0xf0]  ;;  %v8789_v57 = vld [vmem:[%s12806_s12 + $0x368] sm:$0xf0] }
 0x454   : > { %v4192_v27 = vmax.f32 %v4135_v18, 0.0  ;;  %v4123_v29 = vpop.f32.mrf.mxu3  ;;  %v7645_v21 = vor.u32 %v8702_v10, %v7642_v47  ;;  %v8695_v18 = vld [vmem:[%s12806_s12 + $0x7c] sm:$0xf]  ;;  %v7976_v40 = vld [vmem:[%s12806_s12 + $0x350] sm:$0xf] }
 0x455   : > { %v4110_v37 = vpop.f32.mrf.mxu2  ;;  %v8691_v29 = vld [vmem:[%s12806_s12 + $0x58] sm:$0xf0]  ;;  %v7617_v33 = vor.u32 %v8695_v18, %v7614_v23  ;;  %v7957_v18 = vor.u32 %v8783_v25, %v7956_v55 }
 0x456   : > { %v12056_v51 = vpack.c.bf16 %v4192_v27, %v4192_v27  ;;  %v7584_v27 = vld [vmem:[%s12806_s12 + $0x40] sm:$0xf] }
 0x457   : > { %5454 = vmatpush.bf16.msra.mxu3 %v8005_v24 }
 0x458   : > { %5351 = vmatmul.bf16.vlgmr.msrb.gmra.mxu1 %v12056_v51  ;;  %v4149_v46 = vpop.f32.mrf.mxu0 }
 0x459   : > { %5421 = vmatpush.bf16.msrb.mxu1 %v7753_v38  ;;  %v7585_v38 = vor.u32 %v8691_v29, %v7584_v27  ;;  %v8692_v46 = vld [vmem:[%s12806_s12 + $0x60] sm:$0xf0]  ;;  %v7930_v27 = vld [vmem:[%s12806_s12 + $0x304] sm:$0xf0]  ;;  %v8765_v29 = vld [vmem:[%s12806_s12 + $0x2ac] sm:$0xf] }
 0x45a   : > { %5403 = vmatmul.bf16.vlgmr.msrb.gmra.mxu0 %v12056_v51  ;;  %5455 = vmatmul.bf16.vlgmr.msra.gmra.mxu3 %v12056_v51  ;;  %v7593_v61 = vor.u32 %v8692_v46, %v7592_v44  ;;  %v7902_v44 = vld [vmem:[%s12806_s12 + $0x2cc] sm:$0xf0]  ;;  %v8758_v46 = vld [vmem:[%s12806_s12 + $0x274] sm:$0xf] }
 0x45b   : > { %5519 = vmatpush.bf16.msrb.mxu3 %v8233_v32  ;;  %5473 = vmatpush.bf16.msrb.mxu0 %v7757_v28  ;;  %v8688_v28 = vld [vmem:[%s12806_s12 + $0x44] sm:$0xf] }
 0x45c   : > { %v4186_v56 = vpop.f32.mrf.mxu3 }
 0x45d   : > { %5422 = vmatpush.bf16.msrb.mxu1 %v7725_v36  ;;  %v7977_v36 = vor.u32 %v8789_v57, %v7976_v40  ;;  %v7900_v57 = vld [vmem:[%s12806_s12 + $0x2b0] sm:$0xf] }
 0x45f   : > { %5525 = vmatpush.bf16.msra.mxu3 %v7761_v43  ;;  %5474 = vmatpush.bf16.msrb.mxu0 %v7729_v52  ;;  %v7586_v43 = vld [vmem:[%s12806_s12 + $0x5c] sm:$0xf0] }
 0x461   : > { %v4160_v39 = vpop.f32.mrf.mxu1  ;;  %5423 = vmatpush.bf16.msrb.mxu1 %v7697_v58  ;;  %v7557_v58 = vor.u32 %v8684_v49, %v7556_v34 }
 0x462   : > { %v4161_v24 = vadd.f32 %v4160_v39, %v4148_v11  ;;  %v7558_v39 = vld [vmem:[%s12806_s12 + $0x24] sm:$0xf0]  ;;  %v7922_v11 = vld [vmem:[%s12806_s12 + $0x2fc] sm:$0xf0] }
 0x463   : > { %5526 = vmatpush.bf16.msra.mxu3 %v7733_v54  ;;  %5475 = vmatpush.bf16.msrb.mxu0 %v7701_v42  ;;  %v7589_v54 = vor.u32 %v8688_v28, %v7586_v43  ;;  %v7981_v42 = vor.u32 %v8786_v35, %v7978_v50  ;;  %v7561_v5 = vor.u32 %v8681_v59, %v7558_v39  ;;  %v8769_v28 = vld [vmem:[%s12806_s12 + $0x2c8] sm:$0xf0]  ;;  %v8766_v43 = vld [vmem:[%s12806_s12 + $0x2b4] sm:$0xf]  ;;  %v8759_v59 = vld [vmem:[%s12806_s12 + $0x27c] sm:$0xf] }
 0x464   : > { %v4188_v45 = vpop.f32.mrf.mxu3  ;;  %v7925_v31 = vor.u32 %v8772_v7, %v7922_v11  ;;  %v7901_v49 = vor.u32 %v8769_v28, %v7900_v57  ;;  %v8754_v35 = vld [vmem:[%s12806_s12 + $0x250] sm:$0xf0]  ;;  %v7905_v50 = vor.u32 %v8766_v43, %v7902_v44  ;;  %v7818_v7 = vld [vmem:[%s12806_s12 + $0x224] sm:$0xf0]  ;;  %v8737_v11 = vld [vmem:[%s12806_s12 + $0x1cc] sm:$0xf] }
 0x465   : > { %5424 = vmatpush.bf16.msrb.mxu1 %v7669_v4  ;;  %v8779_v4 = vld [vmem:[%s12806_s12 + $0x31c] sm:$0xf]  ;;  %v7989_v45 = vor.u32 %v8787_v3, %v7986_v62  ;;  %v7844_v3 = vld [vmem:[%s12806_s12 + $0x240] sm:$0xf]  ;;  %v8752_v62 = vld [vmem:[%s12806_s12 + $0x244] sm:$0xf] }
 0x466   : > { %v7953_v47 = vor.u32 %v8779_v4, %v7950_v53  ;;  %v7846_v4 = vld [vmem:[%s12806_s12 + $0x25c] sm:$0xf0]  ;;  %v8744_v53 = vld [vmem:[%s12806_s12 + $0x204] sm:$0xf]  ;;  %v8847_v28 = vld [vmem:[%s12806_s12 + $0x538] sm:$0xf0] }
 0x467   : > { %5527 = vmatpush.bf16.msra.mxu3 %v7705_v1  ;;  %5476 = vmatpush.bf16.msrb.mxu0 %v7673_v8  ;;  %v7984_v1 = vld [vmem:[%s12806_s12 + $0x358] sm:$0xf]  ;;  %v8775_v8 = vld [vmem:[%s12806_s12 + $0x2f8] sm:$0xf0]  ;;  %v7849_v55 = vor.u32 %v8752_v62, %v7846_v4  ;;  %v8216_v57 = vld [vmem:[%s12806_s12 + $0x520] sm:$0xf] }
 0x468   : > { %v7985_v10 = vor.u32 %v8790_v2, %v7984_v1  ;;  %v8160_v62 = vld [vmem:[%s12806_s12 + $0x4b0] sm:$0xf]  ;;  %v8833_v4 = vld [vmem:[%s12806_s12 + $0x4c8] sm:$0xf0] }
 0x469   : > { %v4162_v14 = vpop.f32.mrf.mxu1  ;;  %5425 = vmatpush.bf16.msrb.mxu1 %v7641_v13  ;;  %v8780_v13 = vld [vmem:[%s12806_s12 + $0x324] sm:$0xf] }
 0x46a   : > { %v7921_v14 = vor.u32 %v8775_v8, %v7920_v6  ;;  %v7961_v23 = vor.u32 %v8780_v13, %v7958_v16  ;;  %v7780_v8 = vld [vmem:[%s12806_s12 + $0x1c8] sm:$0xf]  ;;  %v8745_v16 = vld [vmem:[%s12806_s12 + $0x20c] sm:$0xf] }
 0x46b   : > { %5528 = vmatpush.bf16.msra.mxu3 %v7677_v9  ;;  %5477 = vmatpush.bf16.msrb.mxu0 %v7645_v21  ;;  %v7565_v9 = vor.u32 %v8685_v63, %v7564_v30  ;;  %v7892_v21 = vld [vmem:[%s12806_s12 + $0x2a8] sm:$0xf]  ;;  %v7808_v63 = vld [vmem:[%s12806_s12 + $0x200] sm:$0xf] }
 0x46c   : > { %v7816_v13 = vld [vmem:[%s12806_s12 + $0x208] sm:$0xf] }
 0x46d   : > { %v4173_v26 = vpop.f32.mrf.mxu2  ;;  %5426 = vmatpush.bf16.msrb.mxu1 %v7613_v20  ;;  %v8773_v20 = vld [vmem:[%s12806_s12 + $0x2ec] sm:$0xf] }
 0x46e   : > { %v4174_v32 = vadd.f32 %v4173_v26, %v4161_v24  ;;  %v8776_v24 = vld [vmem:[%s12806_s12 + $0x300] sm:$0xf0] }
 0x46f   : > { %5529 = vmatpush.bf16.msra.mxu3 %v7649_v22  ;;  %5478 = vmatpush.bf16.msrb.mxu0 %v7617_v33  ;;  %v8768_v22 = vld [vmem:[%s12806_s12 + $0x2c0] sm:$0xf0]  ;;  %v7929_v33 = vor.u32 %v8776_v24, %v7928_v15  ;;  %v8835_v24 = vld [vmem:[%s12806_s12 + $0x4dc] sm:$0xf] }
 0x470   : > { %v4187_v37 = vadd.f32 %v4186_v56, %v4174_v32  ;;  %v8782_v56 = vld [vmem:[%s12806_s12 + $0x330] sm:$0xf0]  ;;  %v7893_v26 = vor.u32 %v8768_v22, %v7892_v21  ;;  %v7894_v32 = vld [vmem:[%s12806_s12 + $0x2c4] sm:$0xf0] }
 0x471   : > { %5427 = vmatpush.bf16.msrb.mxu1 %v7585_v38  ;;  %v7949_v0 = vor.u32 %v8782_v56, %v7948_v19  ;;  %v7933_v38 = vor.u32 %v8773_v20, %v7930_v27  ;;  %v7897_v40 = vor.u32 %v8765_v29, %v7894_v32  ;;  %v7872_v19 = vld [vmem:[%s12806_s12 + $0x278] sm:$0xf]  ;;  %v8762_v56 = vld [vmem:[%s12806_s12 + $0x290] sm:$0xf0]  ;;  %v7782_v21 = vld [vmem:[%s12806_s12 + $0x1e4] sm:$0xf0]  ;;  %v7821_v20 = vor.u32 %v8745_v16, %v7818_v7 }
 0x472   : > { %v4193_v48 = vmax.f32 %v4187_v37, 0.0  ;;  %v8761_v37 = vld [vmem:[%s12806_s12 + $0x288] sm:$0xf0]  ;;  %v7873_v30 = vor.u32 %v8762_v56, %v7872_v19  ;;  %v8174_v27 = vld [vmem:[%s12806_s12 + $0x4f4] sm:$0xf0] }
 0x473   : > { %5530 = vmatpush.bf16.msra.mxu3 %v7621_v17  ;;  %5479 = vmatpush.bf16.msrb.mxu0 %v7589_v54  ;;  %v7864_v17 = vld [vmem:[%s12806_s12 + $0x270] sm:$0xf]  ;;  %v8741_v32 = vld [vmem:[%s12806_s12 + $0x1e8] sm:$0xf0]  ;;  %v8177_v43 = vor.u32 %v8835_v24, %v8174_v27  ;;  %v8182_v56 = vld [vmem:[%s12806_s12 + $0x4fc] sm:$0xf0] }
 0x474   : > { %v12189_v52 = vpack.c.bf16 %v4193_v48, %v4193_v48  ;;  %v7866_v48 = vld [vmem:[%s12806_s12 + $0x28c] sm:$0xf0]  ;;  %v7865_v34 = vor.u32 %v8761_v37, %v7864_v17  ;;  %v8738_v17 = vld [vmem:[%s12806_s12 + $0x1d4] sm:$0xf]  ;;  %v8096_v7 = vld [vmem:[%s12806_s12 + $0x438] sm:$0xf] }
 0x475   : > { %v4175_v60 = vpop.f32.mrf.mxu2  ;;  %5428 = vmatpush.bf16.msrb.mxu1 %v7557_v58  ;;  %v7869_v54 = vor.u32 %v8758_v46, %v7866_v48  ;;  %v7838_v58 = vld [vmem:[%s12806_s12 + $0x254] sm:$0xf0]  ;;  %v7788_v29 = vld [vmem:[%s12806_s12 + $0x1d0] sm:$0xf]  ;;  %v8180_v46 = vld [vmem:[%s12806_s12 + $0x4e0] sm:$0xf] }
 0x476   : > { %8246 = vmatmul.msk.bf16.vlgmr.msrb.gmra.mxu2 %vm1761_vm0, %v12189_v52  ;;  %8247 = vmatmul.msk.bf16.vlgmr.msra.gmra.mxu1 %vm1761_vm0, %v12189_v52  ;;  %v7874_v60 = vld [vmem:[%s12806_s12 + $0x294] sm:$0xf0]  ;;  %v7790_v37 = vld [vmem:[%s12806_s12 + $0x1ec] sm:$0xf0]  ;;  %v7789_v44 = vor.u32 %v8741_v32, %v7788_v29  ;;  %v8839_v48 = vld [vmem:[%s12806_s12 + $0x4f8] sm:$0xf0] }
 0x477   : > { %5434 = vmatpush.bf16.msrb.mxu2 %v7977_v36  ;;  %8248 = vmatmul.msk.bf16.vlgmr.msra.gmra.mxu0 %vm1761_vm0, %v12189_v52  ;;  %v7836_v36 = vld [vmem:[%s12806_s12 + $0x238] sm:$0xf]  ;;  %v7877_v1 = vor.u32 %v8759_v59, %v7874_v60  ;;  %v8181_v19 = vor.u32 %v8839_v48, %v8180_v46  ;;  %v8188_v59 = vld [vmem:[%s12806_s12 + $0x4e8] sm:$0xf]  ;;  %v8840_v60 = vld [vmem:[%s12806_s12 + $0x500] sm:$0xf0] }
 0x478   : > { %8249 = vmatmul.msk.bf16.vlgmr.msrb.gmra.mxu3 %vm1761_vm0, %v12189_v52  ;;  %5480 = vmatpush.bf16.msrb.mxu0 %v7561_v5  ;;  %v7837_v39 = vor.u32 %v8754_v35, %v7836_v36  ;;  %v7810_v5 = vld [vmem:[%s12806_s12 + $0x21c] sm:$0xf0]  ;;  %v8098_v24 = vld [vmem:[%s12806_s12 + $0x454] sm:$0xf0]  ;;  %v8811_v32 = vld [vmem:[%s12806_s12 + $0x418] sm:$0xf0] }
 0x479   : > { %5531 = vmatpush.bf16.msra.mxu3 %v7593_v61  ;;  %5486 = vmatpush.bf16.msra.mxu1 %v7981_v42  ;;  %v8751_v61 = vld [vmem:[%s12806_s12 + $0x23c] sm:$0xf]  ;;  %v7813_v25 = vor.u32 %v8744_v53, %v7810_v5  ;;  %v8146_v36 = vld [vmem:[%s12806_s12 + $0x4bc] sm:$0xf0]  ;;  %v8124_v5 = vld [vmem:[%s12806_s12 + $0x470] sm:$0xf] }
 0x47a   : > { %v8747_v42 = vld [vmem:[%s12806_s12 + $0x218] sm:$0xf0]  ;;  %v7841_v2 = vor.u32 %v8751_v61, %v7838_v58  ;;  %v8152_v58 = vld [vmem:[%s12806_s12 + $0x4a8] sm:$0xf]  ;;  %v8068_v29 = vld [vmem:[%s12806_s12 + $0x400] sm:$0xf] }
 0x47b   : > { %5435 = vmatpush.bf16.msrb.mxu2 %v7949_v0  ;;  %v8755_v0 = vld [vmem:[%s12806_s12 + $0x258] sm:$0xf0]  ;;  %v7809_v6 = vor.u32 %v8747_v42, %v7808_v63  ;;  %v8118_v63 = vld [vmem:[%s12806_s12 + $0x484] sm:$0xf0] }
 0x47c   : > { %5538 = vmatpush.bf16.msra.mxu0 %v7985_v10  ;;  %v8740_v10 = vld [vmem:[%s12806_s12 + $0x1e0] sm:$0xf0]  ;;  %v8040_v48 = vld [vmem:[%s12806_s12 + $0x3c8] sm:$0xf] }
 0x47d   : > { %5532 = vmatpush.bf16.msra.mxu3 %v7565_v9  ;;  %5487 = vmatpush.bf16.msra.mxu1 %v7953_v47  ;;  %v7845_v9 = vor.u32 %v8755_v0, %v7844_v3  ;;  %v8202_v47 = vld [vmem:[%s12806_s12 + $0x52c] sm:$0xf0]  ;;  %v7781_v22 = vor.u32 %v8740_v10, %v7780_v8  ;;  %v8154_v0 = vld [vmem:[%s12806_s12 + $0x4c4] sm:$0xf0]  ;;  %v8814_v8 = vld [vmem:[%s12806_s12 + $0x434] sm:$0xf] }
 0x47f   : > { %5436 = vmatpush.bf16.msrb.mxu2 %v7921_v14  ;;  %v8748_v14 = vld [vmem:[%s12806_s12 + $0x220] sm:$0xf0] }
 0x480   : > { %5539 = vmatpush.bf16.msra.mxu0 %v7957_v18  ;;  %v8208_v18 = vld [vmem:[%s12806_s12 + $0x518] sm:$0xf]  ;;  %v7817_v15 = vor.u32 %v8748_v14, %v7816_v13  ;;  %v8826_v14 = vld [vmem:[%s12806_s12 + $0x490] sm:$0xf0] }
 0x481   : > { %5590 = vmatpush.bf16.msrb.mxu3 %v7989_v45  ;;  %5488 = vmatpush.bf16.msra.mxu1 %v7925_v31  ;;  %v8842_v45 = vld [vmem:[%s12806_s12 + $0x514] sm:$0xf]  ;;  %v8132_v13 = vld [vmem:[%s12806_s12 + $0x478] sm:$0xf] }
 0x482   : > { %v8205_v31 = vor.u32 %v8842_v45, %v8202_v47  ;;  %v8161_v45 = vor.u32 %v8833_v4, %v8160_v62  ;;  %v8822_v47 = vld [vmem:[%s12806_s12 + $0x474] sm:$0xf] }
 0x483   : > { %5437 = vmatpush.bf16.msrb.mxu2 %v7893_v26  ;;  %v7785_v26 = vor.u32 %v8737_v11, %v7782_v21  ;;  %v8818_v11 = vld [vmem:[%s12806_s12 + $0x450] sm:$0xf0]  ;;  %v8807_v21 = vld [vmem:[%s12806_s12 + $0x3fc] sm:$0xf] }
 0x484   : > { %5540 = vmatpush.bf16.msra.mxu0 %v7929_v33 }
 0x485   : > { %5591 = vmatpush.bf16.msrb.mxu3 %v7961_v23  ;;  %5489 = vmatpush.bf16.msra.mxu1 %v7897_v40  ;;  %v8846_v23 = vld [vmem:[%s12806_s12 + $0x530] sm:$0xf0]  ;;  %v8210_v40 = vld [vmem:[%s12806_s12 + $0x534] sm:$0xf0] }
 0x486   : > { %5377 = vmatmul.bf16.vlgmr.msra.gmra.mxu2 %v11932_v12  ;;  %5429 = vmatmul.bf16.vlgmr.msrb.gmra.mxu1 %v11932_v12  ;;  %v8209_v33 = vor.u32 %v8846_v23, %v8208_v18  ;;  %v8133_v23 = vor.u32 %v8826_v14, %v8132_v13  ;;  %v8735_v13 = vld [vmem:[%s12806_s12 + $0x1b8] sm:$0xf0]  ;;  %v8724_v14 = vld [vmem:[%s12806_s12 + $0x164] sm:$0xf] }
 0x487   : > { %5438 = vmatpush.bf16.msrb.mxu2 %v7865_v34  ;;  %5481 = vmatmul.bf16.vlgmr.msrb.gmra.mxu0 %v11932_v12  ;;  %v7793_v34 = vor.u32 %v8738_v17, %v7790_v37  ;;  %v8034_v17 = vld [vmem:[%s12806_s12 + $0x3dc] sm:$0xf0] }
 0x488   : > { %5533 = vmatmul.bf16.vlgmr.msra.gmra.mxu3 %v11932_v12  ;;  %5541 = vmatpush.bf16.msra.mxu0 %v7901_v49  ;;  %v8828_v49 = vld [vmem:[%s12806_s12 + $0x4a4] sm:$0xf] }
 0x489   : > { %5592 = vmatpush.bf16.msrb.mxu3 %v7933_v38  ;;  %5490 = vmatpush.bf16.msra.mxu1 %v7869_v54  ;;  %v8843_v38 = vld [vmem:[%s12806_s12 + $0x51c] sm:$0xf]  ;;  %v8836_v54 = vld [vmem:[%s12806_s12 + $0x4e4] sm:$0xf]  ;;  %v8149_v61 = vor.u32 %v8828_v49, %v8146_v36  ;;  %v8793_v49 = vld [vmem:[%s12806_s12 + $0x38c] sm:$0xf] }
 0x48a   : > { %v8213_v35 = vor.u32 %v8843_v38, %v8210_v40  ;;  %v8185_v42 = vor.u32 %v8836_v54, %v8182_v56  ;;  %v8808_v40 = vld [vmem:[%s12806_s12 + $0x404] sm:$0xf]  ;;  %v8006_v36 = vld [vmem:[%s12806_s12 + $0x3a4] sm:$0xf0]  ;;  %v8801_v54 = vld [vmem:[%s12806_s12 + $0x3cc] sm:$0xf] }
 0x48b   : > { %5439 = vmatpush.bf16.msrb.mxu2 %v7837_v39  ;;  %v8832_v39 = vld [vmem:[%s12806_s12 + $0x4c0] sm:$0xf0]  ;;  %v8853_v56 = vld [vmem:[%s12806_s12 + $0x568] sm:$0xf0] }
 0x48c   : > { %5542 = vmatpush.bf16.msra.mxu0 %v7873_v30  ;;  %v8821_v30 = vld [vmem:[%s12806_s12 + $0x46c] sm:$0xf]  ;;  %v8153_v3 = vor.u32 %v8832_v39, %v8152_v58  ;;  %v8009_v39 = vor.u32 %v8793_v49, %v8006_v36  ;;  %v8696_v49 = vld [vmem:[%s12806_s12 + $0x84] sm:$0xf]  ;;  %v7622_v36 = vld [vmem:[%s12806_s12 + $0x9c] sm:$0xf0] }
 0x48d   : > { %5593 = vmatpush.bf16.msrb.mxu3 %v7905_v50  ;;  %5491 = vmatpush.bf16.msra.mxu1 %v7841_v2  ;;  %v8217_v50 = vor.u32 %v8847_v28, %v8216_v57  ;;  %v8829_v2 = vld [vmem:[%s12806_s12 + $0x4ac] sm:$0xf]  ;;  %v8121_v53 = vor.u32 %v8821_v30, %v8118_v63  ;;  %v8069_v57 = vor.u32 %v8811_v32, %v8068_v29  ;;  %v8070_v28 = vld [vmem:[%s12806_s12 + $0x41c] sm:$0xf0]  ;;  %v8012_v30 = vld [vmem:[%s12806_s12 + $0x390] sm:$0xf] }
 0x48e   : > { %v8157_v10 = vor.u32 %v8829_v2, %v8154_v0  ;;  %v8805_v58 = vld [vmem:[%s12806_s12 + $0x3e8] sm:$0xf0]  ;;  %v7762_v2 = vld [vmem:[%s12806_s12 + $0x1b4] sm:$0xf0]  ;;  %v8238_v0 = vld [vmem:[%s12806_s12 + $0x56c] sm:$0xf0] }
 0x48f   : > { %5440 = vmatpush.bf16.msrb.mxu2 %v7809_v6  ;;  %v8825_v6 = vld [vmem:[%s12806_s12 + $0x488] sm:$0xf0]  ;;  %v8710_v32 = vld [vmem:[%s12806_s12 + $0xf4] sm:$0xf] }
 0x490   : > { %5543 = vmatpush.bf16.msra.mxu0 %v7845_v9  ;;  %v8090_v9 = vld [vmem:[%s12806_s12 + $0x44c] sm:$0xf0]  ;;  %v8797_v63 = vld [vmem:[%s12806_s12 + $0x3a8] sm:$0xf0] }
 0x491   : > { %5594 = vmatpush.bf16.msrb.mxu3 %v7877_v1  ;;  %5492 = vmatpush.bf16.msra.mxu1 %v7813_v25  ;;  %v8189_v1 = vor.u32 %v8840_v60, %v8188_v59  ;;  %v8126_v25 = vld [vmem:[%s12806_s12 + $0x48c] sm:$0xf0]  ;;  %v8093_v16 = vor.u32 %v8814_v8, %v8090_v9  ;;  %v8042_v60 = vld [vmem:[%s12806_s12 + $0x3e4] sm:$0xf0]  ;;  %v8020_v8 = vld [vmem:[%s12806_s12 + $0x398] sm:$0xf] }
 0x492   : > { %v8129_v18 = vor.u32 %v8822_v47, %v8126_v25  ;;  %v8045_v62 = vor.u32 %v8801_v54, %v8042_v60  ;;  %v8798_v9 = vld [vmem:[%s12806_s12 + $0x3b0] sm:$0xf0]  ;;  %v7768_v47 = vld [vmem:[%s12806_s12 + $0x1a0] sm:$0xf]  ;;  %v8721_v29 = vld [vmem:[%s12806_s12 + $0x148] sm:$0xf0]  ;;  %v7625_v54 = vor.u32 %v8696_v49, %v7622_v36 }
 0x493   : > { %5441 = vmatpush.bf16.msrb.mxu2 %v7781_v22  ;;  %v8062_v22 = vld [vmem:[%s12806_s12 + $0x414] sm:$0xf0]  ;;  %v8854_v25 = vld [vmem:[%s12806_s12 + $0x570] sm:$0xf0]  ;;  %v7594_v60 = vld [vmem:[%s12806_s12 + $0x64] sm:$0xf0] }
 0x494   : > { %5544 = vmatpush.bf16.msra.mxu0 %v7817_v15  ;;  %v8097_v15 = vor.u32 %v8818_v11, %v8096_v7  ;;  %v8065_v27 = vor.u32 %v8807_v21, %v8062_v22  ;;  %v8021_v11 = vor.u32 %v8798_v9, %v8020_v8  ;;  %v7769_v22 = vor.u32 %v8735_v13, %v7768_v47  ;;  %v8686_v8 = vld [vmem:[%s12806_s12 + $0x30] sm:$0xf0]  ;;  %v7964_v9 = vld [vmem:[%s12806_s12 + $0x328] sm:$0xf]  ;;  %v7936_v13 = vld [vmem:[%s12806_s12 + $0x2f0] sm:$0xf] }
 0x495   : > { %5595 = vmatpush.bf16.msrb.mxu3 %v7849_v55  ;;  %5493 = vmatpush.bf16.msra.mxu1 %v7785_v26  ;;  %v8125_v55 = vor.u32 %v8825_v6, %v8124_v5  ;;  %v8819_v26 = vld [vmem:[%s12806_s12 + $0x458] sm:$0xf0]  ;;  %v8013_v5 = vor.u32 %v8797_v63, %v8012_v30  ;;  %v8014_v6 = vld [vmem:[%s12806_s12 + $0x3ac] sm:$0xf0] }
 0x496   : > { %5442 = vmatmul.bf16.vlgmr.msrb.gmra.mxu2 %v11995_v41  ;;  %v7600_v63 = vld [vmem:[%s12806_s12 + $0x50] sm:$0xf] }
 0x497   : > { %5499 = vmatpush.bf16.msra.mxu2 %v8205_v31  ;;  %v8815_v31 = vld [vmem:[%s12806_s12 + $0x43c] sm:$0xf] }
 0x498   : > { %5545 = vmatpush.bf16.msra.mxu0 %v7789_v44  ;;  %5494 = vmatmul.bf16.vlgmr.msra.gmra.mxu1 %v11995_v41  ;;  %v8101_v37 = vor.u32 %v8815_v31, %v8098_v24  ;;  %v8812_v44 = vld [vmem:[%s12806_s12 + $0x420] sm:$0xf0]  ;;  %v7706_v24 = vld [vmem:[%s12806_s12 + $0x144] sm:$0xf0] }
 0x499   : > { %5596 = vmatpush.bf16.msrb.mxu3 %v7821_v20  ;;  %5551 = vmatpush.bf16.msrb.mxu1 %v8209_v33  ;;  %v8104_v20 = vld [vmem:[%s12806_s12 + $0x440] sm:$0xf]  ;;  %v8800_v33 = vld [vmem:[%s12806_s12 + $0x3c4] sm:$0xf] }
 0x49a   : > { %v8105_v38 = vor.u32 %v8819_v26, %v8104_v20  ;;  %v8037_v46 = vor.u32 %v8800_v33, %v8034_v17  ;;  %v8728_v31 = vld [vmem:[%s12806_s12 + $0x180] sm:$0xf0]  ;;  %v7678_v33 = vld [vmem:[%s12806_s12 + $0x10c] sm:$0xf0] }
 0x49b   : > { %5500 = vmatpush.bf16.msra.mxu2 %v8177_v43  ;;  %5546 = vmatmul.bf16.vlgmr.msra.gmra.mxu0 %v11995_v41  ;;  %v8076_v43 = vld [vmem:[%s12806_s12 + $0x408] sm:$0xf] }
 0x49c   : > { %5603 = vmatpush.bf16.msrb.mxu0 %v8213_v35  ;;  %v8073_v35 = vor.u32 %v8808_v40, %v8070_v28  ;;  %v8703_v40 = vld [vmem:[%s12806_s12 + $0xbc] sm:$0xf] }
 0x49d   : > { %5597 = vmatpush.bf16.msrb.mxu3 %v7793_v34  ;;  %5552 = vmatpush.bf16.msrb.mxu1 %v8181_v19  ;;  %v8804_v34 = vld [vmem:[%s12806_s12 + $0x3e0] sm:$0xf0]  ;;  %v8236_v19 = vld [vmem:[%s12806_s12 + $0x550] sm:$0xf] }
 0x49e   : > { %v8041_v59 = vor.u32 %v8804_v34, %v8040_v48  ;;  %v7656_v48 = vld [vmem:[%s12806_s12 + $0xc0] sm:$0xf]  ;;  %v8707_v34 = vld [vmem:[%s12806_s12 + $0xd8] sm:$0xf0] }
 0x49f   : > { %5501 = vmatpush.bf16.msra.mxu2 %v8149_v61  ;;  %v8048_v61 = vld [vmem:[%s12806_s12 + $0x3d0] sm:$0xf] }
 0x4a0   : > { %5598 = vmatmul.bf16.vlgmr.msrb.gmra.mxu3 %v11995_v41  ;;  %5604 = vmatpush.bf16.msrb.mxu0 %v8185_v42  ;;  %v8731_v42 = vld [vmem:[%s12806_s12 + $0x19c] sm:$0xf]  ;;  %v8049_v4 = vor.u32 %v8805_v58, %v8048_v61 }
 0x4a1   : > { %5655 = vmatpush.bf16.msra.mxu3 %v8217_v50  ;;  %5553 = vmatpush.bf16.msrb.mxu1 %v8153_v3  ;;  %v8077_v50 = vor.u32 %v8812_v44, %v8076_v43  ;;  %v8850_v3 = vld [vmem:[%s12806_s12 + $0x554] sm:$0xf]  ;;  %v12670_v43 = vld [vmem:[%s12807_s13] sm:$0x7f] }
 0x4a3   : > { %5502 = vmatpush.bf16.msra.mxu2 %v8121_v53  ;;  %v8794_v53 = vld [vmem:[%s12806_s12 + $0x394] sm:$0xf] }
 0x4a4   : > { %5605 = vmatpush.bf16.msrb.mxu0 %v8157_v10  ;;  %v7765_v10 = vor.u32 %v8731_v42, %v7762_v2  ;;  %v8017_v7 = vor.u32 %v8794_v53, %v8014_v6  ;;  %v8682_v2 = vld [vmem:[%s12806_s12 + $0x14] sm:$0xf]  ;;  %v7572_v6 = vld [vmem:[%s12806_s12 + $0x18] sm:$0xf] }
 0x4a5   : > { %5656 = vmatpush.bf16.msra.mxu3 %v8189_v1  ;;  %5554 = vmatpush.bf16.msrb.mxu1 %v8125_v55  ;;  %v8237_v1 = vor.u32 %v8853_v56, %v8236_v19  ;;  %v8244_v55 = vld [vmem:[%s12806_s12 + $0x558] sm:$0xf]  ;;  %v7628_v19 = vld [vmem:[%s12806_s12 + $0x88] sm:$0xf]  ;;  %v8700_v56 = vld [vmem:[%s12806_s12 + $0xa0] sm:$0xf0]  ;;  %v7573_v47 = vor.u32 %v8686_v8, %v7572_v6 }
 0x4a6   : > { %v8245_v21 = vor.u32 %v8854_v25, %v8244_v55 }
 0x4a7   : > { %5503 = vmatpush.bf16.msra.mxu2 %v8093_v16  ;;  %v7734_v16 = vld [vmem:[%s12806_s12 + $0x17c] sm:$0xf0] }
 0x4a8   : > { %5606 = vmatpush.bf16.msrb.mxu0 %v8129_v18  ;;  %v7737_v18 = vor.u32 %v8724_v14, %v7734_v16  ;;  %v8777_v14 = vld [vmem:[%s12806_s12 + $0x308] sm:$0xf0] }
 0x4a9   : > { %5657 = vmatpush.bf16.msra.mxu3 %v8161_v45  ;;  %5555 = vmatpush.bf16.msrb.mxu1 %v8097_v15  ;;  %v8241_v45 = vor.u32 %v8850_v3, %v8238_v0  ;;  %v8717_v15 = vld [vmem:[%s12806_s12 + $0x12c] sm:$0xf]  ;;  %v7566_v3 = vld [vmem:[%s12806_s12 + $0x2c] sm:$0xf0]  ;;  %v7937_v16 = vor.u32 %v8777_v14, %v7936_v13 }
 0x4aa   : > { %v7709_v26 = vor.u32 %v8717_v15, %v7706_v24  ;;  %v7569_v53 = vor.u32 %v8682_v2, %v7566_v3  ;;  %v8763_v15 = vld [vmem:[%s12806_s12 + $0x298] sm:$0xf0]  ;;  %v4404_v3 = vperm.slane %v12670_v43, 4 }
 0x4ab   : > { %5504 = vmatpush.bf16.msra.mxu2 %v8065_v27  ;;  %v7712_v27 = vld [vmem:[%s12806_s12 + $0x130] sm:$0xf] }
 0x4ac   : > { %5607 = vmatpush.bf16.msrb.mxu0 %v8101_v37  ;;  %v7713_v17 = vor.u32 %v8721_v29, %v7712_v27  ;;  %v7681_v37 = vor.u32 %v8710_v32, %v7678_v33  ;;  %v7824_v33 = vld [vmem:[%s12806_s12 + $0x210] sm:$0xf] }
 0x4ad   : > { %5658 = vmatpush.bf16.msra.mxu3 %v8133_v23  ;;  %5556 = vmatpush.bf16.msrb.mxu1 %v8069_v57  ;;  %v7740_v23 = vld [vmem:[%s12806_s12 + $0x168] sm:$0xf]  ;;  %v7650_v57 = vld [vmem:[%s12806_s12 + $0xd4] sm:$0xf0] }
 0x4ae   : > { %v7741_v20 = vor.u32 %v8728_v31, %v7740_v23  ;;  %v7880_v31 = vld [vmem:[%s12806_s12 + $0x280] sm:$0xf] }
 0x4af   : > { %5505 = vmatpush.bf16.msra.mxu2 %v8037_v46  ;;  %v7653_v46 = vor.u32 %v8703_v40, %v7650_v57  ;;  %v7881_v24 = vor.u32 %v8763_v15, %v7880_v31 }
 0x4b0   : > { %5608 = vmatpush.bf16.msrb.mxu0 %v8073_v35  ;;  %v4400_v35 = vperm.slane %v12670_v43, 0 }
 0x4b1   : > { %5659 = vmatpush.bf16.msra.mxu3 %v8105_v38  ;;  %5557 = vmatpush.bf16.msrb.mxu1 %v8041_v59  ;;  %v8714_v38 = vld [vmem:[%s12806_s12 + $0x110] sm:$0xf0]  ;;  %v8689_v59 = vld [vmem:[%s12806_s12 + $0x4c] sm:$0xf] }
 0x4b2   : > { %v7597_v30 = vor.u32 %v8689_v59, %v7594_v60 }
 0x4b3   : > { %5506 = vmatpush.bf16.msra.mxu2 %v8009_v39  ;;  %v7629_v39 = vor.u32 %v8700_v56, %v7628_v19  ;;  %v4401_v19 = vperm.slane %v12670_v43, 1 }
 0x4b4   : > { %5609 = vmatpush.bf16.msrb.mxu0 %v8045_v62  ;;  %v7992_v62 = vld [vmem:[%s12806_s12 + $0x360] sm:$0xf] }
 0x4b5   : > { %5660 = vmatpush.bf16.msra.mxu3 %v8077_v50  ;;  %5558 = vmatpush.bf16.msrb.mxu1 %v8013_v5  ;;  %v7657_v50 = vor.u32 %v8707_v34, %v7656_v48 }
 0x4b6   : > { %5507 = vmatmul.bf16.vlgmr.msra.gmra.mxu2 %v12056_v51 }
 0x4b7   : > { %5571 = vmatpush.bf16.msrb.mxu2 %v8237_v1  ;;  %v8693_v1 = vld [vmem:[%s12806_s12 + $0x68] sm:$0xf0] }
 0x4b8   : > { %5610 = vmatpush.bf16.msrb.mxu0 %v8017_v7  ;;  %5559 = vmatmul.bf16.vlgmr.msrb.gmra.mxu1 %v12056_v51  ;;  %v7908_v7 = vld [vmem:[%s12806_s12 + $0x2b8] sm:$0xf] }
 0x4b9   : > { %5661 = vmatpush.bf16.msra.mxu3 %v8049_v4  ;;  %5623 = vmatpush.bf16.msra.mxu1 %v8241_v45  ;;  %v7601_v4 = vor.u32 %v8693_v1, %v7600_v63 }
 0x4bb   : > { %5577 = vmatpush.bf16.msra.mxu2 %v7765_v10  ;;  %5611 = vmatmul.bf16.vlgmr.msrb.gmra.mxu0 %v12056_v51  ;;  %v8784_v10 = vld [vmem:[%s12806_s12 + $0x340] sm:$0xf0] }
 0x4bc   : > { %5675 = vmatpush.bf16.msra.mxu0 %v8245_v21  ;;  %v5326_v28 = vpop.f32.mrf.mxu3  ;;  %v7965_v25 = vor.u32 %v8784_v10, %v7964_v9 }
 0x4bd   : > { %5662 = vmatpush.bf16.msra.mxu3 %v8021_v11  ;;  %5629 = vmatpush.bf16.msrb.mxu1 %v7769_v22  ;;  %v5327_v58 = vadd.f32 %v5326_v28, %v4400_v35  ;;  %v8770_v11 = vld [vmem:[%s12806_s12 + $0x2d0] sm:$0xf0] }
 0x4be   : > { %v7909_v23 = vor.u32 %v8770_v11, %v7908_v7 }
 0x4bf   : > { %5578 = vmatpush.bf16.msra.mxu2 %v7737_v18 }
 0x4c0   : > { %5663 = vmatmul.bf16.vlgmr.msra.gmra.mxu3 %v12056_v51  ;;  %v7684_v51 = vld [vmem:[%s12806_s12 + $0xf8] sm:$0xf] }
 0x4c1   : > { %5630 = vmatpush.bf16.msrb.mxu1 %v7741_v20  ;;  %v7685_v44 = vor.u32 %v8714_v38, %v7684_v51  ;;  %v7852_v20 = vld [vmem:[%s12806_s12 + $0x248] sm:$0xf]  ;;  %v7796_v51 = vld [vmem:[%s12806_s12 + $0x1d8] sm:$0xf]  ;;  %v8742_v38 = vld [vmem:[%s12806_s12 + $0x1f0] sm:$0xf0] }
 0x4c2   : > { %v7797_v57 = vor.u32 %v8742_v38, %v7796_v51  ;;  %v4405_v38 = vperm.slane %v12670_v43, 5 }
 0x4c3   : > { %5579 = vmatpush.bf16.msra.mxu2 %v7709_v26 }
 0x4c4   : > { %v5328_v61 = vpop.f32.mrf.mxu3 }
 0x4c5   : > { %5631 = vmatpush.bf16.msrb.mxu1 %v7713_v17  ;;  %v8749_v17 = vld [vmem:[%s12806_s12 + $0x228] sm:$0xf0] }
 0x4c6   : > { %8250 = vmatmul.msk.bf16.vlgmr.msrb.gmra.mxu2 %vm1761_vm0, %v12189_v52 }
 0x4c7   : > { %5580 = vmatpush.bf16.msra.mxu2 %v7681_v37  ;;  %v5339_v42 = vpop.f32.mrf.mxu0  ;;  %v7825_v37 = vor.u32 %v8749_v17, %v7824_v33 }
 0x4c8   : > { %8251 = vmatmul.msk.bf16.vlgmr.msra.gmra.mxu1 %vm1761_vm0, %v12189_v52  ;;  %v12715_v0 = vadd.f32 %v5339_v42, %v5327_v58 }
 0x4c9   : > { %5632 = vmatpush.bf16.msrb.mxu1 %v7685_v44 }
 0x4cb   : > { %5581 = vmatpush.bf16.msra.mxu2 %v7653_v46  ;;  %8252 = vmatmul.msk.bf16.vlgmr.msra.gmra.mxu0 %vm1761_vm0, %v12189_v52  ;;  %v8791_v52 = vld [vmem:[%s12806_s12 + $0x378] sm:$0xf0] }
 0x4cc   : > { %v7993_v5 = vor.u32 %v8791_v52, %v7992_v62  ;;  %v4402_v52 = vperm.slane %v12670_v43, 2 }
 0x4cd   : > { %5633 = vmatpush.bf16.msrb.mxu1 %v7657_v50  ;;  %v5391_v45 = vpop.f32.mrf.mxu3 }
 0x4cf   : > { %5582 = vmatpush.bf16.msra.mxu2 %v7625_v54  ;;  %v5341_v55 = vpop.f32.mrf.mxu0 }
 0x4d1   : > { %5634 = vmatpush.bf16.msrb.mxu1 %v7629_v39 }
 0x4d3   : > { %5583 = vmatpush.bf16.msra.mxu2 %v7597_v30 }
 0x4d5   : > { %5635 = vmatpush.bf16.msrb.mxu1 %v7601_v4  ;;  %v5352_v21 = vpop.f32.mrf.mxu1  ;;  %v5393_v22 = vpop.f32.mrf.mxu3 }
 0x4d7   : > { %5584 = vmatpush.bf16.msra.mxu2 %v7569_v53  ;;  %v5404_v18 = vpop.f32.mrf.mxu0 }
 0x4d9   : > { %5636 = vmatpush.bf16.msrb.mxu1 %v7573_v47 }
 0x4da   : > { %5585 = vmatmul.bf16.vlgmr.msra.gmra.mxu2 %v11932_v12 }
 0x4db   : > { %5642 = vmatpush.bf16.msrb.mxu2 %v7993_v5 }
 0x4dc   : > { %5637 = vmatmul.bf16.vlgmr.msrb.gmra.mxu1 %v11932_v12  ;;  %v8756_v12 = vld [vmem:[%s12806_s12 + $0x260] sm:$0xf0] }
 0x4dd   : > { %v5354_v26 = vpop.f32.mrf.mxu1  ;;  %v5456_v27 = vpop.f32.mrf.mxu3  ;;  %v7853_v32 = vor.u32 %v8756_v12, %v7852_v20 }
 0x4df   : > { %5643 = vmatpush.bf16.msrb.mxu2 %v7965_v25  ;;  %v5406_v29 = vpop.f32.mrf.mxu0 }
 0x4e3   : > { %5644 = vmatpush.bf16.msrb.mxu2 %v7937_v16  ;;  %v4403_v16 = vperm.slane %v12670_v43, 3 }
 0x4e5   : > { %v5458_v40 = vpop.f32.mrf.mxu3 }
 0x4e7   : > { %5645 = vmatpush.bf16.msrb.mxu2 %v7909_v23 }
 0x4eb   : > { %5646 = vmatpush.bf16.msrb.mxu2 %v7881_v24 }
 0x4ef   : > { %5647 = vmatpush.bf16.msrb.mxu2 %v7853_v32 }
 0x4f3   : > { %5648 = vmatpush.bf16.msrb.mxu2 %v7825_v37  ;;  %v5417_v28 = vpop.f32.mrf.mxu1 }
 0x4f4   : > { %v5469_v44 = vpop.f32.mrf.mxu0 }
 0x4f7   : > { %5649 = vmatpush.bf16.msrb.mxu2 %v7797_v57 }
 0x4f9   : > { %v5365_v46 = vpop.f32.mrf.mxu2 }
 0x4fa   : > { %5650 = vmatmul.bf16.vlgmr.msrb.gmra.mxu2 %v11995_v41  ;;  %v5353_v41 = vadd.f32 %v5352_v21, %v12715_v0 }
 0x4fb   : > { %v5521_v48 = vpop.f32.mrf.mxu3  ;;  %v5419_v34 = vpop.f32.mrf.mxu1 }
 0x4fc   : > { %v5471_v49 = vpop.f32.mrf.mxu0  ;;  %v5366_v63 = vadd.f32 %v5365_v46, %v5353_v41 }
 0x501   : > { %v5367_v36 = vpop.f32.mrf.mxu2 }
 0x503   : > { %v5523_v35 = vpop.f32.mrf.mxu3  ;;  %v5430_v50 = vpop.f32.mrf.mxu1 }
 0x504   : > { %v5482_v54 = vpop.f32.mrf.mxu0  ;;  %v5431_v0 = vadd.f32 %v5430_v50, %v4402_v52 }
 0x505   : > { %v5483_v7 = vadd.f32 %v5482_v54, %v4403_v16  ;;  %v4406_v54 = vperm.slane %v12670_v43, 6 }
 0x509   : > { %v5378_v56 = vpop.f32.mrf.mxu2 }
 0x50a   : > { %v5379_v59 = vadd.f32 %v5378_v56, %v4401_v19 }
 0x50b   : > { %v5534_v60 = vpop.f32.mrf.mxu3  ;;  %v5432_v61 = vpop.f32.mrf.mxu1 }
 0x50c   : > { %v5392_v58 = vadd.f32 %v5391_v45, %v5379_v59  ;;  %v5484_v39 = vpop.f32.mrf.mxu0  ;;  %v5535_v53 = vadd.f32 %v5534_v60, %v4404_v3 }
 0x50e   : > { %v5405_v30 = vadd.f32 %v5404_v18, %v5392_v58 }
 0x510   : > { %v5418_v42 = vadd.f32 %v5417_v28, %v5405_v30 }
 0x511   : > { %v5380_v1 = vpop.f32.mrf.mxu2 }
 0x512   : > { %v5681_v2 = vpack.c.bf16 %v5418_v42, %v5366_v63 }
 0x513   : > { %v5536_v62 = vpop.f32.mrf.mxu3 }
 0x514   : > { %5685 = vst [vmem:[%s12780_s26] sm:$0xff] %v5681_v2 }
 0x515   : > { %v5495_v4 = vpop.f32.mrf.mxu1 }
 0x516   : > { %v5496_v21 = vadd.f32 %v5495_v4, %v5483_v7 }
 0x518   : > { %v5547_v5 = vpop.f32.mrf.mxu0 }
 0x519   : > { %v5548_v6 = vadd.f32 %v5547_v5, %v5535_v53  ;;  %v5443_v8 = vpop.f32.mrf.mxu2 }
 0x51a   : > { %v5444_v9 = vadd.f32 %v5443_v8, %v5431_v0 }
 0x51c   : > { %v5457_v10 = vadd.f32 %v5456_v27, %v5444_v9 }
 0x51d   : > { %v5497_v47 = vpop.f32.mrf.mxu1 }
 0x51e   : > { %v5470_v45 = vadd.f32 %v5469_v44, %v5457_v10 }
 0x520   : > { %v5549_v25 = vpop.f32.mrf.mxu0 }
 0x521   : > { %v5445_v13 = vpop.f32.mrf.mxu2 }
 0x523   : > { %v5599_v55 = vpop.f32.mrf.mxu3 }
 0x52b   : > { %v5601_v14 = vpop.f32.mrf.mxu3 }
 0x535   : > { %v5560_v11 = vpop.f32.mrf.mxu1 }
 0x536   : > { %v5561_v46 = vadd.f32 %v5560_v11, %v5548_v6 }
 0x538   : > { %v5612_v22 = vpop.f32.mrf.mxu0 }
 0x539   : > { %v5508_v18 = vpop.f32.mrf.mxu2 }
 0x53a   : > { %v5509_v23 = vadd.f32 %v5508_v18, %v5496_v21 }
 0x53c   : > { %v5522_v31 = vadd.f32 %v5521_v48, %v5509_v23 }
 0x53d   : > { %v5562_v24 = vpop.f32.mrf.mxu1 }
 0x53e   : > { %v5682_v15 = vpack.c.bf16 %v5522_v31, %v5470_v45 }
 0x540   : > { %5686 = vst [vmem:[%s12780_s26 + $0x8] sm:$0xff] %v5682_v15  ;;  %v5614_v12 = vpop.f32.mrf.mxu0 }
 0x541   : > { %v5510_v26 = vpop.f32.mrf.mxu2 }
 0x543   : > { %v5664_v20 = vpop.f32.mrf.mxu3 }
 0x545   : > { %v5625_v27 = vpop.f32.mrf.mxu1 }
 0x548   : > { %v5677_v32 = vpop.f32.mrf.mxu0 }
 0x549   : > { %v5573_v33 = vpop.f32.mrf.mxu2 }
 0x54a   : > { %v5574_v49 = vadd.f32 %v5573_v33, %v5561_v46 }
 0x54b   : > { %v5666_v29 = vpop.f32.mrf.mxu3 }
 0x54d   : > { %v5627_v17 = vpop.f32.mrf.mxu1 }
 0x550   : > { %v5679_v37 = vpop.f32.mrf.mxu0 }
 0x551   : > { %v5575_v51 = vpop.f32.mrf.mxu2 }
 0x559   : > { %v5638_v40 = vpop.f32.mrf.mxu1 }
 0x55a   : > { %v5639_v19 = vadd.f32 %v5638_v40, %v4406_v54 }
 0x55d   : > { %v5586_v57 = vpop.f32.mrf.mxu2 }
 0x55e   : > { %v5587_v28 = vadd.f32 %v5586_v57, %v4405_v38 }
 0x560   : > { %v5600_v44 = vadd.f32 %v5599_v55, %v5587_v28 }
 0x561   : > { %v5640_v34 = vpop.f32.mrf.mxu1 }
 0x562   : > { %v5613_v48 = vadd.f32 %v5612_v22, %v5600_v44 }
 0x564   : > { %v5626_v36 = vadd.f32 %v5625_v27, %v5613_v48 }
 0x565   : > { %v5588_v35 = vpop.f32.mrf.mxu2 }
 0x566   : > { %v5683_v50 = vpack.c.bf16 %v5626_v36, %v5574_v49 }
 0x568   : > { %5687 = vst [vmem:[%s12780_s26 + $0x10] sm:$0xff] %v5683_v50 }
 0x57d   : > { %v5651_v56 = vpop.f32.mrf.mxu2 }
 0x57e   : > { %v5652_v59 = vadd.f32 %v5651_v56, %v5639_v19 }
 0x580   : > { %v5665_v60 = vadd.f32 %v5664_v20, %v5652_v59 }
 0x582   : > { %v5678_v61 = vadd.f32 %v5677_v32, %v5665_v60 }
 0x584   : > { %v5684_v58 = vpack.c.bf16 %v5678_v61, %v5678_v61 }
 0x585   : > { %v5653_v39 = vpop.f32.mrf.mxu2 }
 0x586   : > { %5689 = vst.msk [vmem:[%s12780_s26 + $0x18] sm:$0xf] %vm5688_vm5, %v5684_v58 }
 0x587 PF: > { %s27_s21 = sadd.s32 1, %s8876_s21  }
 0x588   : > { %p24_p4 = scmp.ge.s32.totalorder %s27_s21, 4  }
 0x58a   :  { %26 = sbr.rel (!%p24_p4) target bundleno = 2 (0x2), region = 133 }

</bundles_post_ra>
